<compile_context>
chip_gen: v7x
topology: tpu7x:2x2x1
jax: 0.10.0
libtpu: 0.0.40
codegen_flags: <defaults>
</compile_context>

<pallas_src>
import functools

import numpy as np
import jax
import jax.numpy as jnp
from jax.experimental import pallas as pl
from jax.experimental.pallas import tpu as pltpu

NUM_CLASSES = 10
BN_EPS = 1e-5
KSIZE = 5
VMEM_LIMIT = 32 * 1024 * 1024


def _round_up(n, m):
    return ((n + m - 1) // m) * m


def _cdiv(a, b):
    return (a + b - 1) // b


# ---------------------------------------------------------------------------
# Pallas kernels
# ---------------------------------------------------------------------------
def _conv_bn_relu_pool_kernel(x_ref, w_ref, s_ref, o_ref, *, k, hpe, ho, woc, wocp):
    """Fused conv(kxk, pad=(k-1)/2) + BN(eval) + ReLU + 2x2 maxpool for a tile of TB images.

    x_ref: (TB, Hp, Wp*Cin) bf16 padded input, rows H-deinterleaved: rows [0:hpe) are the even
           padded rows, rows [hpe:2*hpe) the odd ones.  Lane axis = merged (W, Cin), C fastest.
    w_ref: (k, Wp*Cin, 2*wocp) bf16 banded conv weight (BN scale folded into columns); columns
           ordered (w-pool phase, pooled col q, Cout), zero-padded from woc to wocp per phase.
    s_ref: (1, woc) f32 BN shift (+ conv bias), tiled over the pooled columns.
    o_ref: (TB, ho, woc) pooled output, layout (row, (col, Cout)) channel-fastest.
    """
    tb = x_ref.shape[0]
    for b in range(tb):                       # static unroll over the images of this tile
        a0 = jnp.zeros((ho, 2 * wocp), jnp.float32)   # conv rows 2r   (H-pool phase 0)
        a1 = jnp.zeros((ho, 2 * wocp), jnp.float32)   # conv rows 2r+1 (H-pool phase 1)
        for kh in range(k):
            w_kh = w_ref[kh]                  # (Wp*Cin, 2*wocp) bf16
            # Row offsets into the deinterleaved input for padded rows (2r+a+kh):
            if kh % 2 == 0:
                s0, s1 = kh // 2, hpe + kh // 2
            else:
                s0, s1 = hpe + (kh - 1) // 2, (kh + 1) // 2
            a0 = a0 + jnp.dot(x_ref[b, s0:s0 + ho, :], w_kh,
                              preferred_element_type=jnp.float32)
            a1 = a1 + jnp.dot(x_ref[b, s1:s1 + ho, :], w_kh,
                              preferred_element_type=jnp.float32)
        m = jnp.maximum(a0, a1)                        # max-pool over the two H phases
        m = jnp.maximum(m[:, :wocp], m[:, wocp:])      # max-pool over the two W phases (128-aligned)
        o_ref[b] = jnp.maximum(m[:, :woc] + s_ref[...], 0.0).astype(o_ref.dtype)


def _gate_fc_kernel(f_ref, g_ref, w_ref, b_ref, enc_ref, out_ref):
    """encoder = features * gate ; logits = features @ (gate-folded Wfc) + bfc.
    The gate is pre-folded into w_ref, so the MXU dot does not wait on the VPU product."""
    f = f_ref[...]
    enc_ref[...] = f * g_ref[...]
    out_ref[...] = (jnp.dot(f.astype(jnp.bfloat16), w_ref[...],
                            preferred_element_type=jnp.float32) + b_ref[...])


# ---------------------------------------------------------------------------
# Wrappers around pallas_call
# ---------------------------------------------------------------------------
def _conv_layer(x_de, wband, shift_row, *, ho, woc, tb, out_dtype):
    """x_de: (Bp, Hp, Wp*Cin) bf16 (deinterleaved), wband: (k, Wp*Cin, 2*wocp) f32,
    shift_row: (1, woc) f32  ->  (Bp, ho, woc) pooled activations."""
    bp, hp, lcin = x_de.shape
    k = wband.shape[0]
    two_wocp = wband.shape[2]
    kernel = functools.partial(_conv_bn_relu_pool_kernel,
                               k=k, hpe=hp // 2, ho=ho, woc=woc, wocp=two_wocp // 2)
    return pl.pallas_call(
        kernel,
        out_shape=jax.ShapeDtypeStruct((bp, ho, woc), out_dtype),
        grid=(bp // tb,),
        in_specs=[
            pl.BlockSpec((tb, hp, lcin), lambda i: (i, 0, 0)),
            pl.BlockSpec((k, lcin, two_wocp), lambda i: (0, 0, 0)),
            pl.BlockSpec((1, woc), lambda i: (0, 0)),
        ],
        out_specs=pl.BlockSpec((tb, ho, woc), lambda i: (i, 0, 0)),
        compiler_params=pltpu.CompilerParams(
            dimension_semantics=("parallel",),
            vmem_limit_bytes=VMEM_LIMIT,
        ),
    )(x_de.astype(jnp.bfloat16), wband.astype(jnp.bfloat16),
      shift_row.astype(jnp.float32))


def _gate_fc(features, gate, w_fc, b_fc, *, tb):
    """features: (Bp, D) f32, gate: (D,), w_fc: (NC, D), b_fc: (NC,) -> ((Bp, D), (Bp, NC))."""
    bp, d = features.shape
    nc = w_fc.shape[0]
    w_eff = (gate[:, None] * jnp.transpose(w_fc)).astype(jnp.bfloat16)   # gate folded into Wfc
    return pl.pallas_call(
        _gate_fc_kernel,
        out_shape=(
            jax.ShapeDtypeStruct((bp, d), jnp.float32),
            jax.ShapeDtypeStruct((bp, nc), jnp.float32),
        ),
        grid=(bp // tb,),
        in_specs=[
            pl.BlockSpec((tb, d), lambda i: (i, 0)),
            pl.BlockSpec((1, d), lambda i: (0, 0)),
            pl.BlockSpec((d, nc), lambda i: (0, 0)),
            pl.BlockSpec((1, nc), lambda i: (0, 0)),
        ],
        out_specs=(
            pl.BlockSpec((tb, d), lambda i: (i, 0)),
            pl.BlockSpec((tb, nc), lambda i: (i, 0)),
        ),
        compiler_params=pltpu.CompilerParams(
            dimension_semantics=("parallel",),
            vmem_limit_bytes=VMEM_LIMIT,
        ),
    )(features, gate.reshape(1, d).astype(jnp.float32), w_eff,
      b_fc.reshape(1, nc).astype(jnp.float32))


# ---------------------------------------------------------------------------
# XLA glue (all on tiny tensors: weights + raw activations, no 25x expansion)
# ---------------------------------------------------------------------------
def _build_banded_weight(w_oihw, scale, W, k=KSIZE):
    """Banded conv weight for the in-kernel conv:  conv_rows = x_rows(H, Wp*Cin) @ Wband[kh].
    Column index = pw*wocp + q*Cout + co (w-pool phase major), BN scale folded in."""
    cout, cin, _, _ = w_oihw.shape
    wo, wp = W // 2, W + k - 1
    wocp = _round_up(wo * cout, 128)
    wt = jnp.transpose(w_oihw, (2, 3, 1, 0)) * scale[None, None, None, :]   # (kh, kw, ci, co)
    # Static 0/1 scatter: g[v*Cin+ci, kw, ci, pw, q] = 1  iff  v == 2*q + pw + kw.
    g = np.zeros((wp * cin, k, cin, 2, wo), np.float32)
    for kw in range(k):
        for pw in range(2):
            for q in range(wo):
                v = 2 * q + pw + kw
                g[v * cin:(v + 1) * cin, kw, :, pw, q] = np.eye(cin, dtype=np.float32)
    wband = jnp.einsum('lkcpq,hkcd->hlpqd', jnp.asarray(g), wt)   # (kh, Wp*Cin, 2, Wo, Cout)
    wband = wband.reshape(k, wp * cin, 2, wo * cout)
    wband = jnp.pad(wband, ((0, 0), (0, 0), (0, 0), (0, wocp - wo * cout)))
    return wband.reshape(k, wp * cin, 2 * wocp)


def _deinterleave_rows(x):
    # [r0, r1, r2, ...] -> [r0, r2, ..., r1, r3, ...] along axis 1 (tiny XLA copy).
    return jnp.concatenate([x[:, 0::2, :], x[:, 1::2, :]], axis=1)


def _bn_affine(gamma, beta, mean, var, conv_bias, eps=BN_EPS):
    scale = gamma / jnp.sqrt(var + eps)
    shift = beta + scale * (conv_bias - mean)
    return scale, shift


def convnet_gate_forward(x_nchw, params):
    B = x_nchw.shape[0]
    # Batch tile: <=8 images per grid step, and grid length >= 2 whenever B >= 2 (v7x megacore).
    tb = 1 if B <= 1 else min(8, _cdiv(B, 2))
    bp = _round_up(B, tb)

    # ---- layer1: Conv2d(1,16,5,pad=2) + BN + ReLU + MaxPool(2) ----
    s1, t1 = _bn_affine(params["bn1_gamma"], params["bn1_beta"],
                        params["bn1_mean"], params["bn1_var"], params["b1"])
    wband1 = _build_banded_weight(params["w1"], s1, W=28)        # (5, 32, 512)
    shift1 = jnp.tile(t1, 14).reshape(1, 14 * 16)                # (1, 224)
    x = x_nchw.reshape(B, 28, 28).astype(jnp.bfloat16)
    x = jnp.pad(x, ((0, bp - B), (2, 2), (2, 2)))                # batch + spatial zero pad
    x = _deinterleave_rows(x)                                    # (bp, 32, 32) bf16
    y1 = _conv_layer(x, wband1, shift1, ho=14, woc=14 * 16, tb=tb,
                     out_dtype=jnp.bfloat16)                     # (bp, 14, 224) bf16

    # ---- layer2: Conv2d(16,32,5,pad=2) + BN + ReLU + MaxPool(2) ----
    s2, t2 = _bn_affine(params["bn2_gamma"], params["bn2_beta"],
                        params["bn2_mean"], params["bn2_var"], params["b2"])
    wband2 = _build_banded_weight(params["w2"], s2, W=14)        # (5, 288, 512)
    shift2 = jnp.tile(t2, 7).reshape(1, 7 * 32)                  # (1, 224)
    y1p = jnp.pad(y1, ((0, 0), (2, 2), (2 * 16, 2 * 16)))        # spatial pad in merged (W, C)
    y1p = _deinterleave_rows(y1p)                                # (bp, 18, 288) bf16
    y2 = _conv_layer(y1p, wband2, shift2, ho=7, woc=7 * 32, tb=tb,
                     out_dtype=jnp.float32)                      # (bp, 7, 224) f32

    # ---- flatten in PyTorch NCHW order, gate3, fc ----
    feat = jnp.transpose(y2.reshape(bp, 7, 7, 32), (0, 3, 1, 2)).reshape(bp, 7 * 7 * 32)
    tb_fc = min(512, max(8, _round_up(_cdiv(bp, 2), 8)))
    bp_fc = _round_up(bp, tb_fc)
    if bp_fc != bp:
        feat = jnp.pad(feat, ((0, bp_fc - bp), (0, 0)))
    enc, logits = _gate_fc(feat, params["gate"], params["w_fc"], params["b_fc"], tb=tb_fc)
    return enc[:B], logits[:B]


# ---------------------------------------------------------------------------
# Parameters (PyTorch-native layouts) and demo
# ---------------------------------------------------------------------------
def init_params(key, num_classes=NUM_CLASSES):
    ks = jax.random.split(key, 16)
    p = {}
    p["w1"] = 0.1 * jax.random.normal(ks[0], (16, 1, 5, 5))      # Conv2d OIHW
    p["b1"] = 0.05 * jax.random.normal(ks[1], (16,))
    p["bn1_gamma"] = 1.0 + 0.1 * jax.random.normal(ks[2], (16,))
    p["bn1_beta"] = 0.1 * jax.random.normal(ks[3], (16,))
    p["bn1_mean"] = 0.1 * jax.random.normal(ks[4], (16,))
    p["bn1_var"] = jnp.abs(1.0 + 0.1 * jax.random.normal(ks[5], (16,)))
    p["w2"] = 0.05 * jax.random.normal(ks[6], (32, 16, 5, 5))
    p["b2"] = 0.05 * jax.random.normal(ks[7], (32,))
    p["bn2_gamma"] = 1.0 + 0.1 * jax.random.normal(ks[8], (32,))
    p["bn2_beta"] = 0.1 * jax.random.normal(ks[9], (32,))
    p["bn2_mean"] = 0.1 * jax.random.normal(ks[10], (32,))
    p["bn2_var"] = jnp.abs(1.0 + 0.1 * jax.random.normal(ks[11], (32,)))
    p["gate"] = 1.0 + 0.05 * jax.random.normal(ks[12], (7 * 7 * 32,))
    p["w_fc"] = 0.02 * jax.random.normal(ks[13], (num_classes, 7 * 7 * 32))  # Linear (out, in)
    p["b_fc"] = jnp.zeros((num_classes,))
    return {k: v.astype(jnp.float32) for k, v in p.items()}


if __name__ == "__main__":
    key = jax.random.PRNGKey(0)
    k_x, k_p = jax.random.split(key)
    # MNIST-shaped input: batch=2, 1 channel, 28x28 (NCHW, as PyTorch expects)
    x = jax.random.normal(k_x, (2, 1, 28, 28), dtype=jnp.float32)
    params = init_params(k_p)

    encoder, output = jax.jit(convnet_gate_forward)(x, params)
    jax.block_until_ready((encoder, output))

    assert encoder.shape == (2, 7 * 7 * 32)
    assert output.shape == (2, NUM_CLASSES)
    print("KERNEL_OK")
</pallas_src>

<mosaic_0001>
module attributes {stable_mosaic.version = 11 : i64} {
  func.func @_conv_bn_relu_pool_kernel(%arg0: i32, %arg1: memref<1x32x32xbf16, #tpu.memory_space<vmem>>, %arg2: memref<5x32x512xbf16, #tpu.memory_space<vmem>>, %arg3: memref<1x224xf32, #tpu.memory_space<vmem>>, %arg4: memref<1x14x224xbf16, #tpu.memory_space<vmem>>) attributes {dimension_semantics = [#tpu.dimension_semantics<parallel>], iteration_bounds = array<i64: 2>, scalar_prefetch = 0 : i64, scratch_operands = 0 : i64, tpu.core_type = #tpu.core_type<tc>, window_params = [{transform_indices = @transform_0, window_bounds = array<i64: 1, 32, 32>}, {pipeline_mode = #tpu.pipeline_mode<synchronous>, transform_indices = @transform_1, window_bounds = array<i64: 5, 32, 512>}, {pipeline_mode = #tpu.pipeline_mode<synchronous>, transform_indices = @transform_2, window_bounds = array<i64: 1, 224>}, {transform_indices = @transform_3, window_bounds = array<i64: 1, 14, 224>}]} {
    %cst = arith.constant 0.000000e+00 : f32
    %0 = vector.broadcast %cst : f32 to vector<14x512xf32>
    %cst_0 = arith.constant 0.000000e+00 : f32
    %1 = vector.broadcast %cst_0 : f32 to vector<14x512xf32>
    %c0 = arith.constant 0 : index
    %c0_1 = arith.constant 0 : index
    %c0_2 = arith.constant 0 : index
    %2 = vector.load %arg2[%c0, %c0_1, %c0_2] : memref<5x32x512xbf16, #tpu.memory_space<vmem>>, vector<1x32x512xbf16>
    %3 = vector.shape_cast %2 : vector<1x32x512xbf16> to vector<32x512xbf16>
    %c0_3 = arith.constant 0 : index
    %c0_4 = arith.constant 0 : index
    %c0_5 = arith.constant 0 : index
    %4 = vector.load %arg1[%c0_3, %c0_4, %c0_5] : memref<1x32x32xbf16, #tpu.memory_space<vmem>>, vector<1x14x32xbf16>
    %5 = vector.shape_cast %4 : vector<1x14x32xbf16> to vector<14x32xbf16>
    %cst_6 = arith.constant dense<0.000000e+00> : vector<14x512xf32>
    %6 = tpu.matmul %5, %3, %cst_6 {dimension_numbers = #tpu.dot_dimension_numbers<[1], [0], [0], [1], [0, 0, 1, 1], [], []>} : vector<14x32xbf16>, vector<32x512xbf16>, vector<14x512xf32> -> vector<14x512xf32>
    %7 = arith.addf %0, %6 : vector<14x512xf32>
    %c0_7 = arith.constant 0 : index
    %c16 = arith.constant 16 : index
    %c0_8 = arith.constant 0 : index
    %8 = vector.load %arg1[%c0_7, %c16, %c0_8] : memref<1x32x32xbf16, #tpu.memory_space<vmem>>, vector<1x14x32xbf16>
    %9 = vector.shape_cast %8 : vector<1x14x32xbf16> to vector<14x32xbf16>
    %cst_9 = arith.constant dense<0.000000e+00> : vector<14x512xf32>
    %10 = tpu.matmul %9, %3, %cst_9 {dimension_numbers = #tpu.dot_dimension_numbers<[1], [0], [0], [1], [0, 0, 1, 1], [], []>} : vector<14x32xbf16>, vector<32x512xbf16>, vector<14x512xf32> -> vector<14x512xf32>
    %11 = arith.addf %1, %10 : vector<14x512xf32>
    %c1 = arith.constant 1 : index
    %c0_10 = arith.constant 0 : index
    %c0_11 = arith.constant 0 : index
    %12 = vector.load %arg2[%c1, %c0_10, %c0_11] : memref<5x32x512xbf16, #tpu.memory_space<vmem>>, vector<1x32x512xbf16>
    %13 = vector.shape_cast %12 : vector<1x32x512xbf16> to vector<32x512xbf16>
    %c0_12 = arith.constant 0 : index
    %c16_13 = arith.constant 16 : index
    %c0_14 = arith.constant 0 : index
    %14 = vector.load %arg1[%c0_12, %c16_13, %c0_14] : memref<1x32x32xbf16, #tpu.memory_space<vmem>>, vector<1x14x32xbf16>
    %15 = vector.shape_cast %14 : vector<1x14x32xbf16> to vector<14x32xbf16>
    %cst_15 = arith.constant dense<0.000000e+00> : vector<14x512xf32>
    %16 = tpu.matmul %15, %13, %cst_15 {dimension_numbers = #tpu.dot_dimension_numbers<[1], [0], [0], [1], [0, 0, 1, 1], [], []>} : vector<14x32xbf16>, vector<32x512xbf16>, vector<14x512xf32> -> vector<14x512xf32>
    %17 = arith.addf %7, %16 : vector<14x512xf32>
    %c0_16 = arith.constant 0 : index
    %c1_17 = arith.constant 1 : index
    %c0_18 = arith.constant 0 : index
    %18 = vector.load %arg1[%c0_16, %c1_17, %c0_18] : memref<1x32x32xbf16, #tpu.memory_space<vmem>>, vector<1x14x32xbf16>
    %19 = vector.shape_cast %18 : vector<1x14x32xbf16> to vector<14x32xbf16>
    %cst_19 = arith.constant dense<0.000000e+00> : vector<14x512xf32>
    %20 = tpu.matmul %19, %13, %cst_19 {dimension_numbers = #tpu.dot_dimension_numbers<[1], [0], [0], [1], [0, 0, 1, 1], [], []>} : vector<14x32xbf16>, vector<32x512xbf16>, vector<14x512xf32> -> vector<14x512xf32>
    %21 = arith.addf %11, %20 : vector<14x512xf32>
    %c2 = arith.constant 2 : index
    %c0_20 = arith.constant 0 : index
    %c0_21 = arith.constant 0 : index
    %22 = vector.load %arg2[%c2, %c0_20, %c0_21] : memref<5x32x512xbf16, #tpu.memory_space<vmem>>, vector<1x32x512xbf16>
    %23 = vector.shape_cast %22 : vector<1x32x512xbf16> to vector<32x512xbf16>
    %c0_22 = arith.constant 0 : index
    %c1_23 = arith.constant 1 : index
    %c0_24 = arith.constant 0 : index
    %24 = vector.load %arg1[%c0_22, %c1_23, %c0_24] : memref<1x32x32xbf16, #tpu.memory_space<vmem>>, vector<1x14x32xbf16>
    %25 = vector.shape_cast %24 : vector<1x14x32xbf16> to vector<14x32xbf16>
    %cst_25 = arith.constant dense<0.000000e+00> : vector<14x512xf32>
    %26 = tpu.matmul %25, %23, %cst_25 {dimension_numbers = #tpu.dot_dimension_numbers<[1], [0], [0], [1], [0, 0, 1, 1], [], []>} : vector<14x32xbf16>, vector<32x512xbf16>, vector<14x512xf32> -> vector<14x512xf32>
    %27 = arith.addf %17, %26 : vector<14x512xf32>
    %c0_26 = arith.constant 0 : index
    %c17 = arith.constant 17 : index
    %c0_27 = arith.constant 0 : index
    %28 = vector.load %arg1[%c0_26, %c17, %c0_27] : memref<1x32x32xbf16, #tpu.memory_space<vmem>>, vector<1x14x32xbf16>
    %29 = vector.shape_cast %28 : vector<1x14x32xbf16> to vector<14x32xbf16>
    %cst_28 = arith.constant dense<0.000000e+00> : vector<14x512xf32>
    %30 = tpu.matmul %29, %23, %cst_28 {dimension_numbers = #tpu.dot_dimension_numbers<[1], [0], [0], [1], [0, 0, 1, 1], [], []>} : vector<14x32xbf16>, vector<32x512xbf16>, vector<14x512xf32> -> vector<14x512xf32>
    %31 = arith.addf %21, %30 : vector<14x512xf32>
    %c3 = arith.constant 3 : index
    %c0_29 = arith.constant 0 : index
    %c0_30 = arith.constant 0 : index
    %32 = vector.load %arg2[%c3, %c0_29, %c0_30] : memref<5x32x512xbf16, #tpu.memory_space<vmem>>, vector<1x32x512xbf16>
    %33 = vector.shape_cast %32 : vector<1x32x512xbf16> to vector<32x512xbf16>
    %c0_31 = arith.constant 0 : index
    %c17_32 = arith.constant 17 : index
    %c0_33 = arith.constant 0 : index
    %34 = vector.load %arg1[%c0_31, %c17_32, %c0_33] : memref<1x32x32xbf16, #tpu.memory_space<vmem>>, vector<1x14x32xbf16>
    %35 = vector.shape_cast %34 : vector<1x14x32xbf16> to vector<14x32xbf16>
    %cst_34 = arith.constant dense<0.000000e+00> : vector<14x512xf32>
    %36 = tpu.matmul %35, %33, %cst_34 {dimension_numbers = #tpu.dot_dimension_numbers<[1], [0], [0], [1], [0, 0, 1, 1], [], []>} : vector<14x32xbf16>, vector<32x512xbf16>, vector<14x512xf32> -> vector<14x512xf32>
    %37 = arith.addf %27, %36 : vector<14x512xf32>
    %c0_35 = arith.constant 0 : index
    %c2_36 = arith.constant 2 : index
    %c0_37 = arith.constant 0 : index
    %38 = vector.load %arg1[%c0_35, %c2_36, %c0_37] : memref<1x32x32xbf16, #tpu.memory_space<vmem>>, vector<1x14x32xbf16>
    %39 = vector.shape_cast %38 : vector<1x14x32xbf16> to vector<14x32xbf16>
    %cst_38 = arith.constant dense<0.000000e+00> : vector<14x512xf32>
    %40 = tpu.matmul %39, %33, %cst_38 {dimension_numbers = #tpu.dot_dimension_numbers<[1], [0], [0], [1], [0, 0, 1, 1], [], []>} : vector<14x32xbf16>, vector<32x512xbf16>, vector<14x512xf32> -> vector<14x512xf32>
    %41 = arith.addf %31, %40 : vector<14x512xf32>
    %c4 = arith.constant 4 : index
    %c0_39 = arith.constant 0 : index
    %c0_40 = arith.constant 0 : index
    %42 = vector.load %arg2[%c4, %c0_39, %c0_40] : memref<5x32x512xbf16, #tpu.memory_space<vmem>>, vector<1x32x512xbf16>
    %43 = vector.shape_cast %42 : vector<1x32x512xbf16> to vector<32x512xbf16>
    %c0_41 = arith.constant 0 : index
    %c2_42 = arith.constant 2 : index
    %c0_43 = arith.constant 0 : index
    %44 = vector.load %arg1[%c0_41, %c2_42, %c0_43] : memref<1x32x32xbf16, #tpu.memory_space<vmem>>, vector<1x14x32xbf16>
    %45 = vector.shape_cast %44 : vector<1x14x32xbf16> to vector<14x32xbf16>
    %cst_44 = arith.constant dense<0.000000e+00> : vector<14x512xf32>
    %46 = tpu.matmul %45, %43, %cst_44 {dimension_numbers = #tpu.dot_dimension_numbers<[1], [0], [0], [1], [0, 0, 1, 1], [], []>} : vector<14x32xbf16>, vector<32x512xbf16>, vector<14x512xf32> -> vector<14x512xf32>
    %47 = arith.addf %37, %46 : vector<14x512xf32>
    %c0_45 = arith.constant 0 : index
    %c18 = arith.constant 18 : index
    %c0_46 = arith.constant 0 : index
    %48 = vector.load %arg1[%c0_45, %c18, %c0_46] : memref<1x32x32xbf16, #tpu.memory_space<vmem>>, vector<1x14x32xbf16>
    %49 = vector.shape_cast %48 : vector<1x14x32xbf16> to vector<14x32xbf16>
    %cst_47 = arith.constant dense<0.000000e+00> : vector<14x512xf32>
    %50 = tpu.matmul %49, %43, %cst_47 {dimension_numbers = #tpu.dot_dimension_numbers<[1], [0], [0], [1], [0, 0, 1, 1], [], []>} : vector<14x32xbf16>, vector<32x512xbf16>, vector<14x512xf32> -> vector<14x512xf32>
    %51 = arith.addf %41, %50 : vector<14x512xf32>
    %52 = arith.maximumf %47, %51 : vector<14x512xf32>
    %53 = vector.extract_strided_slice %52 {offsets = [0, 0], sizes = [14, 256], strides = [1, 1]} : vector<14x512xf32> to vector<14x256xf32>
    %54 = vector.extract_strided_slice %52 {offsets = [0, 256], sizes = [14, 256], strides = [1, 1]} : vector<14x512xf32> to vector<14x256xf32>
    %55 = arith.maximumf %53, %54 : vector<14x256xf32>
    %56 = vector.extract_strided_slice %55 {offsets = [0, 0], sizes = [14, 224], strides = [1, 1]} : vector<14x256xf32> to vector<14x224xf32>
    %c0_48 = arith.constant 0 : index
    %c0_49 = arith.constant 0 : index
    %57 = vector.load %arg3[%c0_48, %c0_49] : memref<1x224xf32, #tpu.memory_space<vmem>>, vector<1x224xf32>
    %58 = vector.broadcast %57 : vector<1x224xf32> to vector<14x224xf32>
    %59 = arith.addf %56, %58 : vector<14x224xf32>
    %cst_50 = arith.constant 0.000000e+00 : f32
    %60 = vector.broadcast %cst_50 : f32 to vector<14x224xf32>
    %61 = arith.maximumf %59, %60 : vector<14x224xf32>
    %62 = arith.truncf %61 : vector<14x224xf32> to vector<14x224xbf16>
    %c0_51 = arith.constant 0 : index
    %c0_52 = arith.constant 0 : index
    %c0_53 = arith.constant 0 : index
    %63 = vector.load %arg4[%c0_51, %c0_52, %c0_53] : memref<1x14x224xbf16, #tpu.memory_space<vmem>>, vector<1x14x224xbf16>
    %64 = vector.shape_cast %63 : vector<1x14x224xbf16> to vector<14x224xbf16>
    %65 = vector.shape_cast %62 : vector<14x224xbf16> to vector<1x14x224xbf16>
    tpu.vector_store %arg4[%c0_51, %c0_52, %c0_53], %65 {strides = array<i32>} : memref<1x14x224xbf16, #tpu.memory_space<vmem>>, vector<1x14x224xbf16>,
    return
  }
  func.func @transform_0(%arg0: i32) -> (i32, i32, i32) {
    %c0_i32 = arith.constant 0 : i32
    %c0_i32_0 = arith.constant 0 : i32
    %c0_i32_1 = arith.constant 0 : i32
    return %arg0, %c0_i32, %c0_i32_0 : i32, i32, i32
  }
  func.func @transform_1(%arg0: i32) -> (i32, i32, i32) {
    %c0_i32 = arith.constant 0 : i32
    %c0_i32_0 = arith.constant 0 : i32
    %c0_i32_1 = arith.constant 0 : i32
    %c0_i32_2 = arith.constant 0 : i32
    return %c0_i32, %c0_i32_0, %c0_i32_1 : i32, i32, i32
  }
  func.func @transform_2(%arg0: i32) -> (i32, i32) {
    %c0_i32 = arith.constant 0 : i32
    %c0_i32_0 = arith.constant 0 : i32
    %c0_i32_1 = arith.constant 0 : i32
    return %c0_i32, %c0_i32_0 : i32, i32
  }
  func.func @transform_3(%arg0: i32) -> (i32, i32, i32) {
    %c0_i32 = arith.constant 0 : i32
    %c0_i32_0 = arith.constant 0 : i32
    %c0_i32_1 = arith.constant 0 : i32
    return %arg0, %c0_i32, %c0_i32_0 : i32, i32, i32
  }
}

module attributes {stable_mosaic.version = 11 : i64} {
  func.func @_conv_bn_relu_pool_kernel(%arg0: i32, %arg1: memref<1x18x288xbf16, #tpu.memory_space<vmem>>, %arg2: memref<5x288x512xbf16, #tpu.memory_space<vmem>>, %arg3: memref<1x224xf32, #tpu.memory_space<vmem>>, %arg4: memref<1x7x224xf32, #tpu.memory_space<vmem>>) attributes {dimension_semantics = [#tpu.dimension_semantics<parallel>], iteration_bounds = array<i64: 2>, scalar_prefetch = 0 : i64, scratch_operands = 0 : i64, tpu.core_type = #tpu.core_type<tc>, window_params = [{transform_indices = @transform_0, window_bounds = array<i64: 1, 18, 288>}, {pipeline_mode = #tpu.pipeline_mode<synchronous>, transform_indices = @transform_1, window_bounds = array<i64: 5, 288, 512>}, {pipeline_mode = #tpu.pipeline_mode<synchronous>, transform_indices = @transform_2, window_bounds = array<i64: 1, 224>}, {transform_indices = @transform_3, window_bounds = array<i64: 1, 7, 224>}]} {
    %cst = arith.constant 0.000000e+00 : f32
    %0 = vector.broadcast %cst : f32 to vector<7x512xf32>
    %cst_0 = arith.constant 0.000000e+00 : f32
    %1 = vector.broadcast %cst_0 : f32 to vector<7x512xf32>
    %c0 = arith.constant 0 : index
    %c0_1 = arith.constant 0 : index
    %c0_2 = arith.constant 0 : index
    %2 = vector.load %arg2[%c0, %c0_1, %c0_2] : memref<5x288x512xbf16, #tpu.memory_space<vmem>>, vector<1x288x512xbf16>
    %3 = vector.shape_cast %2 : vector<1x288x512xbf16> to vector<288x512xbf16>
    %c0_3 = arith.constant 0 : index
    %c0_4 = arith.constant 0 : index
    %c0_5 = arith.constant 0 : index
    %4 = vector.load %arg1[%c0_3, %c0_4, %c0_5] : memref<1x18x288xbf16, #tpu.memory_space<vmem>>, vector<1x7x288xbf16>
    %5 = vector.shape_cast %4 : vector<1x7x288xbf16> to vector<7x288xbf16>
    %cst_6 = arith.constant dense<0.000000e+00> : vector<7x512xf32>
    %6 = tpu.matmul %5, %3, %cst_6 {dimension_numbers = #tpu.dot_dimension_numbers<[1], [0], [0], [1], [0, 0, 1, 1], [], []>} : vector<7x288xbf16>, vector<288x512xbf16>, vector<7x512xf32> -> vector<7x512xf32>
    %7 = arith.addf %0, %6 : vector<7x512xf32>
    %c0_7 = arith.constant 0 : index
    %c9 = arith.constant 9 : index
    %c0_8 = arith.constant 0 : index
    %8 = vector.load %arg1[%c0_7, %c9, %c0_8] : memref<1x18x288xbf16, #tpu.memory_space<vmem>>, vector<1x7x288xbf16>
    %9 = vector.shape_cast %8 : vector<1x7x288xbf16> to vector<7x288xbf16>
    %cst_9 = arith.constant dense<0.000000e+00> : vector<7x512xf32>
    %10 = tpu.matmul %9, %3, %cst_9 {dimension_numbers = #tpu.dot_dimension_numbers<[1], [0], [0], [1], [0, 0, 1, 1], [], []>} : vector<7x288xbf16>, vector<288x512xbf16>, vector<7x512xf32> -> vector<7x512xf32>
    %11 = arith.addf %1, %10 : vector<7x512xf32>
    %c1 = arith.constant 1 : index
    %c0_10 = arith.constant 0 : index
    %c0_11 = arith.constant 0 : index
    %12 = vector.load %arg2[%c1, %c0_10, %c0_11] : memref<5x288x512xbf16, #tpu.memory_space<vmem>>, vector<1x288x512xbf16>
    %13 = vector.shape_cast %12 : vector<1x288x512xbf16> to vector<288x512xbf16>
    %c0_12 = arith.constant 0 : index
    %c9_13 = arith.constant 9 : index
    %c0_14 = arith.constant 0 : index
    %14 = vector.load %arg1[%c0_12, %c9_13, %c0_14] : memref<1x18x288xbf16, #tpu.memory_space<vmem>>, vector<1x7x288xbf16>
    %15 = vector.shape_cast %14 : vector<1x7x288xbf16> to vector<7x288xbf16>
    %cst_15 = arith.constant dense<0.000000e+00> : vector<7x512xf32>
    %16 = tpu.matmul %15, %13, %cst_15 {dimension_numbers = #tpu.dot_dimension_numbers<[1], [0], [0], [1], [0, 0, 1, 1], [], []>} : vector<7x288xbf16>, vector<288x512xbf16>, vector<7x512xf32> -> vector<7x512xf32>
    %17 = arith.addf %7, %16 : vector<7x512xf32>
    %c0_16 = arith.constant 0 : index
    %c1_17 = arith.constant 1 : index
    %c0_18 = arith.constant 0 : index
    %18 = vector.load %arg1[%c0_16, %c1_17, %c0_18] : memref<1x18x288xbf16, #tpu.memory_space<vmem>>, vector<1x7x288xbf16>
    %19 = vector.shape_cast %18 : vector<1x7x288xbf16> to vector<7x288xbf16>
    %cst_19 = arith.constant dense<0.000000e+00> : vector<7x512xf32>
    %20 = tpu.matmul %19, %13, %cst_19 {dimension_numbers = #tpu.dot_dimension_numbers<[1], [0], [0], [1], [0, 0, 1, 1], [], []>} : vector<7x288xbf16>, vector<288x512xbf16>, vector<7x512xf32> -> vector<7x512xf32>
    %21 = arith.addf %11, %20 : vector<7x512xf32>
    %c2 = arith.constant 2 : index
    %c0_20 = arith.constant 0 : index
    %c0_21 = arith.constant 0 : index
    %22 = vector.load %arg2[%c2, %c0_20, %c0_21] : memref<5x288x512xbf16, #tpu.memory_space<vmem>>, vector<1x288x512xbf16>
    %23 = vector.shape_cast %22 : vector<1x288x512xbf16> to vector<288x512xbf16>
    %c0_22 = arith.constant 0 : index
    %c1_23 = arith.constant 1 : index
    %c0_24 = arith.constant 0 : index
    %24 = vector.load %arg1[%c0_22, %c1_23, %c0_24] : memref<1x18x288xbf16, #tpu.memory_space<vmem>>, vector<1x7x288xbf16>
    %25 = vector.shape_cast %24 : vector<1x7x288xbf16> to vector<7x288xbf16>
    %cst_25 = arith.constant dense<0.000000e+00> : vector<7x512xf32>
    %26 = tpu.matmul %25, %23, %cst_25 {dimension_numbers = #tpu.dot_dimension_numbers<[1], [0], [0], [1], [0, 0, 1, 1], [], []>} : vector<7x288xbf16>, vector<288x512xbf16>, vector<7x512xf32> -> vector<7x512xf32>
    %27 = arith.addf %17, %26 : vector<7x512xf32>
    %c0_26 = arith.constant 0 : index
    %c10 = arith.constant 10 : index
    %c0_27 = arith.constant 0 : index
    %28 = vector.load %arg1[%c0_26, %c10, %c0_27] : memref<1x18x288xbf16, #tpu.memory_space<vmem>>, vector<1x7x288xbf16>
    %29 = vector.shape_cast %28 : vector<1x7x288xbf16> to vector<7x288xbf16>
    %cst_28 = arith.constant dense<0.000000e+00> : vector<7x512xf32>
    %30 = tpu.matmul %29, %23, %cst_28 {dimension_numbers = #tpu.dot_dimension_numbers<[1], [0], [0], [1], [0, 0, 1, 1], [], []>} : vector<7x288xbf16>, vector<288x512xbf16>, vector<7x512xf32> -> vector<7x512xf32>
    %31 = arith.addf %21, %30 : vector<7x512xf32>
    %c3 = arith.constant 3 : index
    %c0_29 = arith.constant 0 : index
    %c0_30 = arith.constant 0 : index
    %32 = vector.load %arg2[%c3, %c0_29, %c0_30] : memref<5x288x512xbf16, #tpu.memory_space<vmem>>, vector<1x288x512xbf16>
    %33 = vector.shape_cast %32 : vector<1x288x512xbf16> to vector<288x512xbf16>
    %c0_31 = arith.constant 0 : index
    %c10_32 = arith.constant 10 : index
    %c0_33 = arith.constant 0 : index
    %34 = vector.load %arg1[%c0_31, %c10_32, %c0_33] : memref<1x18x288xbf16, #tpu.memory_space<vmem>>, vector<1x7x288xbf16>
    %35 = vector.shape_cast %34 : vector<1x7x288xbf16> to vector<7x288xbf16>
    %cst_34 = arith.constant dense<0.000000e+00> : vector<7x512xf32>
    %36 = tpu.matmul %35, %33, %cst_34 {dimension_numbers = #tpu.dot_dimension_numbers<[1], [0], [0], [1], [0, 0, 1, 1], [], []>} : vector<7x288xbf16>, vector<288x512xbf16>, vector<7x512xf32> -> vector<7x512xf32>
    %37 = arith.addf %27, %36 : vector<7x512xf32>
    %c0_35 = arith.constant 0 : index
    %c2_36 = arith.constant 2 : index
    %c0_37 = arith.constant 0 : index
    %38 = vector.load %arg1[%c0_35, %c2_36, %c0_37] : memref<1x18x288xbf16, #tpu.memory_space<vmem>>, vector<1x7x288xbf16>
    %39 = vector.shape_cast %38 : vector<1x7x288xbf16> to vector<7x288xbf16>
    %cst_38 = arith.constant dense<0.000000e+00> : vector<7x512xf32>
    %40 = tpu.matmul %39, %33, %cst_38 {dimension_numbers = #tpu.dot_dimension_numbers<[1], [0], [0], [1], [0, 0, 1, 1], [], []>} : vector<7x288xbf16>, vector<288x512xbf16>, vector<7x512xf32> -> vector<7x512xf32>
    %41 = arith.addf %31, %40 : vector<7x512xf32>
    %c4 = arith.constant 4 : index
    %c0_39 = arith.constant 0 : index
    %c0_40 = arith.constant 0 : index
    %42 = vector.load %arg2[%c4, %c0_39, %c0_40] : memref<5x288x512xbf16, #tpu.memory_space<vmem>>, vector<1x288x512xbf16>
    %43 = vector.shape_cast %42 : vector<1x288x512xbf16> to vector<288x512xbf16>
    %c0_41 = arith.constant 0 : index
    %c2_42 = arith.constant 2 : index
    %c0_43 = arith.constant 0 : index
    %44 = vector.load %arg1[%c0_41, %c2_42, %c0_43] : memref<1x18x288xbf16, #tpu.memory_space<vmem>>, vector<1x7x288xbf16>
    %45 = vector.shape_cast %44 : vector<1x7x288xbf16> to vector<7x288xbf16>
    %cst_44 = arith.constant dense<0.000000e+00> : vector<7x512xf32>
    %46 = tpu.matmul %45, %43, %cst_44 {dimension_numbers = #tpu.dot_dimension_numbers<[1], [0], [0], [1], [0, 0, 1, 1], [], []>} : vector<7x288xbf16>, vector<288x512xbf16>, vector<7x512xf32> -> vector<7x512xf32>
    %47 = arith.addf %37, %46 : vector<7x512xf32>
    %c0_45 = arith.constant 0 : index
    %c11 = arith.constant 11 : index
    %c0_46 = arith.constant 0 : index
    %48 = vector.load %arg1[%c0_45, %c11, %c0_46] : memref<1x18x288xbf16, #tpu.memory_space<vmem>>, vector<1x7x288xbf16>
    %49 = vector.shape_cast %48 : vector<1x7x288xbf16> to vector<7x288xbf16>
    %cst_47 = arith.constant dense<0.000000e+00> : vector<7x512xf32>
    %50 = tpu.matmul %49, %43, %cst_47 {dimension_numbers = #tpu.dot_dimension_numbers<[1], [0], [0], [1], [0, 0, 1, 1], [], []>} : vector<7x288xbf16>, vector<288x512xbf16>, vector<7x512xf32> -> vector<7x512xf32>
    %51 = arith.addf %41, %50 : vector<7x512xf32>
    %52 = arith.maximumf %47, %51 : vector<7x512xf32>
    %53 = vector.extract_strided_slice %52 {offsets = [0, 0], sizes = [7, 256], strides = [1, 1]} : vector<7x512xf32> to vector<7x256xf32>
    %54 = vector.extract_strided_slice %52 {offsets = [0, 256], sizes = [7, 256], strides = [1, 1]} : vector<7x512xf32> to vector<7x256xf32>
    %55 = arith.maximumf %53, %54 : vector<7x256xf32>
    %56 = vector.extract_strided_slice %55 {offsets = [0, 0], sizes = [7, 224], strides = [1, 1]} : vector<7x256xf32> to vector<7x224xf32>
    %c0_48 = arith.constant 0 : index
    %c0_49 = arith.constant 0 : index
    %57 = vector.load %arg3[%c0_48, %c0_49] : memref<1x224xf32, #tpu.memory_space<vmem>>, vector<1x224xf32>
    %58 = vector.broadcast %57 : vector<1x224xf32> to vector<7x224xf32>
    %59 = arith.addf %56, %58 : vector<7x224xf32>
    %cst_50 = arith.constant 0.000000e+00 : f32
    %60 = vector.broadcast %cst_50 : f32 to vector<7x224xf32>
    %61 = arith.maximumf %59, %60 : vector<7x224xf32>
    %c0_51 = arith.constant 0 : index
    %c0_52 = arith.constant 0 : index
    %c0_53 = arith.constant 0 : index
    %62 = vector.load %arg4[%c0_51, %c0_52, %c0_53] : memref<1x7x224xf32, #tpu.memory_space<vmem>>, vector<1x7x224xf32>
    %63 = vector.shape_cast %62 : vector<1x7x224xf32> to vector<7x224xf32>
    %64 = vector.shape_cast %61 : vector<7x224xf32> to vector<1x7x224xf32>
    tpu.vector_store %arg4[%c0_51, %c0_52, %c0_53], %64 {strides = array<i32>} : memref<1x7x224xf32, #tpu.memory_space<vmem>>, vector<1x7x224xf32>,
    return
  }
  func.func @transform_0(%arg0: i32) -> (i32, i32, i32) {
    %c0_i32 = arith.constant 0 : i32
    %c0_i32_0 = arith.constant 0 : i32
    %c0_i32_1 = arith.constant 0 : i32
    return %arg0, %c0_i32, %c0_i32_0 : i32, i32, i32
  }
  func.func @transform_1(%arg0: i32) -> (i32, i32, i32) {
    %c0_i32 = arith.constant 0 : i32
    %c0_i32_0 = arith.constant 0 : i32
    %c0_i32_1 = arith.constant 0 : i32
    %c0_i32_2 = arith.constant 0 : i32
    return %c0_i32, %c0_i32_0, %c0_i32_1 : i32, i32, i32
  }
  func.func @transform_2(%arg0: i32) -> (i32, i32) {
    %c0_i32 = arith.constant 0 : i32
    %c0_i32_0 = arith.constant 0 : i32
    %c0_i32_1 = arith.constant 0 : i32
    return %c0_i32, %c0_i32_0 : i32, i32
  }
  func.func @transform_3(%arg0: i32) -> (i32, i32, i32) {
    %c0_i32 = arith.constant 0 : i32
    %c0_i32_0 = arith.constant 0 : i32
    %c0_i32_1 = arith.constant 0 : i32
    return %arg0, %c0_i32, %c0_i32_0 : i32, i32, i32
  }
}

module attributes {stable_mosaic.version = 11 : i64} {
  func.func @_gate_fc_kernel(%arg0: i32, %arg1: memref<8x1568xf32, #tpu.memory_space<vmem>>, %arg2: memref<1x1568xf32, #tpu.memory_space<vmem>>, %arg3: memref<1568x10xbf16, #tpu.memory_space<vmem>>, %arg4: memref<1x10xf32, #tpu.memory_space<vmem>>, %arg5: memref<8x1568xf32, #tpu.memory_space<vmem>>, %arg6: memref<8x10xf32, #tpu.memory_space<vmem>>) attributes {dimension_semantics = [#tpu.dimension_semantics<parallel>], iteration_bounds = array<i64: 1>, scalar_prefetch = 0 : i64, scratch_operands = 0 : i64, tpu.core_type = #tpu.core_type<tc>, window_params = [{transform_indices = @transform_0, window_bounds = array<i64: 8, 1568>}, {pipeline_mode = #tpu.pipeline_mode<synchronous>, transform_indices = @transform_1, window_bounds = array<i64: 1, 1568>}, {pipeline_mode = #tpu.pipeline_mode<synchronous>, transform_indices = @transform_2, window_bounds = array<i64: 1568, 10>}, {pipeline_mode = #tpu.pipeline_mode<synchronous>, transform_indices = @transform_3, window_bounds = array<i64: 1, 10>}, {transform_indices = @transform_4, window_bounds = array<i64: 8, 1568>}, {transform_indices = @transform_5, window_bounds = array<i64: 8, 10>}]} {
    %c0 = arith.constant 0 : index
    %c0_0 = arith.constant 0 : index
    %0 = vector.load %arg1[%c0, %c0_0] : memref<8x1568xf32, #tpu.memory_space<vmem>>, vector<8x1568xf32>
    %c0_1 = arith.constant 0 : index
    %c0_2 = arith.constant 0 : index
    %1 = vector.load %arg2[%c0_1, %c0_2] : memref<1x1568xf32, #tpu.memory_space<vmem>>, vector<1x1568xf32>
    %2 = vector.broadcast %1 : vector<1x1568xf32> to vector<8x1568xf32>
    %3 = arith.mulf %0, %2 : vector<8x1568xf32>
    %c0_3 = arith.constant 0 : index
    %c0_4 = arith.constant 0 : index
    %4 = vector.load %arg5[%c0_3, %c0_4] : memref<8x1568xf32, #tpu.memory_space<vmem>>, vector<8x1568xf32>
    tpu.vector_store %arg5[%c0_3, %c0_4], %3 {strides = array<i32>} : memref<8x1568xf32, #tpu.memory_space<vmem>>, vector<8x1568xf32>,
    %5 = arith.truncf %0 : vector<8x1568xf32> to vector<8x1568xbf16>
    %c0_5 = arith.constant 0 : index
    %c0_6 = arith.constant 0 : index
    %6 = vector.load %arg3[%c0_5, %c0_6] : memref<1568x10xbf16, #tpu.memory_space<vmem>>, vector<1568x10xbf16>
    %cst = arith.constant dense<0.000000e+00> : vector<8x10xf32>
    %7 = tpu.matmul %5, %6, %cst {dimension_numbers = #tpu.dot_dimension_numbers<[1], [0], [0], [1], [0, 0, 1, 1], [], []>} : vector<8x1568xbf16>, vector<1568x10xbf16>, vector<8x10xf32> -> vector<8x10xf32>
    %c0_7 = arith.constant 0 : index
    %c0_8 = arith.constant 0 : index
    %8 = vector.load %arg4[%c0_7, %c0_8] : memref<1x10xf32, #tpu.memory_space<vmem>>, vector<1x10xf32>
    %9 = vector.broadcast %8 : vector<1x10xf32> to vector<8x10xf32>
    %10 = arith.addf %7, %9 : vector<8x10xf32>
    %c0_9 = arith.constant 0 : index
    %c0_10 = arith.constant 0 : index
    %11 = vector.load %arg6[%c0_9, %c0_10] : memref<8x10xf32, #tpu.memory_space<vmem>>, vector<8x10xf32>
    tpu.vector_store %arg6[%c0_9, %c0_10], %10 {strides = array<i32>} : memref<8x10xf32, #tpu.memory_space<vmem>>, vector<8x10xf32>,
    return
  }
  func.func @transform_0(%arg0: i32) -> (i32, i32) {
    %c0_i32 = arith.constant 0 : i32
    %c0_i32_0 = arith.constant 0 : i32
    return %arg0, %c0_i32 : i32, i32
  }
  func.func @transform_1(%arg0: i32) -> (i32, i32) {
    %c0_i32 = arith.constant 0 : i32
    %c0_i32_0 = arith.constant 0 : i32
    %c0_i32_1 = arith.constant 0 : i32
    return %c0_i32, %c0_i32_0 : i32, i32
  }
  func.func @transform_2(%arg0: i32) -> (i32, i32) {
    %c0_i32 = arith.constant 0 : i32
    %c0_i32_0 = arith.constant 0 : i32
    %c0_i32_1 = arith.constant 0 : i32
    return %c0_i32, %c0_i32_0 : i32, i32
  }
  func.func @transform_3(%arg0: i32) -> (i32, i32) {
    %c0_i32 = arith.constant 0 : i32
    %c0_i32_0 = arith.constant 0 : i32
    %c0_i32_1 = arith.constant 0 : i32
    return %c0_i32, %c0_i32_0 : i32, i32
  }
  func.func @transform_4(%arg0: i32) -> (i32, i32) {
    %c0_i32 = arith.constant 0 : i32
    %c0_i32_0 = arith.constant 0 : i32
    return %arg0, %c0_i32 : i32, i32
  }
  func.func @transform_5(%arg0: i32) -> (i32, i32) {
    %c0_i32 = arith.constant 0 : i32
    %c0_i32_0 = arith.constant 0 : i32
    return %arg0, %c0_i32 : i32, i32
  }
}

</mosaic_0001>

<bundles_post_ra>
// kernel: tile.13
= control target key start
LH: loop header
LB: loop body
LE: loop exit
PB: predicated region body
PF: predicated region fallthrough
CT: control target
= control target key end

     0   :  { %s28_s0 = inlined_call_operand.vmem [shape: f32[16], index: 0, kind: input, shape index: {}]   ;;  %s29_s1 = inlined_call_operand.vmem [shape: f32[14,16], index: 1, kind: output, shape index: {}]  }
   0x1   :  { %v4_v0 = vld [vmem:[%s28_s0] ss:$0 sm:$0xff] }
   0x2   :  { %5 = vst [vmem:[%s29_s1] sm:$0xff] %v4_v0  ;;  %8 = vst [vmem:[%s29_s1 + $0x8] sm:$0xff] %v4_v0 }

// kernel: tile.14
= control target key start
LH: loop header
LB: loop body
LE: loop exit
PB: predicated region body
PF: predicated region fallthrough
CT: control target
= control target key end

     0   :  { %s19_s8 = smov 3  ;;  %s79_s9 = smov 112   ;;  %vm4_vm0 = vcmask 130048   ;;  %vm10_vm1 = vcmask 1048448   ;;  %vm16_vm2 = vcmask 917248   ;;  %vm23_vm3 = vcmask 786048   ;;  %s126_s0 = inlined_call_operand.vmem [shape: f32[14,16], index: 0, kind: input, shape index: {}]   ;;  %s127_s1 = inlined_call_operand.vmem [shape: f32[1,224], index: 1, kind: output, shape index: {}]  }
   0x1   :  { %v64_v0 = vld [vmem:[%s126_s0 + $0x7] sm:$0x1]   ;;  %v66_v1 = vld [vmem:[%s126_s0 + $0x5] ss:$8 sm:%s19_s8]   ;;  %s80_s12 = smov 80   ;;  %s26_s15 = smov 3 }
   0x2   :  { %8 = vrot.lane.b32.xlu0 %v64_v0, %s79_s9  ;;  %21 = vrot.lane.b32.xlu1 %v66_v1, %s80_s12  ;;  %v65_v2 = vld [vmem:[%s126_s0 + $0x6] sm:$0x1]   ;;  %s33_s18 = smov 3  ;;  %s40_s19 = smov 3  ;;  %vm30_vm4 = vcmask 654848   ;;  %vm37_vm5 = vcmask 523648  }
   0x3   :  { %v67_v3 = vld [vmem:[%s126_s0 + $0x4] ss:$8 sm:%s26_s15]   ;;  %s81_s20 = smov 96   ;;  %s82_s21 = smov 64   ;;  %v68_v4 = vld [vmem:[%s126_s0 + $0x3] ss:$8 sm:%s33_s18]  }
   0x4   :  { %s2_s24 = smov 3  ;;  %v69_v5 = vld [vmem:[%s126_s0 + $0x2] ss:$8 sm:%s40_s19]   ;;  %s47_s27 = smov 3  ;;  %vm44_vm6 = vcmask 392448   ;;  %vm51_vm7 = vcmask 261248  }
   0x5   :  { %v3_v6 = vld [vmem:[%s126_s0] ss:$8 sm:%s2_s24]   ;;  %s83_s30 = smov 48   ;;  %s84_s2 = smov 32   ;;  %v70_v7 = vld [vmem:[%s126_s0 + $0x1] ss:$8 sm:%s47_s27]  }
   0x6   :  { %14 = vrot.lane.b32.xlu0 %v65_v2, %s81_s20  ;;  %28 = vrot.lane.b32.xlu1 %v67_v3, %s82_s21  ;;  %5 = vst.msk [vmem:[#allocation0] ss:$8 sm:$0x3] %vm4_vm0, %v3_v6   ;;  %s85_s0 = smov 16  }
   0xa   :  { %35 = vrot.lane.b32.xlu0 %v68_v4, %s83_s30  ;;  %42 = vrot.lane.b32.xlu1 %v69_v5, %s84_s2 }
   0xe   :  { %49 = vrot.lane.b32.xlu0 %v70_v7, %s85_s0 }
  0x74   :  { %v9_v8 = vpop.permute.xlu0 %8   ;;  %v22_v9 = vpop.permute.xlu1 %21  }
  0x75   :  { %11 = vst.msk [vmem:[#allocation0] sm:$0x1] %vm10_vm1, %v9_v8  }
  0x78   :  { %v15_v10 = vpop.permute.xlu0 %14   ;;  %v29_v11 = vpop.permute.xlu1 %28  }
  0x79   :  { %17 = vst.msk [vmem:[#allocation0] sm:$0x1] %vm16_vm2, %v15_v10  }
  0x7a   :  { %24 = vst.msk [vmem:[#allocation0] ss:$8 sm:$0x3] %vm23_vm3, %v22_v9  }
  0x7b   :  { %31 = vst.msk [vmem:[#allocation0] ss:$8 sm:$0x3] %vm30_vm4, %v29_v11  }
  0x7c   :  { %v36_v12 = vpop.permute.xlu0 %35   ;;  %v43_v13 = vpop.permute.xlu1 %42  }
  0x7d   :  { %38 = vst.msk [vmem:[#allocation0] ss:$8 sm:$0x3] %vm37_vm5, %v36_v12  }
  0x7e   :  { %45 = vst.msk [vmem:[#allocation0] ss:$8 sm:$0x3] %vm44_vm6, %v43_v13  }
  0x80   :  { %v50_v14 = vpop.permute.xlu0 %49  }
  0x81   :  { %52 = vst.msk [vmem:[#allocation0] ss:$8 sm:$0x3] %vm51_vm7, %v50_v14  }
  0x88   :  { %v56_v15 = vld [vmem:[#allocation0] sm:$0x1]  ;;  %v60_v16 = vld [vmem:[#allocation0 + $0x8] sm:$0x1] }
  0x89   :  { %58 = vst [vmem:[%s127_s1] sm:$0x1] %v56_v15  ;;  %71 = vst [vmem:[%s127_s1 + $0x1] sm:$0x1] %v60_v16 }

// kernel: convnet_gate_forward.3
= control target key start
LH: loop header
LB: loop body
LE: loop exit
PB: predicated region body
PF: predicated region fallthrough
CT: control target
= control target key end

     0   :  { %s1779_s12 = smov 0   ;;  %s1994_s0 = inlined_call_operand.vmem [shape: bf16[2,32,32], index: 0, kind: input, shape index: {}]   ;;  %s1995_s1 = inlined_call_operand.vmem [shape: bf16[5,32,512], index: 1, kind: input, shape index: {}]   ;;  %s1996_s2 = inlined_call_operand.vmem [shape: f32[1,224], index: 2, kind: input, shape index: {}]   ;;  %s1997_s3 = inlined_call_operand.vmem [shape: bf16[2,14,224], index: 3, kind: output, shape index: {}]  }
   0x1 LB: > { %s1496_s13 = sadd.s32 4294967295, %s1756_s12   ;;  %p1500_p0 = scmp.ge.s32.totalorder %s1756_s12, 1  ;;  %s1756_s12 = sphi %s1779_s12, %s13_s12  }
   0x2   : > { %p137_p1 = scmp.lt.s32.totalorder %s1756_s12, 3 }
   0x4   : > { %p138_p2 = pnand %p1500_p0, %p137_p1 }
   0x5   : > { %v1684_v0 = vld [vmem:[%s1995_s1 + $0x44] ss:$16 sps:$4 sm:$0xff] (!%p138_p2)   ;;  %p161_p3 = scmp.lt.s32.totalorder (!%p138_p2), %s1496_s13, 1  ;;  %v1686_v1 = vld [vmem:[%s1995_s1 + $0x4c] ss:$16 sps:$4 sm:$0xff] (!%p138_p2)   ;;  %v1758_v2 = vmov (!%p138_p2), 0  }
   0x6   : > { %141 = sbr.rel (%p138_p2) target bundleno = 325 (0x145), region = 32  ;;  %274 = vmatprep.mubr.bf16.mxu0 (!%p138_p2), %v1758_v2  ;;  %317 = vmatprep.mubr.bf16.mxu1 (!%p138_p2), %v1758_v2  ;;  %v1688_v3 = vld [vmem:[%s1995_s1 + $0x40] ss:$16 sps:$4 sm:$0xff] (!%p138_p2)   ;;  %v1689_v4 = vld [vmem:[%s1995_s1 + $0x48] ss:$16 sps:$4 sm:$0xff] (!%p138_p2)   ;;  %vm238_vm0 = vcmask (!%p138_p2), 261120  }
   0x7   : > { %242 = vmatprep.subr.bf16.mxu0 (!%p138_p2), %v1684_v0  ;;  %285 = vmatprep.subr.bf16.mxu1 (!%p138_p2), %v1686_v1  ;;  %v1690_v5 = vld [vmem:[%s1995_s1 + $0x64] ss:$16 sps:$4 sm:$0xff] (!%p138_p2)   ;;  %v1692_v6 = vld [vmem:[%s1995_s1 + $0x6c] ss:$16 sps:$4 sm:$0xff] (!%p138_p2)   ;;  %v1694_v7 = vld [vmem:[%s1995_s1 + $0x60] ss:$16 sps:$4 sm:$0xff] (!%p138_p2)  }
   0x8   : > { %243 = vmatpush1.bf16.msra.mxu0 (!%p138_p2), %v1688_v3  ;;  %286 = vmatpush1.bf16.msra.mxu1 (!%p138_p2), %v1689_v4  ;;  %v1695_v8 = vld [vmem:[%s1995_s1 + $0x68] ss:$16 sps:$4 sm:$0xff] (!%p138_p2)   ;;  %v1699_v12 = vld [vmem:[%s1995_s1] ss:$16 sps:$4 sm:$0xff] (!%p138_p2)   ;;  %v1701_v13 = vld [vmem:[%s1995_s1 + $0x4] ss:$16 sps:$4 sm:$0xff] (!%p138_p2)  }
   0x9   : > { %244 = vmatprep.subr.bf16.mxu0 (!%p138_p2), %v1690_v5  ;;  %287 = vmatprep.subr.bf16.mxu1 (!%p138_p2), %v1692_v6  ;;  %v1702_v14 = vld [vmem:[%s1995_s1 + $0x8] ss:$16 sps:$4 sm:$0xff] (!%p138_p2)   ;;  %v1704_v15 = vld [vmem:[%s1995_s1 + $0xc] ss:$16 sps:$4 sm:$0xff] (!%p138_p2)   ;;  %v1707_v16 = vld [vmem:[%s1995_s1 + $0x24] ss:$16 sps:$4 sm:$0xff] (!%p138_p2)  }
   0xa   : > { %v1710_v17 = vld [vmem:[%s1995_s1 + $0x2c] ss:$16 sps:$4 sm:$0xff] (!%p138_p2)   ;;  %v1705_v18 = vld [vmem:[%s1995_s1 + $0x20] ss:$16 sps:$4 sm:$0xff] (!%p138_p2)   ;;  %v1708_v20 = vld [vmem:[%s1995_s1 + $0x28] ss:$16 sps:$4 sm:$0xff] (!%p138_p2)  }
   0xb   : > { %v1715_v29 = vld [vmem:[%s1995_s1 + $0x84] ss:$16 sps:$4 sm:$0xff] (!%p138_p2)   ;;  %v1718_v30 = vld [vmem:[%s1995_s1 + $0x8c] ss:$16 sps:$4 sm:$0xff] (!%p138_p2)   ;;  %v1713_v32 = vld [vmem:[%s1995_s1 + $0x80] ss:$16 sps:$4 sm:$0xff] (!%p138_p2)  }
   0xc   : > { %245 = vmatpush1.bf16.msra.mxu0 (!%p138_p2), %v1694_v7  ;;  %288 = vmatpush1.bf16.msra.mxu1 (!%p138_p2), %v1695_v8  ;;  %v1716_v33 = vld [vmem:[%s1995_s1 + $0x88] ss:$16 sps:$4 sm:$0xff] (!%p138_p2)   ;;  %v1721_v34 = vld [vmem:[%s1995_s1 + $0xa4] ss:$16 sps:$4 sm:$0xff] (!%p138_p2)   ;;  %v1724_v35 = vld [vmem:[%s1995_s1 + $0xac] ss:$16 sps:$4 sm:$0xff] (!%p138_p2)  }
   0xd   : > { %s1999_s13 = smov (!%p161_p3, %s1496_s13), 1  ;;  %376 = vmatprep.subr.bf16.mxu0 %v1701_v13  ;;  %419 = vmatprep.subr.bf16.mxu1 %v1704_v15  ;;  %v1719_v37 = vld [vmem:[%s1995_s1 + $0xa0] ss:$16 sps:$4 sm:$0xff]   ;;  %v1722_v38 = vld [vmem:[%s1995_s1 + $0xa8] ss:$16 sps:$4 sm:$0xff]   ;;  %vm1433_vm1 = vcmask 1043456  }
   0xe   : > { %s1607_s28 = sshll.u32 %s1999_s13, 4  ;;  %v1727_v42 = vld [vmem:[%s1995_s1 + $0xc4] ss:$16 sps:$4 sm:$0xff]   ;;  %v1730_v43 = vld [vmem:[%s1995_s1 + $0xcc] ss:$16 sps:$4 sm:$0xff]   ;;  %vm1434_vm2 = vcmask 785412  }
   0xf   : > { %s1821_s6 = scalar_lea.vmem %s1994_s0, %s1607_s28  ;;  %v1725_v45 = vld [vmem:[%s1995_s1 + $0xc0] ss:$16 sps:$4 sm:$0xff]   ;;  %v1728_v46 = vld [vmem:[%s1995_s1 + $0xc8] ss:$16 sps:$4 sm:$0xff]   ;;  %v1733_v47 = vld [vmem:[%s1995_s1 + $0xe4] ss:$16 sps:$4 sm:$0xff]   ;;  %s170_s4 = scalar_lea.vmem %s1997_s3, %s1607_s28 }
  0x10   : > { %v1824_v9 = vld [vmem:[%s1821_s6 + $0x8] sm:$0xf]  ;;  %v183_v10 = vld [vmem:[%s1821_s6 + $0xc] sm:$0x7]  ;;  %v1856_v19 = vld [vmem:[%s1821_s6 + $0x4] sm:$0xf] }
  0x11   : > { %v1828_v11 = vcombine.low %v1824_v9, %v183_v10  ;;  %v180_v21 = vld [vmem:[%s1821_s6] sm:$0xf]  ;;  %v181_v23 = vld [vmem:[%s1821_s6 + $0x4] sm:$0x7]  ;;  %v1881_v31 = vld [vmem:[%s1821_s6 + $0xc] sm:$0xf] }
  0x12   : > { %v1535_v22 = vcombine.low %v180_v21, %v1856_v19  ;;  %v1524_v24 = vcombine.low %v180_v21, %v181_v23  ;;  %v1558_v36 = vcombine.low %v1824_v9, %v1881_v31  ;;  %v1736_v48 = vld [vmem:[%s1995_s1 + $0xec] ss:$16 sps:$4 sm:$0xff]   ;;  %v1731_v49 = vld [vmem:[%s1995_s1 + $0xe0] ss:$16 sps:$4 sm:$0xff]   ;;  %v1734_v50 = vld [vmem:[%s1995_s1 + $0xe8] ss:$16 sps:$4 sm:$0xff]  }
  0x13   : > { %1522 = vmatmul.mubr.msk.bf16.vlgmr.msra.gmra.mrb[0].mxu0 %vm238_vm0, %v1828_v11  ;;  %1523 = vmatmul.mubr.msk.bf16.vlgmr.msra.gmra.mrb[0].mxu1 %vm238_vm0, %v1828_v11  ;;  %v1042_v51 = vld [vmem:[%s1821_s6] sm:$0xe]  ;;  %v1740_v53 = vld [vmem:[%s1995_s1 + $0x104] ss:$16 sps:$4 sm:$0xff]   ;;  %v1743_v54 = vld [vmem:[%s1995_s1 + $0x10c] ss:$16 sps:$4 sm:$0xff]  }
  0x14   : > { %377 = vmatpush1.bf16.msra.mxu0 %v1699_v12  ;;  %420 = vmatpush1.bf16.msra.mxu1 %v1702_v14  ;;  %v469_v25 = vshll.u32 %v1535_v22, 16  ;;  %v467_v26 = vshrl.u32 %v1535_v22, 16  ;;  %v798_v39 = vshll.u32 %v1558_v36, 16  ;;  %v796_v40 = vshrl.u32 %v1558_v36, 16  ;;  %v1738_v56 = vld [vmem:[%s1995_s1 + $0x100] ss:$16 sps:$4 sm:$0xff]   ;;  %vm1435_vm5 = vmor %vm1434_vm2, %vm1433_vm1 }
  0x15   : > { %378 = vmatprep.subr.bf16.mxu0 %v1707_v16  ;;  %421 = vmatprep.subr.bf16.mxu1 %v1710_v17  ;;  %v1579_v52 = vcombine.low %v1042_v51, %v1856_v19  ;;  %v1741_v57 = vld [vmem:[%s1995_s1 + $0x108] ss:$16 sps:$4 sm:$0xff]   ;;  %v1746_v58 = vld [vmem:[%s1995_s1 + $0x124] ss:$16 sps:$4 sm:$0xff]   ;;  %v1749_v59 = vld [vmem:[%s1995_s1 + $0x12c] ss:$16 sps:$4 sm:$0xff]  }
  0x16   : > { %408 = vmatprep.mubr.bf16.mxu0 %v1758_v2  ;;  %451 = vmatprep.mubr.bf16.mxu1 %v1758_v2  ;;  %v471_v27 = vrot.slane %v469_v25, 1  ;;  %v800_v41 = vrot.slane %v798_v39, 1  ;;  %v1744_v60 = vld [vmem:[%s1995_s1 + $0x120] ss:$16 sps:$4 sm:$0xff]   ;;  %v1747_v61 = vld [vmem:[%s1995_s1 + $0x128] ss:$16 sps:$4 sm:$0xff]  }
  0x17   : > { %v1046_v55 = vrot.slane %v1579_v52, 1  ;;  %v1287_v62 = vld [vmem:[%s1821_s6 + $0x8] sm:$0xe]  ;;  %vm1437_vm3 = vcmask 1042432   ;;  %vm1438_vm4 = vcmask 784388  }
  0x18   : > { %379 = vmatpush1.bf16.msra.mxu0 %v1705_v18  ;;  %422 = vmatpush1.bf16.msra.mxu1 %v1708_v20  ;;  %v472_v28 = vor.u32 %v471_v27, %v467_v26  ;;  %v801_v44 = vor.u32 %v800_v41, %v796_v40  ;;  %v1600_v63 = vcombine.low %v1287_v62, %v1881_v31  ;;  %vm1439_vm6 = vmor %vm1438_vm4, %vm1437_vm3 }
  0x19   : > { %476 = vmatprep.subr.bf16.mxu0 %v1684_v0  ;;  %519 = vmatprep.subr.bf16.mxu1 %v1686_v1  ;;  %v1403_v1 = vlaneseq }
  0x1a   : > { %v1291_v0 = vrot.slane %v1600_v63, 1 }
  0x1f   : > { %1533 = vmatmul.mubr.msk.bf16.vlgmr.msra.gmra.mrb[0].mxu0 %vm238_vm0, %v1524_v24  ;;  %1534 = vmatmul.mubr.msk.bf16.vlgmr.msra.gmra.mrb[0].mxu1 %vm238_vm0, %v1524_v24 }
  0x20   : > { %477 = vmatpush1.bf16.msra.mxu0 %v1688_v3  ;;  %520 = vmatpush1.bf16.msra.mxu1 %v1689_v4 }
  0x21   : > { %478 = vmatprep.subr.bf16.mxu0 %v1690_v5  ;;  %521 = vmatprep.subr.bf16.mxu1 %v1692_v6 }
  0x22   : > { %508 = vmatprep.mubr.bf16.mxu0 %v1758_v2  ;;  %551 = vmatprep.mubr.bf16.mxu1 %v1758_v2 }
  0x24   : > { %479 = vmatpush1.bf16.msra.mxu0 %v1694_v7  ;;  %522 = vmatpush1.bf16.msra.mxu1 %v1695_v8  ;;  %v1404_v7 = vshrl.u32 %v1403_v1, 7 }
  0x25   : > { %562 = vmatprep.subr.bf16.mxu0 %v1701_v13  ;;  %605 = vmatprep.subr.bf16.mxu1 %v1704_v15 }
  0x26   : > { %v1409_v13 = vsub.s32 1, %v1404_v7 }
  0x27   : > { %1536 = vmatmul.mubr.msk.bf16.vlgmr.msra.gmra.mrb[4].mxu0 %vm238_vm0, %v472_v28  ;;  %1537 = vmatmul.mubr.msk.bf16.vlgmr.msra.gmra.mrb[4].mxu1 %vm238_vm0, %v472_v28 }
  0x28   : > { %563 = vmatpush1.bf16.msra.mxu0 %v1699_v12  ;;  %606 = vmatpush1.bf16.msra.mxu1 %v1702_v14  ;;  %v1405_v12 = vsub.s32 0, %v1404_v7 }
  0x29   : > { %564 = vmatprep.subr.bf16.mxu0 %v1707_v16  ;;  %607 = vmatprep.subr.bf16.mxu1 %v1710_v17 }
  0x2a   : > { %594 = vmatprep.mubr.bf16.mxu0 %v1758_v2  ;;  %637 = vmatprep.mubr.bf16.mxu1 %v1758_v2 }
  0x2c   : > { %565 = vmatpush1.bf16.msra.mxu0 %v1705_v18  ;;  %608 = vmatpush1.bf16.msra.mxu1 %v1708_v20 }
  0x2d   : > { %697 = vmatprep.subr.bf16.mxu0 %v1715_v29  ;;  %740 = vmatprep.subr.bf16.mxu1 %v1718_v30 }
  0x33   : > { %1538 = vmatmul.mubr.msk.bf16.vlgmr.msra.gmra.mrb[4].mxu0 %vm238_vm0, %v1828_v11  ;;  %1539 = vmatmul.mubr.msk.bf16.vlgmr.msra.gmra.mrb[4].mxu1 %vm238_vm0, %v1828_v11 }
  0x34   : > { %698 = vmatpush1.bf16.msra.mxu0 %v1713_v32  ;;  %741 = vmatpush1.bf16.msra.mxu1 %v1716_v33 }
  0x35   : > { %699 = vmatprep.subr.bf16.mxu0 %v1721_v34  ;;  %742 = vmatprep.subr.bf16.mxu1 %v1724_v35 }
  0x36   : > { %729 = vmatprep.mubr.bf16.mxu0 %v1758_v2  ;;  %772 = vmatprep.mubr.bf16.mxu1 %v1758_v2 }
  0x38   : > { %700 = vmatpush1.bf16.msra.mxu0 %v1719_v37  ;;  %743 = vmatpush1.bf16.msra.mxu1 %v1722_v38 }
  0x39   : > { %805 = vmatprep.subr.bf16.mxu0 %v1715_v29  ;;  %848 = vmatprep.subr.bf16.mxu1 %v1718_v30 }
  0x3b   : > { %1556 = vmatmul.mubr.msk.bf16.vlgmr.msra.gmra.mrb[0].mxu0 %vm238_vm0, %v472_v28  ;;  %1557 = vmatmul.mubr.msk.bf16.vlgmr.msra.gmra.mrb[0].mxu1 %vm238_vm0, %v472_v28 }
  0x3c   : > { %806 = vmatpush1.bf16.msra.mxu0 %v1713_v32  ;;  %849 = vmatpush1.bf16.msra.mxu1 %v1716_v33 }
  0x3d   : > { %807 = vmatprep.subr.bf16.mxu0 %v1721_v34  ;;  %850 = vmatprep.subr.bf16.mxu1 %v1724_v35 }
  0x3e   : > { %837 = vmatprep.mubr.bf16.mxu0 %v1758_v2  ;;  %880 = vmatprep.mubr.bf16.mxu1 %v1758_v2 }
  0x40   : > { %808 = vmatpush1.bf16.msra.mxu0 %v1719_v37  ;;  %851 = vmatpush1.bf16.msra.mxu1 %v1722_v38 }
  0x41   : > { %948 = vmatprep.subr.bf16.mxu0 %v1727_v42  ;;  %991 = vmatprep.subr.bf16.mxu1 %v1730_v43 }
  0x43   : > { %1559 = vmatmul.mubr.msk.bf16.vlgmr.msra.gmra.mrb[4].mxu0 %vm238_vm0, %v801_v44  ;;  %1560 = vmatmul.mubr.msk.bf16.vlgmr.msra.gmra.mrb[4].mxu1 %vm238_vm0, %v801_v44 }
  0x44   : > { %949 = vmatpush1.bf16.msra.mxu0 %v1725_v45  ;;  %992 = vmatpush1.bf16.msra.mxu1 %v1728_v46 }
  0x45   : > { %950 = vmatprep.subr.bf16.mxu0 %v1733_v47  ;;  %993 = vmatprep.subr.bf16.mxu1 %v1736_v48 }
  0x46   : > { %980 = vmatprep.mubr.bf16.mxu0 %v1758_v2  ;;  %1023 = vmatprep.mubr.bf16.mxu1 %v1758_v2 }
  0x48   : > { %951 = vmatpush1.bf16.msra.mxu0 %v1731_v49  ;;  %994 = vmatpush1.bf16.msra.mxu1 %v1734_v50 }
  0x49   : > { %1050 = vmatprep.subr.bf16.mxu0 %v1727_v42  ;;  %1093 = vmatprep.subr.bf16.mxu1 %v1730_v43 }
  0x4b   : > { %1577 = vmatmul.mubr.msk.bf16.vlgmr.msra.gmra.mrb[0].mxu0 %vm238_vm0, %v801_v44  ;;  %1578 = vmatmul.mubr.msk.bf16.vlgmr.msra.gmra.mrb[0].mxu1 %vm238_vm0, %v801_v44 }
  0x4c   : > { %1051 = vmatpush1.bf16.msra.mxu0 %v1725_v45  ;;  %1094 = vmatpush1.bf16.msra.mxu1 %v1728_v46 }
  0x4d   : > { %1052 = vmatprep.subr.bf16.mxu0 %v1733_v47  ;;  %1095 = vmatprep.subr.bf16.mxu1 %v1736_v48 }
  0x4e   : > { %1082 = vmatprep.mubr.bf16.mxu0 %v1758_v2  ;;  %1125 = vmatprep.mubr.bf16.mxu1 %v1758_v2 }
  0x50   : > { %1053 = vmatpush1.bf16.msra.mxu0 %v1731_v49  ;;  %1096 = vmatpush1.bf16.msra.mxu1 %v1734_v50 }
  0x51   : > { %1193 = vmatprep.subr.bf16.mxu0 %v1740_v53  ;;  %1236 = vmatprep.subr.bf16.mxu1 %v1743_v54 }
  0x53   : > { %1580 = vmatmul.mubr.msk.bf16.vlgmr.msra.gmra.mrb[4].mxu0 %vm238_vm0, %v1046_v55  ;;  %1581 = vmatmul.mubr.msk.bf16.vlgmr.msra.gmra.mrb[4].mxu1 %vm238_vm0, %v1046_v55 }
  0x54   : > { %1194 = vmatpush1.bf16.msra.mxu0 %v1738_v56  ;;  %1237 = vmatpush1.bf16.msra.mxu1 %v1741_v57 }
  0x55   : > { %1195 = vmatprep.subr.bf16.mxu0 %v1746_v58  ;;  %1238 = vmatprep.subr.bf16.mxu1 %v1749_v59 }
  0x56   : > { %1225 = vmatprep.mubr.bf16.mxu0 %v1758_v2  ;;  %1268 = vmatprep.mubr.bf16.mxu1 %v1758_v2 }
  0x58   : > { %1196 = vmatpush1.bf16.msra.mxu0 %v1744_v60  ;;  %1239 = vmatpush1.bf16.msra.mxu1 %v1747_v61 }
  0x59   : > { %1295 = vmatprep.subr.bf16.mxu0 %v1740_v53  ;;  %1338 = vmatprep.subr.bf16.mxu1 %v1743_v54 }
  0x5b   : > { %1598 = vmatmul.mubr.msk.bf16.vlgmr.msra.gmra.mrb[0].mxu0 %vm238_vm0, %v1046_v55  ;;  %1599 = vmatmul.mubr.msk.bf16.vlgmr.msra.gmra.mrb[0].mxu1 %vm238_vm0, %v1046_v55 }
  0x5c   : > { %1296 = vmatpush1.bf16.msra.mxu0 %v1738_v56  ;;  %1339 = vmatpush1.bf16.msra.mxu1 %v1741_v57 }
  0x5d   : > { %1297 = vmatprep.subr.bf16.mxu0 %v1746_v58  ;;  %1340 = vmatprep.subr.bf16.mxu1 %v1749_v59 }
  0x5e   : > { %1327 = vmatprep.mubr.bf16.mxu0 %v1758_v2  ;;  %1370 = vmatprep.mubr.bf16.mxu1 %v1758_v2  ;;  %v1401_v2 = vld [vmem:[%s1996_s2] sm:$0x3] }
  0x5f   : > { %v1406_v18 = vrot.slane %v1401_v2, %v1405_v12  ;;  %v1410_v23 = vrot.slane %v1401_v2, %v1409_v13 }
  0x60   : > { %1298 = vmatpush1.bf16.msra.mxu0 %v1744_v60  ;;  %1341 = vmatpush1.bf16.msra.mxu1 %v1747_v61 }
  0x63   : > { %1601 = vmatmul.mubr.msk.bf16.vlgmr.msra.gmra.mrb[4].mxu0 %vm238_vm0, %v1291_v0  ;;  %1602 = vmatmul.mubr.msk.bf16.vlgmr.msra.gmra.mrb[4].mxu1 %vm238_vm0, %v1291_v0 }
 0x12e   : > { %v1227_v3 = vpop.f32.mrb[0].mxu0  ;;  %v1270_v4 = vpop.f32.mrb[0].mxu1 }
 0x12f   : > { %v1229_v5 = vpop.f32.mrb[1].mxu0  ;;  %v1272_v6 = vpop.f32.mrb[1].mxu1 }
 0x130   : > { %v1231_v8 = vpop.f32.mrb[2].mxu0  ;;  %v1274_v9 = vpop.f32.mrb[2].mxu1 }
 0x131   : > { %v1233_v10 = vpop.f32.mrb[3].mxu0  ;;  %v1276_v11 = vpop.f32.mrb[3].mxu1 }
 0x136   : > { %v1329_v14 = vpop.f32.mrb[4].mxu0  ;;  %v1372_v15 = vpop.f32.mrb[4].mxu1 }
 0x137   : > { %v1389_v16 = vmax.f32 %v1227_v3, %v1329_v14  ;;  %v1391_v17 = vmax.f32 %v1270_v4, %v1372_v15  ;;  %v1331_v19 = vpop.f32.mrb[5].mxu0  ;;  %v1374_v20 = vpop.f32.mrb[5].mxu1 }
 0x138   : > { %v1390_v21 = vmax.f32 %v1229_v5, %v1331_v19  ;;  %v1392_v22 = vmax.f32 %v1272_v6, %v1374_v20  ;;  %v1333_v24 = vpop.f32.mrb[6].mxu0  ;;  %v1376_v25 = vpop.f32.mrb[6].mxu1 }
 0x139   : > { %v1397_v26 = vmax.f32 %v1389_v16, %v1391_v17  ;;  %v1393_v27 = vmax.f32 %v1231_v8, %v1333_v24  ;;  %v1395_v28 = vmax.f32 %v1274_v9, %v1376_v25  ;;  %v1335_v29 = vpop.f32.mrb[7].mxu0  ;;  %v1378_v30 = vpop.f32.mrb[7].mxu1 }
 0x13a   : > { %v1398_v31 = vmax.f32 %v1390_v21, %v1392_v22  ;;  %v1394_v32 = vmax.f32 %v1233_v10, %v1335_v29  ;;  %v1396_v33 = vmax.f32 %v1276_v11, %v1378_v30 }
 0x13b   : > { %v1413_v34 = vadd.f32 %v1406_v18, %v1397_v26  ;;  %v1399_v35 = vmax.f32 %v1393_v27, %v1395_v28 }
 0x13c   : > { %v1414_v36 = vadd.f32 %v1410_v23, %v1398_v31  ;;  %v1400_v37 = vmax.f32 %v1394_v32, %v1396_v33 }
 0x13d   : > { %v1417_v38 = vmax.f32 %v1413_v34, 0.0  ;;  %v1415_v39 = vadd.f32 %v1406_v18, %v1399_v35 }
 0x13e   : > { %v1418_v40 = vmax.f32 %v1414_v36, 0.0  ;;  %v1416_v41 = vadd.f32 %v1410_v23, %v1400_v37 }
 0x13f   : > { %v1419_v42 = vmax.f32 %v1415_v39, 0.0 }
 0x140   : > { %v1609_v43 = vpack.c.bf16 %v1418_v40, %v1417_v38  ;;  %v1420_v44 = vmax.f32 %v1416_v41, 0.0 }
 0x142   : > { %1436 = vst.msk [vmem:[%s170_s4] sm:$0xff] %vm1435_vm5, %v1609_v43  ;;  %v1610_v45 = vpack.c.bf16 %v1420_v44, %v1419_v42 }
 0x144   : > { %1440 = vst.msk [vmem:[%s170_s4 + $0x8] sm:$0x77] %vm1439_vm6, %v1610_v45 }
 0x145 PF: > { %s13_s12 = sadd.s32 1, %s1756_s12  }
 0x146   : > { %p10_p4 = scmp.ge.s32.totalorder %s13_s12, 4  }
 0x148   :  { %12 = sbr.rel (!%p10_p4) target bundleno = 1 (0x1), region = 66 }

// kernel: tile.18
= control target key start
LH: loop header
LB: loop body
LE: loop exit
PB: predicated region body
PF: predicated region fallthrough
CT: control target
= control target key end

     0   :  { %s22_s0 = inlined_call_operand.vmem [shape: f32[32], index: 0, kind: input, shape index: {}]   ;;  %s23_s1 = inlined_call_operand.vmem [shape: f32[7,32], index: 1, kind: output, shape index: {}]  }
   0x1   :  { %v4_v0 = vld [vmem:[%s22_s0] ss:$0 sm:$0xff] }
   0x2   :  { %5 = vst [vmem:[%s23_s1] sm:$0xff] %v4_v0 }

// kernel: tile.19
= control target key start
LH: loop header
LB: loop body
LE: loop exit
PB: predicated region body
PF: predicated region fallthrough
CT: control target
= control target key end

     0   :  { %s13_s8 = smov 3  ;;  %s44_s9 = smov 96   ;;  %vm4_vm0 = vcmask 261120   ;;  %vm10_vm1 = vcmask 1048320   ;;  %vm17_vm2 = vcmask 785920   ;;  %vm24_vm3 = vcmask 523520   ;;  %s75_s0 = inlined_call_operand.vmem [shape: f32[7,32], index: 0, kind: input, shape index: {}]   ;;  %s76_s1 = inlined_call_operand.vmem [shape: f32[1,224], index: 1, kind: output, shape index: {}]  }
   0x1   :  { %v37_v0 = vld [vmem:[%s75_s0 + $0x3] sm:$0x1]   ;;  %s20_s10 = smov 3  ;;  %v38_v1 = vld [vmem:[%s75_s0 + $0x2] ss:$4 sm:%s13_s8]   ;;  %s2_s15 = smov 3 }
   0x2   :  { %8 = vrot.lane.b32.xlu0 %v37_v0, %s44_s9  ;;  %v39_v2 = vld [vmem:[%s75_s0 + $0x1] ss:$4 sm:%s20_s10]   ;;  %s45_s16 = smov 32  }
   0x3   :  { %22 = vrot.lane.b32.xlu1 %v39_v2, %s45_s16  ;;  %v3_v3 = vld [vmem:[%s75_s0] ss:$4 sm:%s2_s15]   ;;  %s46_s0 = smov 64  }
   0x4   :  { %5 = vst.msk [vmem:[#allocation0] ss:$8 sm:$0x3] %vm4_vm0, %v3_v3  }
   0x6   :  { %15 = vrot.lane.b32.xlu0 %v38_v1, %s46_s0 }
  0x74   :  { %v9_v4 = vpop.permute.xlu0 %8  }
  0x75   :  { %11 = vst.msk [vmem:[#allocation0] sm:$0x1] %vm10_vm1, %v9_v4   ;;  %v23_v5 = vpop.permute.xlu1 %22  }
  0x78   :  { %v16_v6 = vpop.permute.xlu0 %15  }
  0x79   :  { %18 = vst.msk [vmem:[#allocation0] ss:$8 sm:$0x3] %vm17_vm2, %v16_v6  }
  0x7a   :  { %25 = vst.msk [vmem:[#allocation0] ss:$8 sm:$0x3] %vm24_vm3, %v23_v5  }
  0x81   :  { %v29_v7 = vld [vmem:[#allocation0] sm:$0x1]  ;;  %v33_v8 = vld [vmem:[#allocation0 + $0x8] sm:$0x1] }
  0x82   :  { %31 = vst [vmem:[%s76_s1] sm:$0x1] %v29_v7  ;;  %40 = vst [vmem:[%s76_s1 + $0x1] sm:$0x1] %v33_v8 }

// kernel: convnet_gate_forward.4
= control target key start
LH: loop header
LB: loop body
LE: loop exit
PB: predicated region body
PF: predicated region fallthrough
CT: control target
= control target key end

     0   :  { %s5738_s12 = smov 0   ;;  %s8375_s0 = inlined_call_operand.vmem [shape: bf16[2,18,288], index: 0, kind: input, shape index: {}]   ;;  %s8376_s1 = inlined_call_operand.vmem [shape: bf16[5,288,512], index: 1, kind: input, shape index: {}]   ;;  %s8377_s2 = inlined_call_operand.vmem [shape: f32[1,224], index: 2, kind: input, shape index: {}]   ;;  %s8378_s3 = inlined_call_operand.vmem [shape: f32[2,7,224], index: 3, kind: output, shape index: {}]  }
   0x1 LB: > { %s4236_s13 = sadd.s32 4294967295, %s5715_s12   ;;  %p4240_p0 = scmp.ge.s32.totalorder %s5715_s12, 1  ;;  %s5715_s12 = sphi %s5738_s12, %s13_s12  }
   0x2   : > { %p137_p1 = scmp.lt.s32.totalorder %s5715_s12, 3 }
   0x4   : > { %p138_p2 = pnand %p4240_p0, %p137_p1 }
   0x6   : > { %141 = sbr.rel (%p138_p2) target bundleno = 996 (0x3e4), region = 32 }
   0xd   : > { %v5081_v0 = vld [vmem:[%s8376_s1 + $0x244] ss:$16 sps:$4 sm:$0xff]   ;;  %v5083_v1 = vld [vmem:[%s8376_s1 + $0x24c] ss:$16 sps:$4 sm:$0xff]   ;;  %v5085_v2 = vld [vmem:[%s8376_s1 + $0x240] ss:$16 sps:$4 sm:$0xff]  }
   0xe   : > { %716 = vmatprep.subr.bf16.mxu0 %v5081_v0  ;;  %v5086_v3 = vld [vmem:[%s8376_s1 + $0x248] ss:$16 sps:$4 sm:$0xff]   ;;  %798 = vmatprep.subr.bf16.mxu1 %v5083_v1  ;;  %v5087_v4 = vld [vmem:[%s8376_s1 + $0x264] ss:$16 sps:$4 sm:$0xff]   ;;  %v5089_v5 = vld [vmem:[%s8376_s1 + $0x26c] ss:$16 sps:$4 sm:$0xff]  }
   0xf   : > { %717 = vmatpush1.bf16.msra.mxu0 %v5085_v2  ;;  %799 = vmatpush1.bf16.msra.mxu1 %v5086_v3  ;;  %v5091_v6 = vld [vmem:[%s8376_s1 + $0x260] ss:$16 sps:$4 sm:$0xff]   ;;  %v5092_v7 = vld [vmem:[%s8376_s1 + $0x268] ss:$16 sps:$4 sm:$0xff]   ;;  %v5093_v8 = vld [vmem:[%s8376_s1 + $0x284] ss:$16 sps:$4 sm:$0xff]  }
  0x10   : > { %718 = vmatprep.subr.bf16.mxu0 %v5087_v4  ;;  %800 = vmatprep.subr.bf16.mxu1 %v5089_v5  ;;  %v5095_v9 = vld [vmem:[%s8376_s1 + $0x28c] ss:$16 sps:$4 sm:$0xff]   ;;  %v5097_v10 = vld [vmem:[%s8376_s1 + $0x280] ss:$16 sps:$4 sm:$0xff]   ;;  %v5098_v11 = vld [vmem:[%s8376_s1 + $0x288] ss:$16 sps:$4 sm:$0xff]  }
  0x11   : > { %v5099_v12 = vld [vmem:[%s8376_s1 + $0x2a4] ss:$16 sps:$4 sm:$0xff]   ;;  %v5101_v13 = vld [vmem:[%s8376_s1 + $0x2ac] ss:$16 sps:$4 sm:$0xff]   ;;  %v5103_v14 = vld [vmem:[%s8376_s1 + $0x2a0] ss:$16 sps:$4 sm:$0xff]  }
  0x12   : > { %v5104_v15 = vld [vmem:[%s8376_s1 + $0x2a8] ss:$16 sps:$4 sm:$0xff]   ;;  %v5105_v16 = vld [vmem:[%s8376_s1 + $0x2c4] ss:$16 sps:$4 sm:$0xff]   ;;  %v5107_v17 = vld [vmem:[%s8376_s1 + $0x2cc] ss:$16 sps:$4 sm:$0xff]  }
  0x13   : > { %719 = vmatpush1.bf16.msra.mxu0 %v5091_v6  ;;  %801 = vmatpush1.bf16.msra.mxu1 %v5092_v7  ;;  %v5109_v18 = vld [vmem:[%s8376_s1 + $0x2c0] ss:$16 sps:$4 sm:$0xff]   ;;  %v5110_v19 = vld [vmem:[%s8376_s1 + $0x2c8] ss:$16 sps:$4 sm:$0xff]   ;;  %v5111_v20 = vld [vmem:[%s8376_s1 + $0x2e4] ss:$16 sps:$4 sm:$0xff]  }
  0x14   : > { %720 = vmatprep.subr.bf16.mxu0 %v5093_v8  ;;  %802 = vmatprep.subr.bf16.mxu1 %v5095_v9  ;;  %v5113_v21 = vld [vmem:[%s8376_s1 + $0x2ec] ss:$16 sps:$4 sm:$0xff]   ;;  %v5115_v22 = vld [vmem:[%s8376_s1 + $0x2e0] ss:$16 sps:$4 sm:$0xff]   ;;  %v5116_v23 = vld [vmem:[%s8376_s1 + $0x2e8] ss:$16 sps:$4 sm:$0xff]  }
  0x15   : > { %v5117_v24 = vld [vmem:[%s8376_s1 + $0x304] ss:$16 sps:$4 sm:$0xff]   ;;  %v5119_v25 = vld [vmem:[%s8376_s1 + $0x30c] ss:$16 sps:$4 sm:$0xff]   ;;  %v5121_v26 = vld [vmem:[%s8376_s1 + $0x300] ss:$16 sps:$4 sm:$0xff]  }
  0x16   : > { %v5122_v27 = vld [vmem:[%s8376_s1 + $0x308] ss:$16 sps:$4 sm:$0xff]   ;;  %v5123_v28 = vld [vmem:[%s8376_s1 + $0x324] ss:$16 sps:$4 sm:$0xff]   ;;  %v5125_v29 = vld [vmem:[%s8376_s1 + $0x32c] ss:$16 sps:$4 sm:$0xff]  }
  0x17   : > { %721 = vmatpush1.bf16.msra.mxu0 %v5097_v10  ;;  %803 = vmatpush1.bf16.msra.mxu1 %v5098_v11  ;;  %v5127_v30 = vld [vmem:[%s8376_s1 + $0x320] ss:$16 sps:$4 sm:$0xff]   ;;  %p161_p3 = scmp.lt.s32.totalorder %s4236_s13, 1  ;;  %v5128_v31 = vld [vmem:[%s8376_s1 + $0x328] ss:$16 sps:$4 sm:$0xff]   ;;  %vm712_vm0 = vcmask 261120  }
  0x18   : > { %722 = vmatprep.subr.bf16.mxu0 %v5099_v12  ;;  %804 = vmatprep.subr.bf16.mxu1 %v5101_v13  ;;  %v5129_v32 = vld [vmem:[%s8376_s1 + $0x344] ss:$16 sps:$4 sm:$0xff]   ;;  %v5131_v33 = vld [vmem:[%s8376_s1 + $0x34c] ss:$16 sps:$4 sm:$0xff]   ;;  %v5133_v34 = vld [vmem:[%s8376_s1 + $0x340] ss:$16 sps:$4 sm:$0xff]  }
  0x19   : > { %v5134_v35 = vld [vmem:[%s8376_s1 + $0x348] ss:$16 sps:$4 sm:$0xff]   ;;  %s8578_s13 = smov (!%p161_p3, %s4236_s13), 1  ;;  %v5135_v36 = vld [vmem:[%s8376_s1 + $0x364] ss:$16 sps:$4 sm:$0xff]   ;;  %vm4179_vm1 = vcmask 784384  }
  0x1a   : > { %v5137_v37 = vld [vmem:[%s8376_s1 + $0x36c] ss:$16 sps:$4 sm:$0xff]   ;;  %v5139_v38 = vld [vmem:[%s8376_s1 + $0x360] ss:$16 sps:$4 sm:$0xff]   ;;  %s5071_s17 = smul.u32 36, %s8578_s13  ;;  %s4926_s14 = sshll.u32 %s8578_s13, 4 }
  0x1b   : > { %723 = vmatpush1.bf16.msra.mxu0 %v5103_v14  ;;  %805 = vmatpush1.bf16.msra.mxu1 %v5104_v15  ;;  %v5140_v39 = vld [vmem:[%s8376_s1 + $0x368] ss:$16 sps:$4 sm:$0xff]   ;;  %v5141_v40 = vld [vmem:[%s8376_s1 + $0x384] ss:$16 sps:$4 sm:$0xff]   ;;  %v5143_v41 = vld [vmem:[%s8376_s1 + $0x38c] ss:$16 sps:$4 sm:$0xff]  }
  0x1c   : > { %724 = vmatprep.subr.bf16.mxu0 %v5105_v16  ;;  %806 = vmatprep.subr.bf16.mxu1 %v5107_v17  ;;  %v5145_v42 = vld [vmem:[%s8376_s1 + $0x380] ss:$16 sps:$4 sm:$0xff]   ;;  %v5146_v43 = vld [vmem:[%s8376_s1 + $0x388] ss:$16 sps:$4 sm:$0xff]   ;;  %s5888_s30 = scalar_lea.vmem %s8375_s0, %s5071_s17  ;;  %v5147_v44 = vld [vmem:[%s8376_s1 + $0x3a4] ss:$16 sps:$4 sm:$0xff]   ;;  %s170_s17 = scalar_lea.vmem %s8378_s3, %s4926_s14 }
  0x1d   : > { %v5149_v45 = vld [vmem:[%s8376_s1 + $0x3ac] ss:$16 sps:$4 sm:$0xff]   ;;  %v5151_v47 = vld [vmem:[%s8376_s1 + $0x3a0] ss:$16 sps:$4 sm:$0xff]   ;;  %v5152_v49 = vld [vmem:[%s8376_s1 + $0x3a8] ss:$16 sps:$4 sm:$0xff]  }
  0x1e   : > { %v246_v46 = vld [vmem:[%s5888_s30 + $0xc] sm:$0xff]  ;;  %v5153_v50 = vld [vmem:[%s8376_s1 + $0x3c4] ss:$16 sps:$4 sm:$0xff]   ;;  %v5158_v55 = vld [vmem:[%s8376_s1 + $0x3c8] ss:$16 sps:$4 sm:$0xff]  }
  0x1f   : > { %725 = vmatpush1.bf16.msra.mxu0 %v5109_v18  ;;  %807 = vmatpush1.bf16.msra.mxu1 %v5110_v19  ;;  %v4317_v48 = vcombine.high %v246_v46, %v246_v46  ;;  %v5155_v51 = vld [vmem:[%s8376_s1 + $0x3cc] ss:$16 sps:$4 sm:$0xff]   ;;  %v5157_v54 = vld [vmem:[%s8376_s1 + $0x3c0] ss:$16 sps:$4 sm:$0xff]   ;;  %v5159_v57 = vld [vmem:[%s8376_s1 + $0x3e4] ss:$16 sps:$4 sm:$0xff]   ;;  %v4316_v61 = vcombine.low %v246_v46, %v246_v46 }
  0x20   : > { %726 = vmatprep.subr.bf16.mxu0 %v5111_v20  ;;  %808 = vmatprep.subr.bf16.mxu1 %v5113_v21  ;;  %v5161_v58 = vld [vmem:[%s8376_s1 + $0x3ec] ss:$16 sps:$4 sm:$0xff]   ;;  %v5163_v60 = vld [vmem:[%s8376_s1 + $0x3e0] ss:$16 sps:$4 sm:$0xff]   ;;  %v5164_v62 = vld [vmem:[%s8376_s1 + $0x3e8] ss:$16 sps:$4 sm:$0xff]  }
  0x21   : > { %v337_v52 = vshrl.u32 %v4317_v48, 16  ;;  %v339_v53 = vshll.u32 %v4317_v48, 16  ;;  %v5165_v63 = vld [vmem:[%s8376_s1 + $0x404] ss:$16 sps:$4 sm:$0xff]   ;;  %v5167_v0 = vld [vmem:[%s8376_s1 + $0x40c] ss:$16 sps:$4 sm:$0xff]  }
  0x22   : > { %v332_v1 = vshll.u32 %v4316_v61, 16  ;;  %v5169_v2 = vld [vmem:[%s8376_s1 + $0x400] ss:$16 sps:$4 sm:$0xff]   ;;  %v5170_v3 = vld [vmem:[%s8376_s1 + $0x408] ss:$16 sps:$4 sm:$0xff]   ;;  %v330_v6 = vshrl.u32 %v4316_v61, 16 }
  0x23   : > { %727 = vmatpush1.bf16.msra.mxu0 %v5115_v22  ;;  %809 = vmatpush1.bf16.msra.mxu1 %v5116_v23  ;;  %v341_v56 = vrot.slane %v339_v53, 1  ;;  %v5171_v4 = vld [vmem:[%s8376_s1 + $0x424] ss:$16 sps:$4 sm:$0xff]   ;;  %v5173_v5 = vld [vmem:[%s8376_s1 + $0x42c] ss:$16 sps:$4 sm:$0xff]   ;;  %v8379_v23 = vmov 0  }
  0x24   : > { %728 = vmatprep.subr.bf16.mxu0 %v5117_v24  ;;  %810 = vmatprep.subr.bf16.mxu1 %v5119_v25  ;;  %v334_v7 = vrot.slane %v332_v1, 1  ;;  %v5175_v8 = vld [vmem:[%s8376_s1 + $0x420] ss:$16 sps:$4 sm:$0xff]   ;;  %v5176_v9 = vld [vmem:[%s8376_s1 + $0x428] ss:$16 sps:$4 sm:$0xff]  }
  0x25   : > { %v5921_v59 = vor.u32 %v341_v56, %v337_v52  ;;  %v5181_v10 = vld [vmem:[%s8376_s1 + $0x444] ss:$16 sps:$4 sm:$0xff]   ;;  %v5184_v11 = vld [vmem:[%s8376_s1 + $0x44c] ss:$16 sps:$4 sm:$0xff]   ;;  %v5179_v14 = vld [vmem:[%s8376_s1 + $0x440] ss:$16 sps:$4 sm:$0xff]  }
  0x26   : > { %v5961_v12 = vor.u32 %v334_v7, %v330_v6  ;;  %v5197_v13 = vld [vmem:[%s5888_s30 + $0x14] ss:$0 sps:$4 sm:$0xff]   ;;  %v5182_v15 = vld [vmem:[%s8376_s1 + $0x448] ss:$16 sps:$4 sm:$0xff]   ;;  %v5190_v17 = vld [vmem:[%s8376_s1 + $0x46c] ss:$16 sps:$4 sm:$0xff]  }
  0x27   : > { %729 = vmatpush1.bf16.msra.mxu0 %v5121_v26  ;;  %811 = vmatpush1.bf16.msra.mxu1 %v5122_v27  ;;  %v5187_v16 = vld [vmem:[%s8376_s1 + $0x464] ss:$16 sps:$4 sm:$0xff]   ;;  %v346_v18 = vshll.u32 %v5197_v13, 16  ;;  %v5185_v19 = vld [vmem:[%s8376_s1 + $0x460] ss:$16 sps:$4 sm:$0xff]   ;;  %v344_v24 = vshrl.u32 %v5197_v13, 16 }
  0x28   : > { %730 = vmatprep.subr.bf16.mxu0 %v5123_v28  ;;  %812 = vmatprep.subr.bf16.mxu1 %v5125_v29  ;;  %8450 = vst [vmem:[#allocation2_spill] sm:$0xff] %v5961_v12  ;;  %v5188_v20 = vld [vmem:[%s8376_s1 + $0x468] ss:$16 sps:$4 sm:$0xff]   ;;  %v5193_v21 = vld [vmem:[%s8376_s1 + $0x4] ss:$16 sps:$4 sm:$0xff]  }
  0x29   : > { %748 = vmatprep.mubr.bf16.mxu0 %v5921_v59  ;;  %830 = vmatprep.mubr.bf16.mxu1 %v5921_v59  ;;  %v5196_v22 = vld [vmem:[%s8376_s1 + $0xc] ss:$16 sps:$4 sm:$0xff]   ;;  %v348_v25 = vrot.slane %v346_v18, 1  ;;  %v5997_v27 = vld [vmem:[%s8376_s1] ss:$16 sps:$4 sm:$0xff]  }
  0x2a   : > { %v6002_v28 = vld [vmem:[%s8376_s1 + $0x8] ss:$16 sps:$4 sm:$0xff]   ;;  %v6007_v29 = vld [vmem:[%s8376_s1 + $0x24] ss:$16 sps:$4 sm:$0xff]   ;;  %v6145_v52 = vld [vmem:[%s8376_s1 + $0xcc] ss:$16 sps:$4 sm:$0xff]  }
  0x2b   : > { %731 = vmatpush1.bf16.msra.mxu0 %v5127_v30  ;;  %813 = vmatpush1.bf16.msra.mxu1 %v5128_v31  ;;  %v5992_v26 = vor.u32 %v348_v25, %v344_v24  ;;  %v6012_v30 = vld [vmem:[%s8376_s1 + $0x2c] ss:$16 sps:$4 sm:$0xff]   ;;  %v6023_v31 = vld [vmem:[%s8376_s1 + $0x20] ss:$16 sps:$4 sm:$0xff]   ;;  %v6251_v7 = vld [vmem:[%s8376_s1 + $0x148] ss:$16 sps:$4 sm:$0xff]  }
  0x2c   : > { %732 = vmatprep.subr.bf16.mxu0 %v5129_v32  ;;  %814 = vmatprep.subr.bf16.mxu1 %v5131_v33  ;;  %v6028_v32 = vld [vmem:[%s8376_s1 + $0x28] ss:$16 sps:$4 sm:$0xff]   ;;  %v6035_v33 = vld [vmem:[%s8376_s1 + $0x44] ss:$16 sps:$4 sm:$0xff]   ;;  %v6150_v53 = vld [vmem:[%s8376_s1 + $0xc0] ss:$16 sps:$4 sm:$0xff]  }
  0x2d   : > { %8451 = vst [vmem:[#allocation3_spill] sm:$0xff] %v5992_v26  ;;  %v6108_v46 = vld [vmem:[%s5888_s30] sm:$0xff]  ;;  %v6165_v56 = vld [vmem:[%s8376_s1 + $0xec] ss:$16 sps:$4 sm:$0xff]   ;;  %v6347_v25 = vld [vmem:[%s8376_s1 + $0x1c8] ss:$16 sps:$4 sm:$0xff]  }
  0x2e   : > { %v6119_v48 = vcombine.high %v6108_v46, %v6108_v46  ;;  %v6189_v61 = vld [vmem:[%s8376_s1 + $0x10c] ss:$16 sps:$4 sm:$0xff]   ;;  %v6246_v6 = vld [vmem:[%s8376_s1 + $0x140] ss:$16 sps:$4 sm:$0xff]   ;;  %v6280_v13 = vld [vmem:[%s8376_s1 + $0x184] ss:$16 sps:$4 sm:$0xff]  }
  0x2f   : > { %733 = vmatpush1.bf16.msra.mxu0 %v5133_v34  ;;  %815 = vmatpush1.bf16.msra.mxu1 %v5134_v35  ;;  %v6040_v34 = vld [vmem:[%s8376_s1 + $0x4c] ss:$16 sps:$4 sm:$0xff]   ;;  %v6047_v35 = vld [vmem:[%s8376_s1 + $0x40] ss:$16 sps:$4 sm:$0xff]   ;;  %8458 = vst [vmem:[#allocation10_spill] sm:$0xff] %v6347_v25 }
  0x30   : > { %734 = vmatprep.subr.bf16.mxu0 %v5135_v36  ;;  %816 = vmatprep.subr.bf16.mxu1 %v5137_v37  ;;  %v6052_v36 = vld [vmem:[%s8376_s1 + $0x48] ss:$16 sps:$4 sm:$0xff]   ;;  %v6059_v37 = vld [vmem:[%s8376_s1 + $0x64] ss:$16 sps:$4 sm:$0xff]   ;;  %v6213_v1 = vld [vmem:[%s8376_s1 + $0x12c] ss:$16 sps:$4 sm:$0xff]  }
  0x31   : > { %v6309_v18 = vld [vmem:[%s8376_s1 + $0x1ac] ss:$16 sps:$4 sm:$0xff]   ;;  %v6342_v24 = vld [vmem:[%s8376_s1 + $0x1c0] ss:$16 sps:$4 sm:$0xff]  }
  0x32   : > { %8453 = vst [vmem:[#allocation5_spill] sm:$0xff] %v6309_v18 }
  0x33   : > { %735 = vmatpush1.bf16.msra.mxu0 %v5139_v38  ;;  %817 = vmatpush1.bf16.msra.mxu1 %v5140_v39  ;;  %v6064_v38 = vld [vmem:[%s8376_s1 + $0x6c] ss:$16 sps:$4 sm:$0xff]   ;;  %v6071_v39 = vld [vmem:[%s8376_s1 + $0x60] ss:$16 sps:$4 sm:$0xff]  }
  0x34   : > { %736 = vmatprep.subr.bf16.mxu0 %v5141_v40  ;;  %818 = vmatprep.subr.bf16.mxu1 %v5143_v41  ;;  %v6076_v40 = vld [vmem:[%s8376_s1 + $0x68] ss:$16 sps:$4 sm:$0xff]   ;;  %v6083_v41 = vld [vmem:[%s8376_s1 + $0x84] ss:$16 sps:$4 sm:$0xff]  }
  0x37   : > { %737 = vmatpush1.bf16.msra.mxu0 %v5145_v42  ;;  %819 = vmatpush1.bf16.msra.mxu1 %v5146_v43  ;;  %v6088_v42 = vld [vmem:[%s8376_s1 + $0x8c] ss:$16 sps:$4 sm:$0xff]   ;;  %v6093_v43 = vld [vmem:[%s8376_s1 + $0x80] ss:$16 sps:$4 sm:$0xff]  }
  0x38   : > { %738 = vmatprep.subr.bf16.mxu0 %v5147_v44  ;;  %820 = vmatprep.subr.bf16.mxu1 %v5149_v45  ;;  %v6100_v44 = vld [vmem:[%s8376_s1 + $0x88] ss:$16 sps:$4 sm:$0xff]   ;;  %v6105_v45 = vld [vmem:[%s8376_s1 + $0xa4] ss:$16 sps:$4 sm:$0xff]  }
  0x3b   : > { %739 = vmatpush1.bf16.msra.mxu0 %v5151_v47  ;;  %821 = vmatpush1.bf16.msra.mxu1 %v5152_v49  ;;  %v6115_v47 = vld [vmem:[%s8376_s1 + $0xac] ss:$16 sps:$4 sm:$0xff]   ;;  %v6124_v49 = vld [vmem:[%s8376_s1 + $0xa0] ss:$16 sps:$4 sm:$0xff]  }
  0x3c   : > { %740 = vmatprep.subr.bf16.mxu0 %v5153_v50  ;;  %822 = vmatprep.subr.bf16.mxu1 %v5155_v51  ;;  %v6133_v50 = vld [vmem:[%s8376_s1 + $0xa8] ss:$16 sps:$4 sm:$0xff]   ;;  %v6138_v51 = vld [vmem:[%s8376_s1 + $0xc4] ss:$16 sps:$4 sm:$0xff]  }
  0x3f   : > { %741 = vmatpush1.bf16.msra.mxu0 %v5157_v54  ;;  %823 = vmatpush1.bf16.msra.mxu1 %v5158_v55  ;;  %v6155_v54 = vld [vmem:[%s8376_s1 + $0xc8] ss:$16 sps:$4 sm:$0xff]   ;;  %v6160_v55 = vld [vmem:[%s8376_s1 + $0xe4] ss:$16 sps:$4 sm:$0xff]  }
  0x40   : > { %742 = vmatprep.subr.bf16.mxu0 %v5159_v57  ;;  %824 = vmatprep.subr.bf16.mxu1 %v5161_v58  ;;  %v6174_v57 = vld [vmem:[%s8376_s1 + $0xe0] ss:$16 sps:$4 sm:$0xff]   ;;  %v6179_v58 = vld [vmem:[%s8376_s1 + $0xe8] ss:$16 sps:$4 sm:$0xff]  }
  0x43   : > { %743 = vmatpush1.bf16.msra.mxu0 %v5163_v60  ;;  %825 = vmatpush1.bf16.msra.mxu1 %v5164_v62  ;;  %v6184_v60 = vld [vmem:[%s8376_s1 + $0x104] ss:$16 sps:$4 sm:$0xff]   ;;  %v6198_v62 = vld [vmem:[%s8376_s1 + $0x100] ss:$16 sps:$4 sm:$0xff]  }
  0x44   : > { %744 = vmatprep.subr.bf16.mxu0 %v5165_v63  ;;  %826 = vmatprep.subr.bf16.mxu1 %v5167_v0  ;;  %v6203_v63 = vld [vmem:[%s8376_s1 + $0x108] ss:$16 sps:$4 sm:$0xff]   ;;  %v6208_v0 = vld [vmem:[%s8376_s1 + $0x124] ss:$16 sps:$4 sm:$0xff]  }
  0x47   : > { %745 = vmatpush1.bf16.msra.mxu0 %v5169_v2  ;;  %827 = vmatpush1.bf16.msra.mxu1 %v5170_v3  ;;  %v6222_v2 = vld [vmem:[%s8376_s1 + $0x120] ss:$16 sps:$4 sm:$0xff]   ;;  %v6227_v3 = vld [vmem:[%s8376_s1 + $0x128] ss:$16 sps:$4 sm:$0xff]  }
  0x48   : > { %746 = vmatprep.subr.bf16.mxu0 %v5171_v4  ;;  %828 = vmatprep.subr.bf16.mxu1 %v5173_v5  ;;  %v6232_v4 = vld [vmem:[%s8376_s1 + $0x144] ss:$16 sps:$4 sm:$0xff]   ;;  %v6237_v5 = vld [vmem:[%s8376_s1 + $0x14c] ss:$16 sps:$4 sm:$0xff]  }
  0x4b   : > { %747 = vmatpush1.bf16.msra.mxu0 %v5175_v8  ;;  %829 = vmatpush1.bf16.msra.mxu1 %v5176_v9  ;;  %v6256_v8 = vld [vmem:[%s8376_s1 + $0x164] ss:$16 sps:$4 sm:$0xff]   ;;  %v6261_v9 = vld [vmem:[%s8376_s1 + $0x16c] ss:$16 sps:$4 sm:$0xff]  }
  0x4c   : > { %757 = vmatprep.subr.bf16.mxu0 %v5181_v10  ;;  %839 = vmatprep.subr.bf16.mxu1 %v5184_v11  ;;  %v6270_v10 = vld [vmem:[%s8376_s1 + $0x160] ss:$16 sps:$4 sm:$0xff]   ;;  %v6275_v11 = vld [vmem:[%s8376_s1 + $0x168] ss:$16 sps:$4 sm:$0xff]  }
  0x4e   : > { %749 = vmatmul.mubr.bf16.vlgmr.msra.gmra.mrb[0].mxu0 %v5961_v12  ;;  %831 = vmatmul.mubr.bf16.vlgmr.msra.gmra.mrb[0].mxu1 %v5961_v12  ;;  %v6366_v12 = vld [vmem:[%s8376_s1 + $0x1e0] ss:$16 sps:$4 sm:$0xff]  }
  0x4f   : > { %758 = vmatpush1.bf16.msra.mxu0 %v5179_v14  ;;  %840 = vmatpush1.bf16.msra.mxu1 %v5182_v15  ;;  %v6285_v14 = vld [vmem:[%s8376_s1 + $0x18c] ss:$16 sps:$4 sm:$0xff]   ;;  %v6294_v15 = vld [vmem:[%s8376_s1 + $0x180] ss:$16 sps:$4 sm:$0xff]   ;;  %8461 = vst [vmem:[#allocation13_spill] sm:$0xff] %v6366_v12 }
  0x50   : > { %759 = vmatprep.subr.bf16.mxu0 %v5187_v16  ;;  %841 = vmatprep.subr.bf16.mxu1 %v5190_v17  ;;  %v6299_v16 = vld [vmem:[%s8376_s1 + $0x188] ss:$16 sps:$4 sm:$0xff]   ;;  %v6304_v17 = vld [vmem:[%s8376_s1 + $0x1a4] ss:$16 sps:$4 sm:$0xff]  }
  0x51   : > { %789 = vmatprep.mubr.bf16.mxu0 %v8379_v23  ;;  %871 = vmatprep.mubr.bf16.mxu1 %v8379_v23  ;;  %8452 = vst [vmem:[#allocation4_spill] sm:$0xff] %v6304_v17  ;;  %v6352_v23 = vld [vmem:[%s8376_s1 + $0x1e4] ss:$16 sps:$4 sm:$0xff]  }
  0x52   : > { %8459 = vst [vmem:[#allocation11_spill] sm:$0xff] %v6352_v23 }
  0x53   : > { %760 = vmatpush1.bf16.msra.mxu0 %v5185_v19  ;;  %842 = vmatpush1.bf16.msra.mxu1 %v5188_v20  ;;  %v6318_v19 = vld [vmem:[%s8376_s1 + $0x1a0] ss:$16 sps:$4 sm:$0xff]   ;;  %v6323_v20 = vld [vmem:[%s8376_s1 + $0x1a8] ss:$16 sps:$4 sm:$0xff]  }
  0x54   : > { %1253 = vmatprep.subr.bf16.mxu0 %v5193_v21  ;;  %1335 = vmatprep.subr.bf16.mxu1 %v5196_v22  ;;  %8454 = vst [vmem:[#allocation6_spill] sm:$0xff] %v6318_v19  ;;  %8455 = vst [vmem:[#allocation7_spill] sm:$0xff] %v6323_v20  ;;  %v6328_v21 = vld [vmem:[%s8376_s1 + $0x1c4] ss:$16 sps:$4 sm:$0xff]   ;;  %v6333_v22 = vld [vmem:[%s8376_s1 + $0x1cc] ss:$16 sps:$4 sm:$0xff]  }
  0x55   : > { %8456 = vst [vmem:[#allocation8_spill] sm:$0xff] %v6328_v21  ;;  %8457 = vst [vmem:[#allocation9_spill] sm:$0xff] %v6333_v22 }
  0x5a   : > { %4391 = vmatmul.mubr.msk.bf16.vlgmr.msra.gmra.mrb[0].mxu0 %vm712_vm0, %v5992_v26  ;;  %4392 = vmatmul.mubr.msk.bf16.vlgmr.msra.gmra.mrb[0].mxu1 %vm712_vm0, %v5992_v26  ;;  %v6357_v26 = vld [vmem:[%s8376_s1 + $0x1ec] ss:$16 sps:$4 sm:$0xff]  }
  0x5b   : > { %1254 = vmatpush1.bf16.msra.mxu0 %v5997_v27  ;;  %1336 = vmatpush1.bf16.msra.mxu1 %v6002_v28  ;;  %8460 = vst [vmem:[#allocation12_spill] sm:$0xff] %v6357_v26 }
  0x5c   : > { %1255 = vmatprep.subr.bf16.mxu0 %v6007_v29  ;;  %1337 = vmatprep.subr.bf16.mxu1 %v6012_v30 }
  0x5d   : > { %1285 = vmatprep.mubr.bf16.mxu0 %v6119_v48  ;;  %1367 = vmatprep.mubr.bf16.mxu1 %v6119_v48 }
  0x5f   : > { %1256 = vmatpush1.bf16.msra.mxu0 %v6023_v31  ;;  %1338 = vmatpush1.bf16.msra.mxu1 %v6028_v32 }
  0x60   : > { %1257 = vmatprep.subr.bf16.mxu0 %v6035_v33  ;;  %1339 = vmatprep.subr.bf16.mxu1 %v6040_v34 }
  0x63   : > { %1258 = vmatpush1.bf16.msra.mxu0 %v6047_v35  ;;  %1340 = vmatpush1.bf16.msra.mxu1 %v6052_v36 }
  0x64   : > { %1259 = vmatprep.subr.bf16.mxu0 %v6059_v37  ;;  %1341 = vmatprep.subr.bf16.mxu1 %v6064_v38 }
  0x67   : > { %1260 = vmatpush1.bf16.msra.mxu0 %v6071_v39  ;;  %1342 = vmatpush1.bf16.msra.mxu1 %v6076_v40 }
  0x68   : > { %1261 = vmatprep.subr.bf16.mxu0 %v6083_v41  ;;  %1343 = vmatprep.subr.bf16.mxu1 %v6088_v42 }
  0x6b   : > { %1262 = vmatpush1.bf16.msra.mxu0 %v6093_v43  ;;  %1344 = vmatpush1.bf16.msra.mxu1 %v6100_v44 }
  0x6c   : > { %1263 = vmatprep.subr.bf16.mxu0 %v6105_v45  ;;  %1345 = vmatprep.subr.bf16.mxu1 %v6115_v47 }
  0x6f   : > { %1264 = vmatpush1.bf16.msra.mxu0 %v6124_v49  ;;  %1346 = vmatpush1.bf16.msra.mxu1 %v6133_v50 }
  0x70   : > { %1265 = vmatprep.subr.bf16.mxu0 %v6138_v51  ;;  %1347 = vmatprep.subr.bf16.mxu1 %v6145_v52 }
  0x73   : > { %1266 = vmatpush1.bf16.msra.mxu0 %v6150_v53  ;;  %1348 = vmatpush1.bf16.msra.mxu1 %v6155_v54 }
  0x74   : > { %1267 = vmatprep.subr.bf16.mxu0 %v6160_v55  ;;  %1349 = vmatprep.subr.bf16.mxu1 %v6165_v56 }
  0x77   : > { %1268 = vmatpush1.bf16.msra.mxu0 %v6174_v57  ;;  %1350 = vmatpush1.bf16.msra.mxu1 %v6179_v58 }
  0x78   : > { %1269 = vmatprep.subr.bf16.mxu0 %v6184_v60  ;;  %1351 = vmatprep.subr.bf16.mxu1 %v6189_v61 }
  0x7b   : > { %1270 = vmatpush1.bf16.msra.mxu0 %v6198_v62  ;;  %1352 = vmatpush1.bf16.msra.mxu1 %v6203_v63 }
  0x7c   : > { %1271 = vmatprep.subr.bf16.mxu0 %v6208_v0  ;;  %1353 = vmatprep.subr.bf16.mxu1 %v6213_v1 }
  0x7f   : > { %1272 = vmatpush1.bf16.msra.mxu0 %v6222_v2  ;;  %1354 = vmatpush1.bf16.msra.mxu1 %v6227_v3 }
  0x80   : > { %1273 = vmatprep.subr.bf16.mxu0 %v6232_v4  ;;  %1355 = vmatprep.subr.bf16.mxu1 %v6237_v5 }
  0x83   : > { %1274 = vmatpush1.bf16.msra.mxu0 %v6246_v6  ;;  %1356 = vmatpush1.bf16.msra.mxu1 %v6251_v7 }
  0x84   : > { %1275 = vmatprep.subr.bf16.mxu0 %v6256_v8  ;;  %1357 = vmatprep.subr.bf16.mxu1 %v6261_v9 }
  0x87   : > { %1276 = vmatpush1.bf16.msra.mxu0 %v6270_v10  ;;  %1358 = vmatpush1.bf16.msra.mxu1 %v6275_v11 }
  0x88   : > { %1277 = vmatprep.subr.bf16.mxu0 %v6280_v13  ;;  %1359 = vmatprep.subr.bf16.mxu1 %v6285_v14 }
  0x8b   : > { %1278 = vmatpush1.bf16.msra.mxu0 %v6294_v15  ;;  %1360 = vmatpush1.bf16.msra.mxu1 %v6299_v16 }
  0x8c   : > { %1279 = vmatprep.subr.bf16.mxu0 %v6304_v17  ;;  %1361 = vmatprep.subr.bf16.mxu1 %v6309_v18  ;;  %v6371_v18 = vld [vmem:[%s8376_s1 + $0x1e8] ss:$16 sps:$4 sm:$0xff]   ;;  %v6399_v17 = vcombine.low %v6108_v46, %v6108_v46  ;;  %v6418_v46 = vld [vmem:[%s8376_s1 + $0x220] ss:$16 sps:$4 sm:$0xff]  }
  0x8d   : > { %8462 = vst [vmem:[#allocation14_spill] sm:$0xff] %v6371_v18 }
  0x8f   : > { %1280 = vmatpush1.bf16.msra.mxu0 %v6318_v19  ;;  %1362 = vmatpush1.bf16.msra.mxu1 %v6323_v20  ;;  %v6376_v19 = vld [vmem:[%s8376_s1 + $0x204] ss:$16 sps:$4 sm:$0xff]   ;;  %v6395_v20 = vld [vmem:[%s8376_s1 + $0x208] ss:$16 sps:$4 sm:$0xff]  }
  0x90   : > { %1281 = vmatprep.subr.bf16.mxu0 %v6328_v21  ;;  %1363 = vmatprep.subr.bf16.mxu1 %v6333_v22  ;;  %8463 = vst [vmem:[#allocation15_spill] sm:$0xff] %v6376_v19  ;;  %v6381_v21 = vld [vmem:[%s8376_s1 + $0x20c] ss:$16 sps:$4 sm:$0xff]   ;;  %v6390_v22 = vld [vmem:[%s8376_s1 + $0x200] ss:$16 sps:$4 sm:$0xff]   ;;  %8466 = vst [vmem:[#allocation18_spill] sm:$0xff] %v6395_v20 }
  0x91   : > { %8464 = vst [vmem:[#allocation16_spill] sm:$0xff] %v6381_v21  ;;  %8465 = vst [vmem:[#allocation17_spill] sm:$0xff] %v6390_v22 }
  0x93   : > { %1282 = vmatpush1.bf16.msra.mxu0 %v6342_v24  ;;  %1364 = vmatpush1.bf16.msra.mxu1 %v6347_v25  ;;  %v6423_v25 = vld [vmem:[%s8376_s1 + $0x228] ss:$16 sps:$4 sm:$0xff]  }
  0x94   : > { %1283 = vmatprep.subr.bf16.mxu0 %v6352_v23  ;;  %1365 = vmatprep.subr.bf16.mxu1 %v6357_v26  ;;  %v6404_v23 = vld [vmem:[%s8376_s1 + $0x224] ss:$16 sps:$4 sm:$0xff]   ;;  %v6409_v26 = vld [vmem:[%s8376_s1 + $0x22c] ss:$16 sps:$4 sm:$0xff]  }
  0x95   : > { %8467 = vst [vmem:[#allocation19_spill] sm:$0xff] %v6404_v23  ;;  %8468 = vst [vmem:[#allocation20_spill] sm:$0xff] %v6409_v26 }
  0x97   : > { %1284 = vmatpush1.bf16.msra.mxu0 %v6366_v12  ;;  %1366 = vmatpush1.bf16.msra.mxu1 %v6371_v18 }
  0x98   : > { %1294 = vmatprep.subr.bf16.mxu0 %v6376_v19  ;;  %1376 = vmatprep.subr.bf16.mxu1 %v6381_v21  ;;  %v8469_v21 = vmov 0   ;;  %v1427_v19 = vshll.u32 %v6119_v48, 16 }
  0x9a   : > { %1286 = vmatmul.mubr.bf16.vlgmr.msra.gmra.mrb[0].mxu0 %v6399_v17  ;;  %1368 = vmatmul.mubr.bf16.vlgmr.msra.gmra.mrb[0].mxu1 %v6399_v17  ;;  %v1429_v18 = vrot.slane %v1427_v19, 1  ;;  %v5641_v19 = vld [vmem:[%s8376_s1 + $0x260] ss:$16 sps:$4 sm:$0xff]  }
  0x9b   : > { %1295 = vmatpush1.bf16.msra.mxu0 %v6390_v22  ;;  %1377 = vmatpush1.bf16.msra.mxu1 %v6395_v20  ;;  %v5635_v22 = vld [vmem:[%s8376_s1 + $0x244] ss:$16 sps:$4 sm:$0xff]   ;;  %v1425_v20 = vshrl.u32 %v6119_v48, 16 }
  0x9c   : > { %1296 = vmatprep.subr.bf16.mxu0 %v6404_v23  ;;  %1378 = vmatprep.subr.bf16.mxu1 %v6409_v26  ;;  %v5636_v23 = vld [vmem:[%s8376_s1 + $0x24c] ss:$16 sps:$4 sm:$0xff]   ;;  %v6443_v26 = vld [vmem:[%s5888_s30 + $0x8] ss:$0 sps:$4 sm:$0xff]   ;;  %v5639_v48 = vld [vmem:[%s8376_s1 + $0x264] ss:$16 sps:$4 sm:$0xff]  }
  0x9d   : > { %1326 = vmatprep.mubr.bf16.mxu0 %v8469_v21  ;;  %1408 = vmatprep.mubr.bf16.mxu1 %v8469_v21  ;;  %v6446_v12 = vor.u32 %v1429_v18, %v1425_v20  ;;  %v5640_v18 = vld [vmem:[%s8376_s1 + $0x26c] ss:$16 sps:$4 sm:$0xff]   ;;  %v5642_v20 = vld [vmem:[%s8376_s1 + $0x268] ss:$16 sps:$4 sm:$0xff]  }
  0x9f   : > { %1297 = vmatpush1.bf16.msra.mxu0 %v6418_v46  ;;  %1379 = vmatpush1.bf16.msra.mxu1 %v6423_v25  ;;  %8470 = vst [vmem:[#allocation21_spill] sm:$0xff] %v6446_v12 }
  0xa0   : > { %1442 = vmatprep.subr.bf16.mxu0 %v5635_v22  ;;  %1524 = vmatprep.subr.bf16.mxu1 %v5636_v23  ;;  %v5637_v22 = vld [vmem:[%s8376_s1 + $0x240] ss:$16 sps:$4 sm:$0xff]   ;;  %v5638_v23 = vld [vmem:[%s8376_s1 + $0x248] ss:$16 sps:$4 sm:$0xff]  }
  0xa6   : > { %4468 = vmatmul.mubr.msk.bf16.vlgmr.msra.gmra.mrb[0].mxu0 %vm712_vm0, %v6443_v26  ;;  %4469 = vmatmul.mubr.msk.bf16.vlgmr.msra.gmra.mrb[0].mxu1 %vm712_vm0, %v6443_v26 }
  0xa7   : > { %1443 = vmatpush1.bf16.msra.mxu0 %v5637_v22  ;;  %1525 = vmatpush1.bf16.msra.mxu1 %v5638_v23  ;;  %v5643_v22 = vld [vmem:[%s8376_s1 + $0x284] ss:$16 sps:$4 sm:$0xff]   ;;  %v5644_v23 = vld [vmem:[%s8376_s1 + $0x28c] ss:$16 sps:$4 sm:$0xff]  }
  0xa8   : > { %1444 = vmatprep.subr.bf16.mxu0 %v5639_v48  ;;  %1526 = vmatprep.subr.bf16.mxu1 %v5640_v18  ;;  %v5645_v48 = vld [vmem:[%s8376_s1 + $0x280] ss:$16 sps:$4 sm:$0xff]   ;;  %v5646_v18 = vld [vmem:[%s8376_s1 + $0x288] ss:$16 sps:$4 sm:$0xff]  }
  0xa9   : > { %1474 = vmatprep.mubr.bf16.mxu0 %v6446_v12  ;;  %1556 = vmatprep.mubr.bf16.mxu1 %v6446_v12 }
  0xab   : > { %1445 = vmatpush1.bf16.msra.mxu0 %v5641_v19  ;;  %1527 = vmatpush1.bf16.msra.mxu1 %v5642_v20  ;;  %v5647_v19 = vld [vmem:[%s8376_s1 + $0x2a4] ss:$16 sps:$4 sm:$0xff]   ;;  %v5648_v20 = vld [vmem:[%s8376_s1 + $0x2ac] ss:$16 sps:$4 sm:$0xff]  }
  0xac   : > { %1446 = vmatprep.subr.bf16.mxu0 %v5643_v22  ;;  %1528 = vmatprep.subr.bf16.mxu1 %v5644_v23  ;;  %v5649_v22 = vld [vmem:[%s8376_s1 + $0x2a0] ss:$16 sps:$4 sm:$0xff]   ;;  %v5650_v23 = vld [vmem:[%s8376_s1 + $0x2a8] ss:$16 sps:$4 sm:$0xff]  }
  0xaf   : > { %1447 = vmatpush1.bf16.msra.mxu0 %v5645_v48  ;;  %1529 = vmatpush1.bf16.msra.mxu1 %v5646_v18  ;;  %v5651_v48 = vld [vmem:[%s8376_s1 + $0x2c4] ss:$16 sps:$4 sm:$0xff]   ;;  %v5652_v18 = vld [vmem:[%s8376_s1 + $0x2cc] ss:$16 sps:$4 sm:$0xff]  }
  0xb0   : > { %1448 = vmatprep.subr.bf16.mxu0 %v5647_v19  ;;  %1530 = vmatprep.subr.bf16.mxu1 %v5648_v20  ;;  %v5653_v19 = vld [vmem:[%s8376_s1 + $0x2c0] ss:$16 sps:$4 sm:$0xff]   ;;  %v5654_v20 = vld [vmem:[%s8376_s1 + $0x2c8] ss:$16 sps:$4 sm:$0xff]  }
  0xb3   : > { %1449 = vmatpush1.bf16.msra.mxu0 %v5649_v22  ;;  %1531 = vmatpush1.bf16.msra.mxu1 %v5650_v23  ;;  %v5655_v22 = vld [vmem:[%s8376_s1 + $0x2e4] ss:$16 sps:$4 sm:$0xff]   ;;  %v5656_v23 = vld [vmem:[%s8376_s1 + $0x2ec] ss:$16 sps:$4 sm:$0xff]  }
  0xb4   : > { %1450 = vmatprep.subr.bf16.mxu0 %v5651_v48  ;;  %1532 = vmatprep.subr.bf16.mxu1 %v5652_v18  ;;  %v5657_v48 = vld [vmem:[%s8376_s1 + $0x2e0] ss:$16 sps:$4 sm:$0xff]   ;;  %v5658_v18 = vld [vmem:[%s8376_s1 + $0x2e8] ss:$16 sps:$4 sm:$0xff]  }
  0xb7   : > { %1451 = vmatpush1.bf16.msra.mxu0 %v5653_v19  ;;  %1533 = vmatpush1.bf16.msra.mxu1 %v5654_v20  ;;  %v5659_v19 = vld [vmem:[%s8376_s1 + $0x304] ss:$16 sps:$4 sm:$0xff]   ;;  %v5660_v20 = vld [vmem:[%s8376_s1 + $0x30c] ss:$16 sps:$4 sm:$0xff]  }
  0xb8   : > { %1452 = vmatprep.subr.bf16.mxu0 %v5655_v22  ;;  %1534 = vmatprep.subr.bf16.mxu1 %v5656_v23  ;;  %v5661_v22 = vld [vmem:[%s8376_s1 + $0x300] ss:$16 sps:$4 sm:$0xff]   ;;  %v5662_v23 = vld [vmem:[%s8376_s1 + $0x308] ss:$16 sps:$4 sm:$0xff]  }
  0xbb   : > { %1453 = vmatpush1.bf16.msra.mxu0 %v5657_v48  ;;  %1535 = vmatpush1.bf16.msra.mxu1 %v5658_v18  ;;  %v5663_v48 = vld [vmem:[%s8376_s1 + $0x324] ss:$16 sps:$4 sm:$0xff]   ;;  %v5664_v18 = vld [vmem:[%s8376_s1 + $0x32c] ss:$16 sps:$4 sm:$0xff]  }
  0xbc   : > { %1454 = vmatprep.subr.bf16.mxu0 %v5659_v19  ;;  %1536 = vmatprep.subr.bf16.mxu1 %v5660_v20  ;;  %v5665_v19 = vld [vmem:[%s8376_s1 + $0x320] ss:$16 sps:$4 sm:$0xff]   ;;  %v5666_v20 = vld [vmem:[%s8376_s1 + $0x328] ss:$16 sps:$4 sm:$0xff]  }
  0xbf   : > { %1455 = vmatpush1.bf16.msra.mxu0 %v5661_v22  ;;  %1537 = vmatpush1.bf16.msra.mxu1 %v5662_v23  ;;  %v5667_v22 = vld [vmem:[%s8376_s1 + $0x344] ss:$16 sps:$4 sm:$0xff]   ;;  %v5668_v23 = vld [vmem:[%s8376_s1 + $0x34c] ss:$16 sps:$4 sm:$0xff]  }
  0xc0   : > { %1456 = vmatprep.subr.bf16.mxu0 %v5663_v48  ;;  %1538 = vmatprep.subr.bf16.mxu1 %v5664_v18  ;;  %v5669_v48 = vld [vmem:[%s8376_s1 + $0x340] ss:$16 sps:$4 sm:$0xff]   ;;  %v5670_v18 = vld [vmem:[%s8376_s1 + $0x348] ss:$16 sps:$4 sm:$0xff]  }
  0xc3   : > { %1457 = vmatpush1.bf16.msra.mxu0 %v5665_v19  ;;  %1539 = vmatpush1.bf16.msra.mxu1 %v5666_v20  ;;  %v5671_v19 = vld [vmem:[%s8376_s1 + $0x364] ss:$16 sps:$4 sm:$0xff]   ;;  %v5672_v20 = vld [vmem:[%s8376_s1 + $0x36c] ss:$16 sps:$4 sm:$0xff]  }
  0xc4   : > { %1458 = vmatprep.subr.bf16.mxu0 %v5667_v22  ;;  %1540 = vmatprep.subr.bf16.mxu1 %v5668_v23  ;;  %v5673_v22 = vld [vmem:[%s8376_s1 + $0x360] ss:$16 sps:$4 sm:$0xff]   ;;  %v5674_v23 = vld [vmem:[%s8376_s1 + $0x368] ss:$16 sps:$4 sm:$0xff]  }
  0xc7   : > { %1459 = vmatpush1.bf16.msra.mxu0 %v5669_v48  ;;  %1541 = vmatpush1.bf16.msra.mxu1 %v5670_v18  ;;  %v5675_v48 = vld [vmem:[%s8376_s1 + $0x384] ss:$16 sps:$4 sm:$0xff]   ;;  %v5676_v18 = vld [vmem:[%s8376_s1 + $0x38c] ss:$16 sps:$4 sm:$0xff]  }
  0xc8   : > { %1460 = vmatprep.subr.bf16.mxu0 %v5671_v19  ;;  %1542 = vmatprep.subr.bf16.mxu1 %v5672_v20  ;;  %v5677_v19 = vld [vmem:[%s8376_s1 + $0x380] ss:$16 sps:$4 sm:$0xff]   ;;  %v5678_v20 = vld [vmem:[%s8376_s1 + $0x388] ss:$16 sps:$4 sm:$0xff]  }
  0xcb   : > { %1461 = vmatpush1.bf16.msra.mxu0 %v5673_v22  ;;  %1543 = vmatpush1.bf16.msra.mxu1 %v5674_v23  ;;  %v5679_v22 = vld [vmem:[%s8376_s1 + $0x3a4] ss:$16 sps:$4 sm:$0xff]   ;;  %v5680_v23 = vld [vmem:[%s8376_s1 + $0x3ac] ss:$16 sps:$4 sm:$0xff]  }
  0xcc   : > { %1462 = vmatprep.subr.bf16.mxu0 %v5675_v48  ;;  %1544 = vmatprep.subr.bf16.mxu1 %v5676_v18  ;;  %v5681_v48 = vld [vmem:[%s8376_s1 + $0x3a0] ss:$16 sps:$4 sm:$0xff]   ;;  %v5682_v18 = vld [vmem:[%s8376_s1 + $0x3a8] ss:$16 sps:$4 sm:$0xff]  }
  0xcf   : > { %1463 = vmatpush1.bf16.msra.mxu0 %v5677_v19  ;;  %1545 = vmatpush1.bf16.msra.mxu1 %v5678_v20  ;;  %v5683_v19 = vld [vmem:[%s8376_s1 + $0x3c4] ss:$16 sps:$4 sm:$0xff]   ;;  %v5684_v20 = vld [vmem:[%s8376_s1 + $0x3cc] ss:$16 sps:$4 sm:$0xff]  }
  0xd0   : > { %1464 = vmatprep.subr.bf16.mxu0 %v5679_v22  ;;  %1546 = vmatprep.subr.bf16.mxu1 %v5680_v23  ;;  %v5685_v22 = vld [vmem:[%s8376_s1 + $0x3c0] ss:$16 sps:$4 sm:$0xff]   ;;  %v5686_v23 = vld [vmem:[%s8376_s1 + $0x3c8] ss:$16 sps:$4 sm:$0xff]  }
  0xd3   : > { %1465 = vmatpush1.bf16.msra.mxu0 %v5681_v48  ;;  %1547 = vmatpush1.bf16.msra.mxu1 %v5682_v18  ;;  %v5687_v48 = vld [vmem:[%s8376_s1 + $0x3e4] ss:$16 sps:$4 sm:$0xff]   ;;  %v5688_v18 = vld [vmem:[%s8376_s1 + $0x3ec] ss:$16 sps:$4 sm:$0xff]  }
  0xd4   : > { %1466 = vmatprep.subr.bf16.mxu0 %v5683_v19  ;;  %1548 = vmatprep.subr.bf16.mxu1 %v5684_v20  ;;  %v1420_v19 = vshll.u32 %v6399_v17, 16  ;;  %v5689_v20 = vld [vmem:[%s8376_s1 + $0x3e0] ss:$16 sps:$4 sm:$0xff]  }
  0xd6   : > { %v1422_v12 = vrot.slane %v1420_v19, 1 }
  0xd7   : > { %1467 = vmatpush1.bf16.msra.mxu0 %v5685_v22  ;;  %1549 = vmatpush1.bf16.msra.mxu1 %v5686_v23  ;;  %v5690_v22 = vld [vmem:[%s8376_s1 + $0x3e8] ss:$16 sps:$4 sm:$0xff]   ;;  %v5691_v23 = vld [vmem:[%s8376_s1 + $0x404] ss:$16 sps:$4 sm:$0xff]  }
  0xd8   : > { %1468 = vmatprep.subr.bf16.mxu0 %v5687_v48  ;;  %1550 = vmatprep.subr.bf16.mxu1 %v5688_v18  ;;  %v5692_v48 = vld [vmem:[%s8376_s1 + $0x40c] ss:$16 sps:$4 sm:$0xff]   ;;  %v1418_v18 = vshrl.u32 %v6399_v17, 16 }
  0xd9   : > { %v5696_v17 = vld [vmem:[%s8376_s1 + $0x42c] ss:$16 sps:$4 sm:$0xff]  }
  0xda   : > { %v6636_v19 = vor.u32 %v1422_v12, %v1418_v18  ;;  %v5700_v12 = vld [vmem:[%s8376_s1 + $0x44c] ss:$16 sps:$4 sm:$0xff]   ;;  %v1433_v18 = vshll.u32 %v6443_v26, 16 }
  0xdb   : > { %1469 = vmatpush1.bf16.msra.mxu0 %v5689_v20  ;;  %1551 = vmatpush1.bf16.msra.mxu1 %v5690_v22  ;;  %v5693_v20 = vld [vmem:[%s8376_s1 + $0x400] ss:$16 sps:$4 sm:$0xff]   ;;  %v5694_v22 = vld [vmem:[%s8376_s1 + $0x408] ss:$16 sps:$4 sm:$0xff]  }
  0xdc   : > { %1470 = vmatprep.subr.bf16.mxu0 %v5691_v23  ;;  %1552 = vmatprep.subr.bf16.mxu1 %v5692_v48  ;;  %v5695_v23 = vld [vmem:[%s8376_s1 + $0x424] ss:$16 sps:$4 sm:$0xff]   ;;  %v5697_v48 = vld [vmem:[%s8376_s1 + $0x420] ss:$16 sps:$4 sm:$0xff]  }
  0xdf   : > { %1471 = vmatpush1.bf16.msra.mxu0 %v5693_v20  ;;  %1553 = vmatpush1.bf16.msra.mxu1 %v5694_v22  ;;  %v5698_v20 = vld [vmem:[%s8376_s1 + $0x428] ss:$16 sps:$4 sm:$0xff]   ;;  %v5699_v22 = vld [vmem:[%s8376_s1 + $0x444] ss:$16 sps:$4 sm:$0xff]  }
  0xe0   : > { %1472 = vmatprep.subr.bf16.mxu0 %v5695_v23  ;;  %1554 = vmatprep.subr.bf16.mxu1 %v5696_v17  ;;  %v5701_v23 = vld [vmem:[%s8376_s1 + $0x440] ss:$16 sps:$4 sm:$0xff]   ;;  %v5702_v17 = vld [vmem:[%s8376_s1 + $0x448] ss:$16 sps:$4 sm:$0xff]  }
  0xe3   : > { %1473 = vmatpush1.bf16.msra.mxu0 %v5697_v48  ;;  %1555 = vmatpush1.bf16.msra.mxu1 %v5698_v20  ;;  %v5703_v48 = vld [vmem:[%s8376_s1 + $0x464] ss:$16 sps:$4 sm:$0xff]   ;;  %v5704_v20 = vld [vmem:[%s8376_s1 + $0x46c] ss:$16 sps:$4 sm:$0xff]  }
  0xe4   : > { %1483 = vmatprep.subr.bf16.mxu0 %v5699_v22  ;;  %1565 = vmatprep.subr.bf16.mxu1 %v5700_v12  ;;  %v1431_v22 = vshrl.u32 %v6443_v26, 16  ;;  %v1435_v12 = vrot.slane %v1433_v18, 1  ;;  %v5708_v26 = vld [vmem:[%s8376_s1 + $0xc] ss:$16 sps:$4 sm:$0xff]  }
  0xe6   : > { %1475 = vmatmul.mubr.bf16.vlgmr.msra.gmra.mrb[4].mxu0 %v6636_v19  ;;  %1557 = vmatmul.mubr.bf16.vlgmr.msra.gmra.mrb[4].mxu1 %v6636_v19  ;;  %v6680_v18 = vor.u32 %v1435_v12, %v1431_v22  ;;  %v6978_v22 = vld [vmem:[%s8376_s1 + $0x588] ss:$16 sps:$4 sm:$0xff]   ;;  %v6985_v12 = vld [vmem:[%s8376_s1 + $0x5a4] ss:$16 sps:$4 sm:$0xff]  }
  0xe7   : > { %1484 = vmatpush1.bf16.msra.mxu0 %v5701_v23  ;;  %1566 = vmatpush1.bf16.msra.mxu1 %v5702_v17  ;;  %v5705_v23 = vld [vmem:[%s8376_s1 + $0x460] ss:$16 sps:$4 sm:$0xff]   ;;  %v5706_v17 = vld [vmem:[%s8376_s1 + $0x468] ss:$16 sps:$4 sm:$0xff]  }
  0xe8   : > { %1485 = vmatprep.subr.bf16.mxu0 %v5703_v48  ;;  %1567 = vmatprep.subr.bf16.mxu1 %v5704_v20  ;;  %v5707_v48 = vld [vmem:[%s8376_s1 + $0x4] ss:$16 sps:$4 sm:$0xff]   ;;  %v6973_v20 = vld [vmem:[%s8376_s1 + $0x580] ss:$16 sps:$4 sm:$0xff]  }
  0xe9   : > { %1515 = vmatprep.mubr.bf16.mxu0 %v8469_v21  ;;  %1597 = vmatprep.mubr.bf16.mxu1 %v8469_v21 }
  0xeb   : > { %1486 = vmatpush1.bf16.msra.mxu0 %v5705_v23  ;;  %1568 = vmatpush1.bf16.msra.mxu1 %v5706_v17  ;;  %v6990_v23 = vld [vmem:[%s8376_s1 + $0x5ac] ss:$16 sps:$4 sm:$0xff]   ;;  %v6997_v17 = vld [vmem:[%s8376_s1 + $0x5a0] ss:$16 sps:$4 sm:$0xff]  }
  0xec   : > { %1606 = vmatprep.subr.bf16.mxu0 %v5707_v48  ;;  %1688 = vmatprep.subr.bf16.mxu1 %v5708_v26  ;;  %v7002_v48 = vld [vmem:[%s8376_s1 + $0x5a8] ss:$16 sps:$4 sm:$0xff]   ;;  %v7009_v26 = vld [vmem:[%s8376_s1 + $0x5c4] ss:$16 sps:$4 sm:$0xff]  }
  0xf2   : > { %4470 = vmatmul.mubr.msk.bf16.vlgmr.msra.gmra.mrb[4].mxu0 %vm712_vm0, %v6680_v18  ;;  %4471 = vmatmul.mubr.msk.bf16.vlgmr.msra.gmra.mrb[4].mxu1 %vm712_vm0, %v6680_v18 }
  0xf3   : > { %1607 = vmatpush1.bf16.msra.mxu0 %v5997_v27  ;;  %1689 = vmatpush1.bf16.msra.mxu1 %v6002_v28  ;;  %v8472_v27 = vld [vmem:[#allocation5_spill] sm:$0xff]  ;;  %v8473_v28 = vld [vmem:[#allocation6_spill] sm:$0xff] }
  0xf4   : > { %1608 = vmatprep.subr.bf16.mxu0 %v6007_v29  ;;  %1690 = vmatprep.subr.bf16.mxu1 %v6012_v30  ;;  %v8474_v29 = vld [vmem:[#allocation7_spill] sm:$0xff]  ;;  %v8475_v30 = vld [vmem:[#allocation8_spill] sm:$0xff] }
  0xf5   : > { %1638 = vmatprep.mubr.bf16.mxu0 %v5921_v59  ;;  %1720 = vmatprep.mubr.bf16.mxu1 %v5921_v59  ;;  %v8471_v59 = vld [vmem:[#allocation4_spill] sm:$0xff] }
  0xf7   : > { %1609 = vmatpush1.bf16.msra.mxu0 %v6023_v31  ;;  %1691 = vmatpush1.bf16.msra.mxu1 %v6028_v32  ;;  %v8476_v31 = vld [vmem:[#allocation9_spill] sm:$0xff]  ;;  %v8477_v32 = vld [vmem:[#allocation10_spill] sm:$0xff] }
  0xf8   : > { %1610 = vmatprep.subr.bf16.mxu0 %v6035_v33  ;;  %1692 = vmatprep.subr.bf16.mxu1 %v6040_v34  ;;  %v8478_v33 = vld [vmem:[#allocation11_spill] sm:$0xff]  ;;  %v8479_v34 = vld [vmem:[#allocation12_spill] sm:$0xff] }
  0xfb   : > { %1611 = vmatpush1.bf16.msra.mxu0 %v6047_v35  ;;  %1693 = vmatpush1.bf16.msra.mxu1 %v6052_v36  ;;  %v8480_v35 = vld [vmem:[#allocation13_spill] sm:$0xff]  ;;  %v8481_v36 = vld [vmem:[#allocation14_spill] sm:$0xff] }
  0xfc   : > { %1612 = vmatprep.subr.bf16.mxu0 %v6059_v37  ;;  %1694 = vmatprep.subr.bf16.mxu1 %v6064_v38  ;;  %v8482_v37 = vld [vmem:[#allocation15_spill] sm:$0xff]  ;;  %v8483_v38 = vld [vmem:[#allocation16_spill] sm:$0xff] }
  0xff   : > { %1613 = vmatpush1.bf16.msra.mxu0 %v6071_v39  ;;  %1695 = vmatpush1.bf16.msra.mxu1 %v6076_v40  ;;  %v8484_v39 = vld [vmem:[#allocation2_spill] sm:$0xff]  ;;  %v8485_v40 = vld [vmem:[#allocation17_spill] sm:$0xff] }
 0x100   : > { %1614 = vmatprep.subr.bf16.mxu0 %v6083_v41  ;;  %1696 = vmatprep.subr.bf16.mxu1 %v6088_v42  ;;  %v8486_v41 = vld [vmem:[#allocation18_spill] sm:$0xff]  ;;  %v8487_v42 = vld [vmem:[#allocation19_spill] sm:$0xff] }
 0x103   : > { %1615 = vmatpush1.bf16.msra.mxu0 %v6093_v43  ;;  %1697 = vmatpush1.bf16.msra.mxu1 %v6100_v44  ;;  %v8488_v43 = vld [vmem:[#allocation20_spill] sm:$0xff] }
 0x104   : > { %1616 = vmatprep.subr.bf16.mxu0 %v6105_v45  ;;  %1698 = vmatprep.subr.bf16.mxu1 %v6115_v47  ;;  %v6761_v44 = vld [vmem:[%s8376_s1 + $0x484] ss:$16 sps:$4 sm:$0xff]   ;;  %v6766_v45 = vld [vmem:[%s8376_s1 + $0x48c] ss:$16 sps:$4 sm:$0xff]   ;;  %v6777_v47 = vld [vmem:[%s8376_s1 + $0x480] ss:$16 sps:$4 sm:$0xff]  }
 0x107   : > { %1617 = vmatpush1.bf16.msra.mxu0 %v6124_v49  ;;  %1699 = vmatpush1.bf16.msra.mxu1 %v6133_v50  ;;  %v6782_v49 = vld [vmem:[%s8376_s1 + $0x488] ss:$16 sps:$4 sm:$0xff]   ;;  %v6787_v50 = vld [vmem:[%s8376_s1 + $0x4a4] ss:$16 sps:$4 sm:$0xff]  }
 0x108   : > { %1618 = vmatprep.subr.bf16.mxu0 %v6138_v51  ;;  %1700 = vmatprep.subr.bf16.mxu1 %v6145_v52  ;;  %v6792_v51 = vld [vmem:[%s8376_s1 + $0x4ac] ss:$16 sps:$4 sm:$0xff]  }
 0x109   : > { %v8489_v52 = vld [vmem:[#allocation3_spill] sm:$0xff] }
 0x10b   : > { %1619 = vmatpush1.bf16.msra.mxu0 %v6150_v53  ;;  %1701 = vmatpush1.bf16.msra.mxu1 %v6155_v54  ;;  %v6803_v53 = vld [vmem:[%s8376_s1 + $0x4a0] ss:$16 sps:$4 sm:$0xff]   ;;  %v6808_v54 = vld [vmem:[%s8376_s1 + $0x4a8] ss:$16 sps:$4 sm:$0xff]  }
 0x10c   : > { %1620 = vmatprep.subr.bf16.mxu0 %v6160_v55  ;;  %1702 = vmatprep.subr.bf16.mxu1 %v6165_v56  ;;  %v6815_v55 = vld [vmem:[%s8376_s1 + $0x4c4] ss:$16 sps:$4 sm:$0xff]   ;;  %v6820_v56 = vld [vmem:[%s8376_s1 + $0x4cc] ss:$16 sps:$4 sm:$0xff]  }
 0x10f   : > { %1621 = vmatpush1.bf16.msra.mxu0 %v6174_v57  ;;  %1703 = vmatpush1.bf16.msra.mxu1 %v6179_v58  ;;  %v8490_v57 = vld [vmem:[#allocation21_spill] sm:$0xff]  ;;  %v6829_v58 = vld [vmem:[%s8376_s1 + $0x4c0] ss:$16 sps:$4 sm:$0xff]  }
 0x110   : > { %1622 = vmatprep.subr.bf16.mxu0 %v6184_v60  ;;  %1704 = vmatprep.subr.bf16.mxu1 %v6189_v61  ;;  %v6834_v60 = vld [vmem:[%s8376_s1 + $0x4c8] ss:$16 sps:$4 sm:$0xff]   ;;  %v6841_v61 = vld [vmem:[%s8376_s1 + $0x4e4] ss:$16 sps:$4 sm:$0xff]  }
 0x113   : > { %1623 = vmatpush1.bf16.msra.mxu0 %v6198_v62  ;;  %1705 = vmatpush1.bf16.msra.mxu1 %v6203_v63  ;;  %v6846_v62 = vld [vmem:[%s8376_s1 + $0x4ec] ss:$16 sps:$4 sm:$0xff]   ;;  %v6853_v63 = vld [vmem:[%s8376_s1 + $0x4e0] ss:$16 sps:$4 sm:$0xff]  }
 0x114   : > { %1624 = vmatprep.subr.bf16.mxu0 %v6208_v0  ;;  %1706 = vmatprep.subr.bf16.mxu1 %v6213_v1  ;;  %v6858_v0 = vld [vmem:[%s8376_s1 + $0x4e8] ss:$16 sps:$4 sm:$0xff]   ;;  %v6865_v1 = vld [vmem:[%s8376_s1 + $0x504] ss:$16 sps:$4 sm:$0xff]  }
 0x117   : > { %1625 = vmatpush1.bf16.msra.mxu0 %v6222_v2  ;;  %1707 = vmatpush1.bf16.msra.mxu1 %v6227_v3  ;;  %v6870_v2 = vld [vmem:[%s8376_s1 + $0x50c] ss:$16 sps:$4 sm:$0xff]   ;;  %v6877_v3 = vld [vmem:[%s8376_s1 + $0x500] ss:$16 sps:$4 sm:$0xff]  }
 0x118   : > { %1626 = vmatprep.subr.bf16.mxu0 %v6232_v4  ;;  %1708 = vmatprep.subr.bf16.mxu1 %v6237_v5  ;;  %v6882_v4 = vld [vmem:[%s8376_s1 + $0x508] ss:$16 sps:$4 sm:$0xff]   ;;  %v6889_v5 = vld [vmem:[%s8376_s1 + $0x524] ss:$16 sps:$4 sm:$0xff]  }
 0x11b   : > { %1627 = vmatpush1.bf16.msra.mxu0 %v6246_v6  ;;  %1709 = vmatpush1.bf16.msra.mxu1 %v6251_v7  ;;  %v6894_v6 = vld [vmem:[%s8376_s1 + $0x52c] ss:$16 sps:$4 sm:$0xff]   ;;  %v6901_v7 = vld [vmem:[%s8376_s1 + $0x520] ss:$16 sps:$4 sm:$0xff]  }
 0x11c   : > { %1628 = vmatprep.subr.bf16.mxu0 %v6256_v8  ;;  %1710 = vmatprep.subr.bf16.mxu1 %v6261_v9  ;;  %v6906_v8 = vld [vmem:[%s8376_s1 + $0x528] ss:$16 sps:$4 sm:$0xff]   ;;  %v6913_v9 = vld [vmem:[%s8376_s1 + $0x544] ss:$16 sps:$4 sm:$0xff]  }
 0x11f   : > { %1629 = vmatpush1.bf16.msra.mxu0 %v6270_v10  ;;  %1711 = vmatpush1.bf16.msra.mxu1 %v6275_v11  ;;  %v6918_v10 = vld [vmem:[%s8376_s1 + $0x54c] ss:$16 sps:$4 sm:$0xff]   ;;  %v6925_v11 = vld [vmem:[%s8376_s1 + $0x540] ss:$16 sps:$4 sm:$0xff]  }
 0x120   : > { %1630 = vmatprep.subr.bf16.mxu0 %v6280_v13  ;;  %1712 = vmatprep.subr.bf16.mxu1 %v6285_v14  ;;  %v6930_v13 = vld [vmem:[%s8376_s1 + $0x548] ss:$16 sps:$4 sm:$0xff]   ;;  %v6937_v14 = vld [vmem:[%s8376_s1 + $0x564] ss:$16 sps:$4 sm:$0xff]  }
 0x123   : > { %1631 = vmatpush1.bf16.msra.mxu0 %v6294_v15  ;;  %1713 = vmatpush1.bf16.msra.mxu1 %v6299_v16  ;;  %v6942_v15 = vld [vmem:[%s8376_s1 + $0x56c] ss:$16 sps:$4 sm:$0xff]   ;;  %v6949_v16 = vld [vmem:[%s8376_s1 + $0x560] ss:$16 sps:$4 sm:$0xff]  }
 0x124   : > { %1632 = vmatprep.subr.bf16.mxu0 %v8471_v59  ;;  %1714 = vmatprep.subr.bf16.mxu1 %v8472_v27  ;;  %v7014_v59 = vld [vmem:[%s8376_s1 + $0x5cc] ss:$16 sps:$4 sm:$0xff]   ;;  %v7021_v27 = vld [vmem:[%s8376_s1 + $0x5c0] ss:$16 sps:$4 sm:$0xff]  }
 0x127   : > { %1633 = vmatpush1.bf16.msra.mxu0 %v8473_v28  ;;  %1715 = vmatpush1.bf16.msra.mxu1 %v8474_v29  ;;  %v7026_v28 = vld [vmem:[%s8376_s1 + $0x5c8] ss:$16 sps:$4 sm:$0xff]   ;;  %v7033_v29 = vld [vmem:[%s8376_s1 + $0x5e4] ss:$16 sps:$4 sm:$0xff]  }
 0x128   : > { %1634 = vmatprep.subr.bf16.mxu0 %v8475_v30  ;;  %1716 = vmatprep.subr.bf16.mxu1 %v8476_v31  ;;  %v7038_v30 = vld [vmem:[%s8376_s1 + $0x5ec] ss:$16 sps:$4 sm:$0xff]   ;;  %v7045_v31 = vld [vmem:[%s8376_s1 + $0x5e0] ss:$16 sps:$4 sm:$0xff]  }
 0x12b   : > { %1635 = vmatpush1.bf16.msra.mxu0 %v6342_v24  ;;  %1717 = vmatpush1.bf16.msra.mxu1 %v8477_v32  ;;  %v6954_v24 = vld [vmem:[%s8376_s1 + $0x568] ss:$16 sps:$4 sm:$0xff]  }
 0x12c   : > { %1636 = vmatprep.subr.bf16.mxu0 %v8478_v33  ;;  %1718 = vmatprep.subr.bf16.mxu1 %v8479_v34  ;;  %v7050_v32 = vld [vmem:[%s8376_s1 + $0x5e8] ss:$16 sps:$4 sm:$0xff]   ;;  %v7057_v33 = vld [vmem:[%s8376_s1 + $0x604] ss:$16 sps:$4 sm:$0xff]   ;;  %v7062_v34 = vld [vmem:[%s8376_s1 + $0x60c] ss:$16 sps:$4 sm:$0xff]  }
 0x12f   : > { %1637 = vmatpush1.bf16.msra.mxu0 %v8480_v35  ;;  %1719 = vmatpush1.bf16.msra.mxu1 %v8481_v36  ;;  %v7069_v35 = vld [vmem:[%s8376_s1 + $0x600] ss:$16 sps:$4 sm:$0xff]   ;;  %v7074_v36 = vld [vmem:[%s8376_s1 + $0x608] ss:$16 sps:$4 sm:$0xff]  }
 0x130   : > { %1647 = vmatprep.subr.bf16.mxu0 %v8482_v37  ;;  %1729 = vmatprep.subr.bf16.mxu1 %v8483_v38  ;;  %v7081_v37 = vld [vmem:[%s8376_s1 + $0x624] ss:$16 sps:$4 sm:$0xff]   ;;  %v7086_v38 = vld [vmem:[%s8376_s1 + $0x62c] ss:$16 sps:$4 sm:$0xff]  }
 0x132   : > { %1639 = vmatmul.mubr.bf16.vlgmr.msra.gmra.mrb[4].mxu0 %v8484_v39  ;;  %1721 = vmatmul.mubr.bf16.vlgmr.msra.gmra.mrb[4].mxu1 %v8484_v39  ;;  %v7093_v39 = vld [vmem:[%s8376_s1 + $0x620] ss:$16 sps:$4 sm:$0xff]  }
 0x133   : > { %1648 = vmatpush1.bf16.msra.mxu0 %v8485_v40  ;;  %1730 = vmatpush1.bf16.msra.mxu1 %v8486_v41  ;;  %v7098_v40 = vld [vmem:[%s8376_s1 + $0x628] ss:$16 sps:$4 sm:$0xff]   ;;  %v7105_v41 = vld [vmem:[%s8376_s1 + $0x644] ss:$16 sps:$4 sm:$0xff]  }
 0x134   : > { %1649 = vmatprep.subr.bf16.mxu0 %v8487_v42  ;;  %1731 = vmatprep.subr.bf16.mxu1 %v8488_v43  ;;  %8491 = vst [vmem:[#allocation4_spill] sm:$0xff] %v7098_v40  ;;  %8492 = vst [vmem:[#allocation5_spill] sm:$0xff] %v7105_v41  ;;  %v7110_v42 = vld [vmem:[%s8376_s1 + $0x64c] ss:$16 sps:$4 sm:$0xff]   ;;  %v7117_v43 = vld [vmem:[%s8376_s1 + $0x640] ss:$16 sps:$4 sm:$0xff]  }
 0x135   : > { %1679 = vmatprep.mubr.bf16.mxu0 %v8469_v21  ;;  %1761 = vmatprep.mubr.bf16.mxu1 %v8469_v21  ;;  %8493 = vst [vmem:[#allocation6_spill] sm:$0xff] %v7110_v42  ;;  %8494 = vst [vmem:[#allocation7_spill] sm:$0xff] %v7117_v43 }
 0x137   : > { %1650 = vmatpush1.bf16.msra.mxu0 %v6418_v46  ;;  %1732 = vmatpush1.bf16.msra.mxu1 %v6423_v25  ;;  %v6961_v25 = vld [vmem:[%s8376_s1 + $0x584] ss:$16 sps:$4 sm:$0xff]   ;;  %v6966_v46 = vld [vmem:[%s8376_s1 + $0x58c] ss:$16 sps:$4 sm:$0xff]  }
 0x138   : > { %2203 = vmatprep.subr.bf16.mxu0 %v6761_v44  ;;  %2285 = vmatprep.subr.bf16.mxu1 %v6766_v45 }
 0x13e   : > { %4472 = vmatmul.mubr.msk.bf16.vlgmr.msra.gmra.mrb[4].mxu0 %vm712_vm0, %v8489_v52  ;;  %4473 = vmatmul.mubr.msk.bf16.vlgmr.msra.gmra.mrb[4].mxu1 %vm712_vm0, %v8489_v52  ;;  %v7122_v52 = vld [vmem:[%s8376_s1 + $0x648] ss:$16 sps:$4 sm:$0xff]  }
 0x13f   : > { %2204 = vmatpush1.bf16.msra.mxu0 %v6777_v47  ;;  %2286 = vmatpush1.bf16.msra.mxu1 %v6782_v49  ;;  %8495 = vst [vmem:[#allocation8_spill] sm:$0xff] %v7122_v52 }
 0x140   : > { %2205 = vmatprep.subr.bf16.mxu0 %v6787_v50  ;;  %2287 = vmatprep.subr.bf16.mxu1 %v6792_v51 }
 0x141   : > { %2235 = vmatprep.mubr.bf16.mxu0 %v8490_v57  ;;  %2317 = vmatprep.mubr.bf16.mxu1 %v8490_v57  ;;  %v7129_v57 = vld [vmem:[%s8376_s1 + $0x664] ss:$16 sps:$4 sm:$0xff]  }
 0x142   : > { %8496 = vst [vmem:[#allocation9_spill] sm:$0xff] %v7129_v57 }
 0x143   : > { %2206 = vmatpush1.bf16.msra.mxu0 %v6803_v53  ;;  %2288 = vmatpush1.bf16.msra.mxu1 %v6808_v54 }
 0x144   : > { %2207 = vmatprep.subr.bf16.mxu0 %v6815_v55  ;;  %2289 = vmatprep.subr.bf16.mxu1 %v6820_v56 }
 0x147   : > { %2208 = vmatpush1.bf16.msra.mxu0 %v6829_v58  ;;  %2290 = vmatpush1.bf16.msra.mxu1 %v6834_v60 }
 0x148   : > { %2209 = vmatprep.subr.bf16.mxu0 %v6841_v61  ;;  %2291 = vmatprep.subr.bf16.mxu1 %v6846_v62 }
 0x14b   : > { %2210 = vmatpush1.bf16.msra.mxu0 %v6853_v63  ;;  %2292 = vmatpush1.bf16.msra.mxu1 %v6858_v0 }
 0x14c   : > { %2211 = vmatprep.subr.bf16.mxu0 %v6865_v1  ;;  %2293 = vmatprep.subr.bf16.mxu1 %v6870_v2 }
 0x14f   : > { %2212 = vmatpush1.bf16.msra.mxu0 %v6877_v3  ;;  %2294 = vmatpush1.bf16.msra.mxu1 %v6882_v4 }
 0x150   : > { %2213 = vmatprep.subr.bf16.mxu0 %v6889_v5  ;;  %2295 = vmatprep.subr.bf16.mxu1 %v6894_v6 }
 0x153   : > { %2214 = vmatpush1.bf16.msra.mxu0 %v6901_v7  ;;  %2296 = vmatpush1.bf16.msra.mxu1 %v6906_v8 }
 0x154   : > { %2215 = vmatprep.subr.bf16.mxu0 %v6913_v9  ;;  %2297 = vmatprep.subr.bf16.mxu1 %v6918_v10 }
 0x157   : > { %2216 = vmatpush1.bf16.msra.mxu0 %v6925_v11  ;;  %2298 = vmatpush1.bf16.msra.mxu1 %v6930_v13 }
 0x158   : > { %2217 = vmatprep.subr.bf16.mxu0 %v6937_v14  ;;  %2299 = vmatprep.subr.bf16.mxu1 %v6942_v15 }
 0x15b   : > { %2218 = vmatpush1.bf16.msra.mxu0 %v6949_v16  ;;  %2300 = vmatpush1.bf16.msra.mxu1 %v6954_v24 }
 0x15c   : > { %2219 = vmatprep.subr.bf16.mxu0 %v6961_v25  ;;  %2301 = vmatprep.subr.bf16.mxu1 %v6966_v46 }
 0x15f   : > { %2220 = vmatpush1.bf16.msra.mxu0 %v6973_v20  ;;  %2302 = vmatpush1.bf16.msra.mxu1 %v6978_v22 }
 0x160   : > { %2221 = vmatprep.subr.bf16.mxu0 %v6985_v12  ;;  %2303 = vmatprep.subr.bf16.mxu1 %v6990_v23 }
 0x163   : > { %2222 = vmatpush1.bf16.msra.mxu0 %v6997_v17  ;;  %2304 = vmatpush1.bf16.msra.mxu1 %v7002_v48 }
 0x164   : > { %2223 = vmatprep.subr.bf16.mxu0 %v7009_v26  ;;  %2305 = vmatprep.subr.bf16.mxu1 %v7014_v59 }
 0x167   : > { %2224 = vmatpush1.bf16.msra.mxu0 %v7021_v27  ;;  %2306 = vmatpush1.bf16.msra.mxu1 %v7026_v28 }
 0x168   : > { %2225 = vmatprep.subr.bf16.mxu0 %v7033_v29  ;;  %2307 = vmatprep.subr.bf16.mxu1 %v7038_v30 }
 0x16b   : > { %2226 = vmatpush1.bf16.msra.mxu0 %v7045_v31  ;;  %2308 = vmatpush1.bf16.msra.mxu1 %v7050_v32 }
 0x16c   : > { %2227 = vmatprep.subr.bf16.mxu0 %v7057_v33  ;;  %2309 = vmatprep.subr.bf16.mxu1 %v7062_v34 }
 0x16f   : > { %2228 = vmatpush1.bf16.msra.mxu0 %v7069_v35  ;;  %2310 = vmatpush1.bf16.msra.mxu1 %v7074_v36 }
 0x170   : > { %2229 = vmatprep.subr.bf16.mxu0 %v7081_v37  ;;  %2311 = vmatprep.subr.bf16.mxu1 %v7086_v38 }
 0x173   : > { %2230 = vmatpush1.bf16.msra.mxu0 %v7093_v39  ;;  %2312 = vmatpush1.bf16.msra.mxu1 %v7098_v40  ;;  %v7134_v40 = vld [vmem:[%s8376_s1 + $0x66c] ss:$16 sps:$4 sm:$0xff]  }
 0x174   : > { %2231 = vmatprep.subr.bf16.mxu0 %v7105_v41  ;;  %2313 = vmatprep.subr.bf16.mxu1 %v7110_v42  ;;  %8497 = vst [vmem:[#allocation10_spill] sm:$0xff] %v7134_v40  ;;  %v7141_v41 = vld [vmem:[%s8376_s1 + $0x660] ss:$16 sps:$4 sm:$0xff]   ;;  %v7146_v42 = vld [vmem:[%s8376_s1 + $0x668] ss:$16 sps:$4 sm:$0xff]  }
 0x175   : > { %8498 = vst [vmem:[#allocation11_spill] sm:$0xff] %v7141_v41  ;;  %8499 = vst [vmem:[#allocation12_spill] sm:$0xff] %v7146_v42 }
 0x177   : > { %2232 = vmatpush1.bf16.msra.mxu0 %v7117_v43  ;;  %2314 = vmatpush1.bf16.msra.mxu1 %v7122_v52  ;;  %v7153_v43 = vld [vmem:[%s8376_s1 + $0x684] ss:$16 sps:$4 sm:$0xff]   ;;  %v7158_v52 = vld [vmem:[%s8376_s1 + $0x68c] ss:$16 sps:$4 sm:$0xff]  }
 0x178   : > { %2233 = vmatprep.subr.bf16.mxu0 %v7129_v57  ;;  %2315 = vmatprep.subr.bf16.mxu1 %v7134_v40  ;;  %8500 = vst [vmem:[#allocation13_spill] sm:$0xff] %v7153_v43  ;;  %8501 = vst [vmem:[#allocation14_spill] sm:$0xff] %v7158_v52  ;;  %v7165_v57 = vld [vmem:[%s8376_s1 + $0x680] ss:$16 sps:$4 sm:$0xff]   ;;  %v7170_v40 = vld [vmem:[%s8376_s1 + $0x688] ss:$16 sps:$4 sm:$0xff]  }
 0x179   : > { %8502 = vst [vmem:[#allocation15_spill] sm:$0xff] %v7170_v40 }
 0x17b   : > { %2234 = vmatpush1.bf16.msra.mxu0 %v7141_v41  ;;  %2316 = vmatpush1.bf16.msra.mxu1 %v7146_v42  ;;  %v7177_v41 = vld [vmem:[%s8376_s1 + $0x6a4] ss:$16 sps:$4 sm:$0xff]   ;;  %v7182_v42 = vld [vmem:[%s8376_s1 + $0x6ac] ss:$16 sps:$4 sm:$0xff]  }
 0x17c   : > { %2244 = vmatprep.subr.bf16.mxu0 %v7153_v43  ;;  %2326 = vmatprep.subr.bf16.mxu1 %v7158_v52  ;;  %v7191_v52 = vld [vmem:[%s8376_s1 + $0x6a0] ss:$16 sps:$4 sm:$0xff]   ;;  %v7196_v43 = vld [vmem:[%s8376_s1 + $0x6a8] ss:$16 sps:$4 sm:$0xff]  }
 0x17e   : > { %2236 = vmatmul.mubr.bf16.vlgmr.msra.gmra.mrb[0].mxu0 %v6636_v19  ;;  %2318 = vmatmul.mubr.bf16.vlgmr.msra.gmra.mrb[0].mxu1 %v6636_v19  ;;  %v7207_v19 = vld [vmem:[%s5888_s30 + $0x10] ss:$12 sps:$4 sm:$0x1e]  }
 0x17f   : > { %2245 = vmatpush1.bf16.msra.mxu0 %v7165_v57  ;;  %2327 = vmatpush1.bf16.msra.mxu1 %v7170_v40  ;;  %8503 = vst [vmem:[#allocation16_spill] sm:$0xff] %v7207_v19  ;;  %v7210_v40 = vrot.slane %v7207_v19, 1  ;;  %v7671_v19 = vld [vmem:[%s8376_s1 + $0x8a4] ss:$16 sps:$4 sm:$0xff]  }
 0x180   : > { %2246 = vmatprep.subr.bf16.mxu0 %v7177_v41  ;;  %2328 = vmatprep.subr.bf16.mxu1 %v7182_v42 }
 0x181   : > { %2276 = vmatprep.mubr.bf16.mxu0 %v8469_v21  ;;  %2358 = vmatprep.mubr.bf16.mxu1 %v8469_v21 }
 0x183   : > { %2247 = vmatpush1.bf16.msra.mxu0 %v7191_v52  ;;  %2329 = vmatpush1.bf16.msra.mxu1 %v7196_v43 }
 0x184   : > { %2396 = vmatprep.subr.bf16.mxu0 %v6761_v44  ;;  %2478 = vmatprep.subr.bf16.mxu1 %v6766_v45  ;;  %v8505_v44 = vld [vmem:[#allocation5_spill] sm:$0xff]  ;;  %v8506_v45 = vld [vmem:[#allocation6_spill] sm:$0xff] }
 0x18a   : > { %4618 = vmatmul.mubr.msk.bf16.vlgmr.msra.gmra.mrb[0].mxu0 %vm712_vm0, %v6680_v18  ;;  %4619 = vmatmul.mubr.msk.bf16.vlgmr.msra.gmra.mrb[0].mxu1 %vm712_vm0, %v6680_v18  ;;  %v8504_v18 = vld [vmem:[#allocation4_spill] sm:$0xff] }
 0x18b   : > { %2397 = vmatpush1.bf16.msra.mxu0 %v6777_v47  ;;  %2479 = vmatpush1.bf16.msra.mxu1 %v6782_v49  ;;  %v7275_v47 = vld [vmem:[%s5888_s30 + $0xc] ss:$12 sps:$4 sm:$0x1e]   ;;  %8523 = vst [vmem:[#allocation4_spill] sm:$0xff] %v7671_v19 }
 0x18c   : > { %2398 = vmatprep.subr.bf16.mxu0 %v6787_v50  ;;  %2480 = vmatprep.subr.bf16.mxu1 %v6792_v51  ;;  %8507 = vst [vmem:[#allocation2_spill] sm:$0xff] %v7275_v47  ;;  %v8508_v49 = vld [vmem:[#allocation7_spill] sm:$0xff]  ;;  %v8509_v50 = vld [vmem:[#allocation8_spill] sm:$0xff]  ;;  %v8510_v51 = vld [vmem:[#allocation9_spill] sm:$0xff] }
 0x18d   : > { %2428 = vmatprep.mubr.bf16.mxu0 %v7210_v40  ;;  %2510 = vmatprep.mubr.bf16.mxu1 %v7210_v40 }
 0x18f   : > { %2399 = vmatpush1.bf16.msra.mxu0 %v6803_v53  ;;  %2481 = vmatpush1.bf16.msra.mxu1 %v6808_v54  ;;  %v8511_v53 = vld [vmem:[#allocation10_spill] sm:$0xff]  ;;  %v7282_v54 = vrot.slane %v7275_v47, 1  ;;  %v7664_v47 = vld [vmem:[%s8376_s1 + $0x888] ss:$16 sps:$4 sm:$0xff]  }
 0x190   : > { %2400 = vmatprep.subr.bf16.mxu0 %v6815_v55  ;;  %2482 = vmatprep.subr.bf16.mxu1 %v6820_v56  ;;  %v8512_v55 = vld [vmem:[#allocation11_spill] sm:$0xff]  ;;  %v8513_v56 = vld [vmem:[#allocation12_spill] sm:$0xff]  ;;  %8522 = vst [vmem:[#allocation21_spill] sm:$0xff] %v7664_v47 }
 0x193   : > { %2401 = vmatpush1.bf16.msra.mxu0 %v6829_v58  ;;  %2483 = vmatpush1.bf16.msra.mxu1 %v6834_v60  ;;  %v8514_v58 = vld [vmem:[#allocation13_spill] sm:$0xff]  ;;  %v8515_v60 = vld [vmem:[#allocation14_spill] sm:$0xff] }
 0x194   : > { %2402 = vmatprep.subr.bf16.mxu0 %v6841_v61  ;;  %2484 = vmatprep.subr.bf16.mxu1 %v6846_v62  ;;  %v8516_v61 = vld [vmem:[#allocation15_spill] sm:$0xff]  ;;  %v7297_v62 = vld [vmem:[%s8376_s1 + $0x6c4] ss:$16 sps:$4 sm:$0xff]  }
 0x197   : > { %2403 = vmatpush1.bf16.msra.mxu0 %v6853_v63  ;;  %2485 = vmatpush1.bf16.msra.mxu1 %v6858_v0  ;;  %v7302_v63 = vld [vmem:[%s8376_s1 + $0x6cc] ss:$16 sps:$4 sm:$0xff]   ;;  %v7307_v0 = vld [vmem:[%s5888_s30 + $0x14] ss:$12 sps:$4 sm:$0x1e]  }
 0x198   : > { %2404 = vmatprep.subr.bf16.mxu0 %v6865_v1  ;;  %2486 = vmatprep.subr.bf16.mxu1 %v6870_v2  ;;  %8517 = vst [vmem:[#allocation17_spill] sm:$0xff] %v7307_v0  ;;  %v7314_v1 = vrot.slane %v7307_v0, 1  ;;  %v7319_v2 = vld [vmem:[%s8376_s1 + $0x6c0] ss:$16 sps:$4 sm:$0xff]  }
 0x199   : > { %v7659_v0 = vld [vmem:[%s8376_s1 + $0x880] ss:$16 sps:$4 sm:$0xff]  }
 0x19a   : > { %8521 = vst [vmem:[#allocation3_spill] sm:$0xff] %v7659_v0 }
 0x19b   : > { %2405 = vmatpush1.bf16.msra.mxu0 %v6877_v3  ;;  %2487 = vmatpush1.bf16.msra.mxu1 %v6882_v4  ;;  %v7324_v3 = vld [vmem:[%s8376_s1 + $0x6c8] ss:$16 sps:$4 sm:$0xff]   ;;  %v7329_v4 = vld [vmem:[%s8376_s1 + $0x6e4] ss:$16 sps:$4 sm:$0xff]  }
 0x19c   : > { %2406 = vmatprep.subr.bf16.mxu0 %v6889_v5  ;;  %2488 = vmatprep.subr.bf16.mxu1 %v6894_v6  ;;  %v7334_v5 = vld [vmem:[%s8376_s1 + $0x6ec] ss:$16 sps:$4 sm:$0xff]   ;;  %v7345_v6 = vld [vmem:[%s8376_s1 + $0x6e0] ss:$16 sps:$4 sm:$0xff]  }
 0x19f   : > { %2407 = vmatpush1.bf16.msra.mxu0 %v6901_v7  ;;  %2489 = vmatpush1.bf16.msra.mxu1 %v6906_v8  ;;  %v7350_v7 = vld [vmem:[%s8376_s1 + $0x6e8] ss:$16 sps:$4 sm:$0xff]   ;;  %v7357_v8 = vld [vmem:[%s8376_s1 + $0x704] ss:$16 sps:$4 sm:$0xff]  }
 0x1a0   : > { %2408 = vmatprep.subr.bf16.mxu0 %v6913_v9  ;;  %2490 = vmatprep.subr.bf16.mxu1 %v6918_v10  ;;  %v7362_v9 = vld [vmem:[%s8376_s1 + $0x70c] ss:$16 sps:$4 sm:$0xff]   ;;  %v7371_v10 = vld [vmem:[%s8376_s1 + $0x700] ss:$16 sps:$4 sm:$0xff]  }
 0x1a3   : > { %2409 = vmatpush1.bf16.msra.mxu0 %v6925_v11  ;;  %2491 = vmatpush1.bf16.msra.mxu1 %v6930_v13  ;;  %v7376_v11 = vld [vmem:[%s8376_s1 + $0x708] ss:$16 sps:$4 sm:$0xff]   ;;  %v7383_v13 = vld [vmem:[%s8376_s1 + $0x724] ss:$16 sps:$4 sm:$0xff]  }
 0x1a4   : > { %2410 = vmatprep.subr.bf16.mxu0 %v6937_v14  ;;  %2492 = vmatprep.subr.bf16.mxu1 %v6942_v15  ;;  %v7388_v14 = vld [vmem:[%s8376_s1 + $0x72c] ss:$16 sps:$4 sm:$0xff]   ;;  %v7395_v15 = vld [vmem:[%s8376_s1 + $0x720] ss:$16 sps:$4 sm:$0xff]  }
 0x1a7   : > { %2411 = vmatpush1.bf16.msra.mxu0 %v6949_v16  ;;  %2493 = vmatpush1.bf16.msra.mxu1 %v6954_v24  ;;  %v7400_v16 = vld [vmem:[%s8376_s1 + $0x728] ss:$16 sps:$4 sm:$0xff]   ;;  %v7407_v24 = vld [vmem:[%s8376_s1 + $0x744] ss:$16 sps:$4 sm:$0xff]  }
 0x1a8   : > { %2412 = vmatprep.subr.bf16.mxu0 %v6961_v25  ;;  %2494 = vmatprep.subr.bf16.mxu1 %v6966_v46  ;;  %v7412_v25 = vld [vmem:[%s8376_s1 + $0x74c] ss:$16 sps:$4 sm:$0xff]   ;;  %v7419_v46 = vld [vmem:[%s8376_s1 + $0x740] ss:$16 sps:$4 sm:$0xff]  }
 0x1ab   : > { %2413 = vmatpush1.bf16.msra.mxu0 %v6973_v20  ;;  %2495 = vmatpush1.bf16.msra.mxu1 %v6978_v22  ;;  %v7424_v20 = vld [vmem:[%s8376_s1 + $0x748] ss:$16 sps:$4 sm:$0xff]   ;;  %v7431_v22 = vld [vmem:[%s8376_s1 + $0x764] ss:$16 sps:$4 sm:$0xff]  }
 0x1ac   : > { %2414 = vmatprep.subr.bf16.mxu0 %v6985_v12  ;;  %2496 = vmatprep.subr.bf16.mxu1 %v6990_v23  ;;  %v7436_v12 = vld [vmem:[%s8376_s1 + $0x76c] ss:$16 sps:$4 sm:$0xff]   ;;  %v7443_v23 = vld [vmem:[%s8376_s1 + $0x760] ss:$16 sps:$4 sm:$0xff]  }
 0x1af   : > { %2415 = vmatpush1.bf16.msra.mxu0 %v6997_v17  ;;  %2497 = vmatpush1.bf16.msra.mxu1 %v7002_v48  ;;  %v7448_v17 = vld [vmem:[%s8376_s1 + $0x768] ss:$16 sps:$4 sm:$0xff]   ;;  %v7455_v48 = vld [vmem:[%s8376_s1 + $0x784] ss:$16 sps:$4 sm:$0xff]  }
 0x1b0   : > { %2416 = vmatprep.subr.bf16.mxu0 %v7009_v26  ;;  %2498 = vmatprep.subr.bf16.mxu1 %v7014_v59  ;;  %v7460_v26 = vld [vmem:[%s8376_s1 + $0x78c] ss:$16 sps:$4 sm:$0xff]   ;;  %v7467_v59 = vld [vmem:[%s8376_s1 + $0x780] ss:$16 sps:$4 sm:$0xff]  }
 0x1b3   : > { %2417 = vmatpush1.bf16.msra.mxu0 %v7021_v27  ;;  %2499 = vmatpush1.bf16.msra.mxu1 %v7026_v28  ;;  %v7472_v27 = vld [vmem:[%s8376_s1 + $0x788] ss:$16 sps:$4 sm:$0xff]   ;;  %v7479_v28 = vld [vmem:[%s8376_s1 + $0x7a4] ss:$16 sps:$4 sm:$0xff]  }
 0x1b4   : > { %2418 = vmatprep.subr.bf16.mxu0 %v7033_v29  ;;  %2500 = vmatprep.subr.bf16.mxu1 %v7038_v30  ;;  %v7484_v29 = vld [vmem:[%s8376_s1 + $0x7ac] ss:$16 sps:$4 sm:$0xff]   ;;  %v7491_v30 = vld [vmem:[%s8376_s1 + $0x7a0] ss:$16 sps:$4 sm:$0xff]  }
 0x1b7   : > { %2419 = vmatpush1.bf16.msra.mxu0 %v7045_v31  ;;  %2501 = vmatpush1.bf16.msra.mxu1 %v7050_v32  ;;  %v7496_v31 = vld [vmem:[%s8376_s1 + $0x7a8] ss:$16 sps:$4 sm:$0xff]   ;;  %v7503_v32 = vld [vmem:[%s8376_s1 + $0x7c4] ss:$16 sps:$4 sm:$0xff]  }
 0x1b8   : > { %2420 = vmatprep.subr.bf16.mxu0 %v7057_v33  ;;  %2502 = vmatprep.subr.bf16.mxu1 %v7062_v34  ;;  %v7508_v33 = vld [vmem:[%s8376_s1 + $0x7cc] ss:$16 sps:$4 sm:$0xff]   ;;  %v7515_v34 = vld [vmem:[%s8376_s1 + $0x7c0] ss:$16 sps:$4 sm:$0xff]  }
 0x1bb   : > { %2421 = vmatpush1.bf16.msra.mxu0 %v7069_v35  ;;  %2503 = vmatpush1.bf16.msra.mxu1 %v7074_v36  ;;  %v7520_v35 = vld [vmem:[%s8376_s1 + $0x7c8] ss:$16 sps:$4 sm:$0xff]   ;;  %v7527_v36 = vld [vmem:[%s8376_s1 + $0x7e4] ss:$16 sps:$4 sm:$0xff]  }
 0x1bc   : > { %2422 = vmatprep.subr.bf16.mxu0 %v7081_v37  ;;  %2504 = vmatprep.subr.bf16.mxu1 %v7086_v38  ;;  %v7532_v37 = vld [vmem:[%s8376_s1 + $0x7ec] ss:$16 sps:$4 sm:$0xff]   ;;  %v7539_v38 = vld [vmem:[%s8376_s1 + $0x7e0] ss:$16 sps:$4 sm:$0xff]  }
 0x1bf   : > { %2423 = vmatpush1.bf16.msra.mxu0 %v7093_v39  ;;  %2505 = vmatpush1.bf16.msra.mxu1 %v8504_v18  ;;  %v7544_v39 = vld [vmem:[%s8376_s1 + $0x7e8] ss:$16 sps:$4 sm:$0xff]   ;;  %v7587_v18 = vld [vmem:[%s8376_s1 + $0x820] ss:$16 sps:$4 sm:$0xff]  }
 0x1c0   : > { %2424 = vmatprep.subr.bf16.mxu0 %v8505_v44  ;;  %2506 = vmatprep.subr.bf16.mxu1 %v8506_v45  ;;  %v7592_v44 = vld [vmem:[%s8376_s1 + $0x828] ss:$16 sps:$4 sm:$0xff]   ;;  %v7599_v45 = vld [vmem:[%s8376_s1 + $0x844] ss:$16 sps:$4 sm:$0xff]  }
 0x1c3   : > { %2425 = vmatpush1.bf16.msra.mxu0 %v8508_v49  ;;  %2507 = vmatpush1.bf16.msra.mxu1 %v8509_v50  ;;  %v7604_v49 = vld [vmem:[%s8376_s1 + $0x84c] ss:$16 sps:$4 sm:$0xff]   ;;  %v7611_v50 = vld [vmem:[%s8376_s1 + $0x840] ss:$16 sps:$4 sm:$0xff]  }
 0x1c4   : > { %2426 = vmatprep.subr.bf16.mxu0 %v8510_v51  ;;  %2508 = vmatprep.subr.bf16.mxu1 %v8511_v53  ;;  %v7616_v51 = vld [vmem:[%s8376_s1 + $0x848] ss:$16 sps:$4 sm:$0xff]   ;;  %v7623_v53 = vld [vmem:[%s8376_s1 + $0x864] ss:$16 sps:$4 sm:$0xff]  }
 0x1c7   : > { %2427 = vmatpush1.bf16.msra.mxu0 %v8512_v55  ;;  %2509 = vmatpush1.bf16.msra.mxu1 %v8513_v56  ;;  %v7628_v55 = vld [vmem:[%s8376_s1 + $0x86c] ss:$16 sps:$4 sm:$0xff]   ;;  %v7635_v56 = vld [vmem:[%s8376_s1 + $0x860] ss:$16 sps:$4 sm:$0xff]  }
 0x1c8   : > { %2437 = vmatprep.subr.bf16.mxu0 %v8514_v58  ;;  %2519 = vmatprep.subr.bf16.mxu1 %v8515_v60  ;;  %v7640_v58 = vld [vmem:[%s8376_s1 + $0x868] ss:$16 sps:$4 sm:$0xff]   ;;  %v7647_v60 = vld [vmem:[%s8376_s1 + $0x884] ss:$16 sps:$4 sm:$0xff]  }
 0x1c9   : > { %8518 = vst [vmem:[#allocation18_spill] sm:$0xff] %v7640_v58  ;;  %8519 = vst [vmem:[#allocation19_spill] sm:$0xff] %v7647_v60 }
 0x1ca   : > { %2429 = vmatmul.mubr.bf16.vlgmr.msra.gmra.mrb[4].mxu0 %v7282_v54  ;;  %2511 = vmatmul.mubr.bf16.vlgmr.msra.gmra.mrb[4].mxu1 %v7282_v54 }
 0x1cb   : > { %2438 = vmatpush1.bf16.msra.mxu0 %v7165_v57  ;;  %2520 = vmatpush1.bf16.msra.mxu1 %v8516_v61  ;;  %v7580_v57 = vld [vmem:[%s8376_s1 + $0x82c] ss:$16 sps:$4 sm:$0xff]  }
 0x1cc   : > { %2439 = vmatprep.subr.bf16.mxu0 %v7177_v41  ;;  %2521 = vmatprep.subr.bf16.mxu1 %v7182_v42  ;;  %v7556_v41 = vld [vmem:[%s8376_s1 + $0x80c] ss:$16 sps:$4 sm:$0xff]   ;;  %v7563_v42 = vld [vmem:[%s8376_s1 + $0x800] ss:$16 sps:$4 sm:$0xff]  }
 0x1cd   : > { %2469 = vmatprep.mubr.bf16.mxu0 %v8469_v21  ;;  %2551 = vmatprep.mubr.bf16.mxu1 %v8469_v21  ;;  %v7652_v61 = vld [vmem:[%s8376_s1 + $0x88c] ss:$16 sps:$4 sm:$0xff]  }
 0x1ce   : > { %8520 = vst [vmem:[#allocation20_spill] sm:$0xff] %v7652_v61 }
 0x1cf   : > { %2440 = vmatpush1.bf16.msra.mxu0 %v7191_v52  ;;  %2522 = vmatpush1.bf16.msra.mxu1 %v7196_v43  ;;  %v7568_v43 = vld [vmem:[%s8376_s1 + $0x808] ss:$16 sps:$4 sm:$0xff]   ;;  %v7575_v52 = vld [vmem:[%s8376_s1 + $0x824] ss:$16 sps:$4 sm:$0xff]  }
 0x1d0   : > { %2997 = vmatprep.subr.bf16.mxu0 %v7297_v62  ;;  %3079 = vmatprep.subr.bf16.mxu1 %v7302_v63 }
 0x1d6   : > { %4623 = vmatmul.mubr.msk.bf16.vlgmr.msra.gmra.mrb[4].mxu0 %vm712_vm0, %v7314_v1  ;;  %4624 = vmatmul.mubr.msk.bf16.vlgmr.msra.gmra.mrb[4].mxu1 %vm712_vm0, %v7314_v1 }
 0x1d7   : > { %2998 = vmatpush1.bf16.msra.mxu0 %v7319_v2  ;;  %3080 = vmatpush1.bf16.msra.mxu1 %v7324_v3 }
 0x1d8   : > { %2999 = vmatprep.subr.bf16.mxu0 %v7329_v4  ;;  %3081 = vmatprep.subr.bf16.mxu1 %v7334_v5 }
 0x1d9   : > { %3029 = vmatprep.mubr.bf16.mxu0 %v7210_v40  ;;  %3111 = vmatprep.mubr.bf16.mxu1 %v7210_v40  ;;  %v7551_v40 = vld [vmem:[%s8376_s1 + $0x804] ss:$16 sps:$4 sm:$0xff]  }
 0x1db   : > { %3000 = vmatpush1.bf16.msra.mxu0 %v7345_v6  ;;  %3082 = vmatpush1.bf16.msra.mxu1 %v7350_v7 }
 0x1dc   : > { %3001 = vmatprep.subr.bf16.mxu0 %v7357_v8  ;;  %3083 = vmatprep.subr.bf16.mxu1 %v7362_v9 }
 0x1df   : > { %3002 = vmatpush1.bf16.msra.mxu0 %v7371_v10  ;;  %3084 = vmatpush1.bf16.msra.mxu1 %v7376_v11 }
 0x1e0   : > { %3003 = vmatprep.subr.bf16.mxu0 %v7383_v13  ;;  %3085 = vmatprep.subr.bf16.mxu1 %v7388_v14 }
 0x1e3   : > { %3004 = vmatpush1.bf16.msra.mxu0 %v7395_v15  ;;  %3086 = vmatpush1.bf16.msra.mxu1 %v7400_v16 }
 0x1e4   : > { %3005 = vmatprep.subr.bf16.mxu0 %v7407_v24  ;;  %3087 = vmatprep.subr.bf16.mxu1 %v7412_v25 }
 0x1e7   : > { %3006 = vmatpush1.bf16.msra.mxu0 %v7419_v46  ;;  %3088 = vmatpush1.bf16.msra.mxu1 %v7424_v20 }
 0x1e8   : > { %3007 = vmatprep.subr.bf16.mxu0 %v7431_v22  ;;  %3089 = vmatprep.subr.bf16.mxu1 %v7436_v12 }
 0x1eb   : > { %3008 = vmatpush1.bf16.msra.mxu0 %v7443_v23  ;;  %3090 = vmatpush1.bf16.msra.mxu1 %v7448_v17 }
 0x1ec   : > { %3009 = vmatprep.subr.bf16.mxu0 %v7455_v48  ;;  %3091 = vmatprep.subr.bf16.mxu1 %v7460_v26 }
 0x1ef   : > { %3010 = vmatpush1.bf16.msra.mxu0 %v7467_v59  ;;  %3092 = vmatpush1.bf16.msra.mxu1 %v7472_v27 }
 0x1f0   : > { %3011 = vmatprep.subr.bf16.mxu0 %v7479_v28  ;;  %3093 = vmatprep.subr.bf16.mxu1 %v7484_v29 }
 0x1f3   : > { %3012 = vmatpush1.bf16.msra.mxu0 %v7491_v30  ;;  %3094 = vmatpush1.bf16.msra.mxu1 %v7496_v31 }
 0x1f4   : > { %3013 = vmatprep.subr.bf16.mxu0 %v7503_v32  ;;  %3095 = vmatprep.subr.bf16.mxu1 %v7508_v33 }
 0x1f7   : > { %3014 = vmatpush1.bf16.msra.mxu0 %v7515_v34  ;;  %3096 = vmatpush1.bf16.msra.mxu1 %v7520_v35 }
 0x1f8   : > { %3015 = vmatprep.subr.bf16.mxu0 %v7527_v36  ;;  %3097 = vmatprep.subr.bf16.mxu1 %v7532_v37 }
 0x1fb   : > { %3016 = vmatpush1.bf16.msra.mxu0 %v7539_v38  ;;  %3098 = vmatpush1.bf16.msra.mxu1 %v7544_v39 }
 0x1fc   : > { %3017 = vmatprep.subr.bf16.mxu0 %v7551_v40  ;;  %3099 = vmatprep.subr.bf16.mxu1 %v7556_v41 }
 0x1ff   : > { %3018 = vmatpush1.bf16.msra.mxu0 %v7563_v42  ;;  %3100 = vmatpush1.bf16.msra.mxu1 %v7568_v43 }
 0x200   : > { %3019 = vmatprep.subr.bf16.mxu0 %v7575_v52  ;;  %3101 = vmatprep.subr.bf16.mxu1 %v7580_v57 }
 0x203   : > { %3020 = vmatpush1.bf16.msra.mxu0 %v7587_v18  ;;  %3102 = vmatpush1.bf16.msra.mxu1 %v7592_v44 }
 0x204   : > { %3021 = vmatprep.subr.bf16.mxu0 %v7599_v45  ;;  %3103 = vmatprep.subr.bf16.mxu1 %v7604_v49 }
 0x207   : > { %3022 = vmatpush1.bf16.msra.mxu0 %v7611_v50  ;;  %3104 = vmatpush1.bf16.msra.mxu1 %v7616_v51 }
 0x208   : > { %3023 = vmatprep.subr.bf16.mxu0 %v7623_v53  ;;  %3105 = vmatprep.subr.bf16.mxu1 %v7628_v55 }
 0x20b   : > { %3024 = vmatpush1.bf16.msra.mxu0 %v7635_v56  ;;  %3106 = vmatpush1.bf16.msra.mxu1 %v7640_v58  ;;  %v7676_v58 = vld [vmem:[%s8376_s1 + $0x8ac] ss:$16 sps:$4 sm:$0xff]  }
 0x20c   : > { %3025 = vmatprep.subr.bf16.mxu0 %v7647_v60  ;;  %3107 = vmatprep.subr.bf16.mxu1 %v7652_v61  ;;  %8524 = vst [vmem:[#allocation5_spill] sm:$0xff] %v7676_v58  ;;  %v7683_v60 = vld [vmem:[%s8376_s1 + $0x8a0] ss:$16 sps:$4 sm:$0xff]   ;;  %v7688_v61 = vld [vmem:[%s8376_s1 + $0x8a8] ss:$16 sps:$4 sm:$0xff]  }
 0x20d   : > { %8525 = vst [vmem:[#allocation6_spill] sm:$0xff] %v7683_v60  ;;  %8526 = vst [vmem:[#allocation7_spill] sm:$0xff] %v7688_v61 }
 0x20f   : > { %3026 = vmatpush1.bf16.msra.mxu0 %v7659_v0  ;;  %3108 = vmatpush1.bf16.msra.mxu1 %v7664_v47  ;;  %v7695_v0 = vld [vmem:[%s8376_s1 + $0x8c4] ss:$16 sps:$4 sm:$0xff]   ;;  %v7700_v47 = vld [vmem:[%s8376_s1 + $0x8cc] ss:$16 sps:$4 sm:$0xff]  }
 0x210   : > { %3027 = vmatprep.subr.bf16.mxu0 %v7671_v19  ;;  %3109 = vmatprep.subr.bf16.mxu1 %v7676_v58  ;;  %8527 = vst [vmem:[#allocation8_spill] sm:$0xff] %v7695_v0  ;;  %8528 = vst [vmem:[#allocation9_spill] sm:$0xff] %v7700_v47  ;;  %v7707_v19 = vld [vmem:[%s8376_s1 + $0x8c0] ss:$16 sps:$4 sm:$0xff]   ;;  %v7712_v58 = vld [vmem:[%s8376_s1 + $0x8c8] ss:$16 sps:$4 sm:$0xff]  }
 0x211   : > { %8529 = vst [vmem:[#allocation10_spill] sm:$0xff] %v7712_v58 }
 0x213   : > { %3028 = vmatpush1.bf16.msra.mxu0 %v7683_v60  ;;  %3110 = vmatpush1.bf16.msra.mxu1 %v7688_v61  ;;  %v7719_v60 = vld [vmem:[%s8376_s1 + $0x8e4] ss:$16 sps:$4 sm:$0xff]   ;;  %v7724_v61 = vld [vmem:[%s8376_s1 + $0x8ec] ss:$16 sps:$4 sm:$0xff]  }
 0x214   : > { %3038 = vmatprep.subr.bf16.mxu0 %v7695_v0  ;;  %3120 = vmatprep.subr.bf16.mxu1 %v7700_v47  ;;  %v7733_v47 = vld [vmem:[%s8376_s1 + $0x8e0] ss:$16 sps:$4 sm:$0xff]   ;;  %v7738_v0 = vld [vmem:[%s8376_s1 + $0x8e8] ss:$16 sps:$4 sm:$0xff]  }
 0x216   : > { %3030 = vmatmul.mubr.bf16.vlgmr.msra.gmra.mrb[0].mxu0 %v7282_v54  ;;  %3112 = vmatmul.mubr.bf16.vlgmr.msra.gmra.mrb[0].mxu1 %v7282_v54  ;;  %v5523_v54 = vld [vmem:[%s5888_s30 + $0x4] ss:$12 sps:$4 sm:$0x1e]  }
 0x217   : > { %3039 = vmatpush1.bf16.msra.mxu0 %v7707_v19  ;;  %3121 = vmatpush1.bf16.msra.mxu1 %v7712_v58  ;;  %v7749_v58 = vrot.slane %v5523_v54, 1  ;;  %v8120_v54 = vld [vmem:[%s8376_s1 + $0xa60] ss:$16 sps:$4 sm:$0xff]  }
 0x218   : > { %3040 = vmatprep.subr.bf16.mxu0 %v7719_v60  ;;  %3122 = vmatprep.subr.bf16.mxu1 %v7724_v61 }
 0x219   : > { %3070 = vmatprep.mubr.bf16.mxu0 %v8469_v21  ;;  %3152 = vmatprep.mubr.bf16.mxu1 %v8469_v21 }
 0x21b   : > { %3041 = vmatpush1.bf16.msra.mxu0 %v7733_v47  ;;  %3123 = vmatpush1.bf16.msra.mxu1 %v7738_v0 }
 0x21c   : > { %3190 = vmatprep.subr.bf16.mxu0 %v7297_v62  ;;  %3272 = vmatprep.subr.bf16.mxu1 %v7302_v63  ;;  %v8530_v62 = vld [vmem:[#allocation18_spill] sm:$0xff]  ;;  %v8531_v63 = vld [vmem:[#allocation19_spill] sm:$0xff] }
 0x222   : > { %4769 = vmatmul.mubr.msk.bf16.vlgmr.msra.gmra.mrb[0].mxu0 %vm712_vm0, %v7314_v1  ;;  %4770 = vmatmul.mubr.msk.bf16.vlgmr.msra.gmra.mrb[0].mxu1 %vm712_vm0, %v7314_v1  ;;  %v8532_v1 = vld [vmem:[#allocation20_spill] sm:$0xff] }
 0x223   : > { %3191 = vmatpush1.bf16.msra.mxu0 %v7319_v2  ;;  %3273 = vmatpush1.bf16.msra.mxu1 %v7324_v3  ;;  %v5525_v2 = vld [vmem:[%s5888_s30] ss:$12 sps:$4 sm:$0x1e]  }
 0x224   : > { %3192 = vmatprep.subr.bf16.mxu0 %v7329_v4  ;;  %3274 = vmatprep.subr.bf16.mxu1 %v7334_v5  ;;  %v8533_v3 = vld [vmem:[#allocation3_spill] sm:$0xff]  ;;  %v8534_v4 = vld [vmem:[#allocation21_spill] sm:$0xff]  ;;  %v8535_v5 = vld [vmem:[#allocation4_spill] sm:$0xff] }
 0x225   : > { %3222 = vmatprep.mubr.bf16.mxu0 %v7749_v58  ;;  %3304 = vmatprep.mubr.bf16.mxu1 %v7749_v58 }
 0x227   : > { %3193 = vmatpush1.bf16.msra.mxu0 %v7345_v6  ;;  %3275 = vmatpush1.bf16.msra.mxu1 %v7350_v7  ;;  %v8536_v6 = vld [vmem:[#allocation5_spill] sm:$0xff]  ;;  %v7818_v7 = vrot.slane %v5525_v2, 1  ;;  %v8144_v2 = vld [vmem:[%s8376_s1 + $0xa80] ss:$16 sps:$4 sm:$0xff]  }
 0x228   : > { %3194 = vmatprep.subr.bf16.mxu0 %v7357_v8  ;;  %3276 = vmatprep.subr.bf16.mxu1 %v7362_v9  ;;  %v8537_v8 = vld [vmem:[#allocation6_spill] sm:$0xff]  ;;  %v8538_v9 = vld [vmem:[#allocation7_spill] sm:$0xff] }
 0x22b   : > { %3195 = vmatpush1.bf16.msra.mxu0 %v7371_v10  ;;  %3277 = vmatpush1.bf16.msra.mxu1 %v7376_v11  ;;  %v8539_v10 = vld [vmem:[#allocation8_spill] sm:$0xff]  ;;  %v8540_v11 = vld [vmem:[#allocation9_spill] sm:$0xff] }
 0x22c   : > { %3196 = vmatprep.subr.bf16.mxu0 %v7383_v13  ;;  %3278 = vmatprep.subr.bf16.mxu1 %v7388_v14  ;;  %v8541_v13 = vld [vmem:[#allocation10_spill] sm:$0xff] }
 0x22d   : > { %v7833_v14 = vld [vmem:[%s8376_s1 + $0x904] ss:$16 sps:$4 sm:$0xff]  }
 0x22f   : > { %3197 = vmatpush1.bf16.msra.mxu0 %v7395_v15  ;;  %3279 = vmatpush1.bf16.msra.mxu1 %v7400_v16  ;;  %v7838_v15 = vld [vmem:[%s8376_s1 + $0x90c] ss:$16 sps:$4 sm:$0xff]  }
 0x230   : > { %3198 = vmatprep.subr.bf16.mxu0 %v7407_v24  ;;  %3280 = vmatprep.subr.bf16.mxu1 %v7412_v25  ;;  %v7852_v24 = vld [vmem:[%s8376_s1 + $0x900] ss:$16 sps:$4 sm:$0xff]   ;;  %v7857_v25 = vld [vmem:[%s8376_s1 + $0x908] ss:$16 sps:$4 sm:$0xff]  }
 0x233   : > { %3199 = vmatpush1.bf16.msra.mxu0 %v7419_v46  ;;  %3281 = vmatpush1.bf16.msra.mxu1 %v7424_v20  ;;  %v7878_v46 = vld [vmem:[%s8376_s1 + $0x920] ss:$16 sps:$4 sm:$0xff]   ;;  %v7883_v20 = vld [vmem:[%s8376_s1 + $0x928] ss:$16 sps:$4 sm:$0xff]  }
 0x234   : > { %3200 = vmatprep.subr.bf16.mxu0 %v7431_v22  ;;  %3282 = vmatprep.subr.bf16.mxu1 %v7436_v12  ;;  %v7890_v22 = vld [vmem:[%s8376_s1 + $0x944] ss:$16 sps:$4 sm:$0xff]   ;;  %v7895_v12 = vld [vmem:[%s8376_s1 + $0x94c] ss:$16 sps:$4 sm:$0xff]  }
 0x237   : > { %3201 = vmatpush1.bf16.msra.mxu0 %v7443_v23  ;;  %3283 = vmatpush1.bf16.msra.mxu1 %v7448_v17  ;;  %v7904_v23 = vld [vmem:[%s8376_s1 + $0x940] ss:$16 sps:$4 sm:$0xff]   ;;  %v7909_v17 = vld [vmem:[%s8376_s1 + $0x948] ss:$16 sps:$4 sm:$0xff]  }
 0x238   : > { %3202 = vmatprep.subr.bf16.mxu0 %v7455_v48  ;;  %3284 = vmatprep.subr.bf16.mxu1 %v7460_v26  ;;  %v7916_v48 = vld [vmem:[%s8376_s1 + $0x964] ss:$16 sps:$4 sm:$0xff]   ;;  %v7921_v26 = vld [vmem:[%s8376_s1 + $0x96c] ss:$16 sps:$4 sm:$0xff]  }
 0x23b   : > { %3203 = vmatpush1.bf16.msra.mxu0 %v7467_v59  ;;  %3285 = vmatpush1.bf16.msra.mxu1 %v7472_v27  ;;  %v7928_v59 = vld [vmem:[%s8376_s1 + $0x960] ss:$16 sps:$4 sm:$0xff]   ;;  %v7933_v27 = vld [vmem:[%s8376_s1 + $0x968] ss:$16 sps:$4 sm:$0xff]  }
 0x23c   : > { %3204 = vmatprep.subr.bf16.mxu0 %v7479_v28  ;;  %3286 = vmatprep.subr.bf16.mxu1 %v7484_v29  ;;  %v7940_v28 = vld [vmem:[%s8376_s1 + $0x984] ss:$16 sps:$4 sm:$0xff]   ;;  %v7945_v29 = vld [vmem:[%s8376_s1 + $0x98c] ss:$16 sps:$4 sm:$0xff]  }
 0x23f   : > { %3205 = vmatpush1.bf16.msra.mxu0 %v7491_v30  ;;  %3287 = vmatpush1.bf16.msra.mxu1 %v7496_v31  ;;  %v7952_v30 = vld [vmem:[%s8376_s1 + $0x980] ss:$16 sps:$4 sm:$0xff]   ;;  %v7957_v31 = vld [vmem:[%s8376_s1 + $0x988] ss:$16 sps:$4 sm:$0xff]  }
 0x240   : > { %3206 = vmatprep.subr.bf16.mxu0 %v7503_v32  ;;  %3288 = vmatprep.subr.bf16.mxu1 %v7508_v33  ;;  %v7964_v32 = vld [vmem:[%s8376_s1 + $0x9a4] ss:$16 sps:$4 sm:$0xff]   ;;  %v7969_v33 = vld [vmem:[%s8376_s1 + $0x9ac] ss:$16 sps:$4 sm:$0xff]  }
 0x243   : > { %3207 = vmatpush1.bf16.msra.mxu0 %v7515_v34  ;;  %3289 = vmatpush1.bf16.msra.mxu1 %v7520_v35  ;;  %v7976_v34 = vld [vmem:[%s8376_s1 + $0x9a0] ss:$16 sps:$4 sm:$0xff]   ;;  %v7981_v35 = vld [vmem:[%s8376_s1 + $0x9a8] ss:$16 sps:$4 sm:$0xff]  }
 0x244   : > { %3208 = vmatprep.subr.bf16.mxu0 %v7527_v36  ;;  %3290 = vmatprep.subr.bf16.mxu1 %v7532_v37  ;;  %v7988_v36 = vld [vmem:[%s8376_s1 + $0x9c4] ss:$16 sps:$4 sm:$0xff]   ;;  %v7993_v37 = vld [vmem:[%s8376_s1 + $0x9cc] ss:$16 sps:$4 sm:$0xff]  }
 0x247   : > { %3209 = vmatpush1.bf16.msra.mxu0 %v7539_v38  ;;  %3291 = vmatpush1.bf16.msra.mxu1 %v7544_v39  ;;  %v8000_v38 = vld [vmem:[%s8376_s1 + $0x9c0] ss:$16 sps:$4 sm:$0xff]   ;;  %v8005_v39 = vld [vmem:[%s8376_s1 + $0x9c8] ss:$16 sps:$4 sm:$0xff]  }
 0x248   : > { %3210 = vmatprep.subr.bf16.mxu0 %v7551_v40  ;;  %3292 = vmatprep.subr.bf16.mxu1 %v7556_v41  ;;  %v8012_v40 = vld [vmem:[%s8376_s1 + $0x9e4] ss:$16 sps:$4 sm:$0xff]   ;;  %v8017_v41 = vld [vmem:[%s8376_s1 + $0x9ec] ss:$16 sps:$4 sm:$0xff]  }
 0x24b   : > { %3211 = vmatpush1.bf16.msra.mxu0 %v7563_v42  ;;  %3293 = vmatpush1.bf16.msra.mxu1 %v7568_v43  ;;  %v8024_v42 = vld [vmem:[%s8376_s1 + $0x9e0] ss:$16 sps:$4 sm:$0xff]   ;;  %v8029_v43 = vld [vmem:[%s8376_s1 + $0x9e8] ss:$16 sps:$4 sm:$0xff]  }
 0x24c   : > { %3212 = vmatprep.subr.bf16.mxu0 %v7575_v52  ;;  %3294 = vmatprep.subr.bf16.mxu1 %v7580_v57  ;;  %v8036_v52 = vld [vmem:[%s8376_s1 + $0xa04] ss:$16 sps:$4 sm:$0xff]   ;;  %v8041_v57 = vld [vmem:[%s8376_s1 + $0xa0c] ss:$16 sps:$4 sm:$0xff]  }
 0x24f   : > { %3213 = vmatpush1.bf16.msra.mxu0 %v7587_v18  ;;  %3295 = vmatpush1.bf16.msra.mxu1 %v7592_v44  ;;  %v8048_v18 = vld [vmem:[%s8376_s1 + $0xa00] ss:$16 sps:$4 sm:$0xff]   ;;  %v8053_v44 = vld [vmem:[%s8376_s1 + $0xa08] ss:$16 sps:$4 sm:$0xff]  }
 0x250   : > { %3214 = vmatprep.subr.bf16.mxu0 %v7599_v45  ;;  %3296 = vmatprep.subr.bf16.mxu1 %v7604_v49  ;;  %v8060_v45 = vld [vmem:[%s8376_s1 + $0xa24] ss:$16 sps:$4 sm:$0xff]   ;;  %v8065_v49 = vld [vmem:[%s8376_s1 + $0xa2c] ss:$16 sps:$4 sm:$0xff]  }
 0x253   : > { %3215 = vmatpush1.bf16.msra.mxu0 %v7611_v50  ;;  %3297 = vmatpush1.bf16.msra.mxu1 %v7616_v51  ;;  %v8072_v50 = vld [vmem:[%s8376_s1 + $0xa20] ss:$16 sps:$4 sm:$0xff]   ;;  %v8077_v51 = vld [vmem:[%s8376_s1 + $0xa28] ss:$16 sps:$4 sm:$0xff]  }
 0x254   : > { %3216 = vmatprep.subr.bf16.mxu0 %v7623_v53  ;;  %3298 = vmatprep.subr.bf16.mxu1 %v7628_v55  ;;  %v8084_v53 = vld [vmem:[%s8376_s1 + $0xa44] ss:$16 sps:$4 sm:$0xff]   ;;  %v8089_v55 = vld [vmem:[%s8376_s1 + $0xa4c] ss:$16 sps:$4 sm:$0xff]  }
 0x257   : > { %3217 = vmatpush1.bf16.msra.mxu0 %v7635_v56  ;;  %3299 = vmatpush1.bf16.msra.mxu1 %v8530_v62  ;;  %v8096_v56 = vld [vmem:[%s8376_s1 + $0xa40] ss:$16 sps:$4 sm:$0xff]   ;;  %v8125_v62 = vld [vmem:[%s8376_s1 + $0xa68] ss:$16 sps:$4 sm:$0xff]  }
 0x258   : > { %3218 = vmatprep.subr.bf16.mxu0 %v8531_v63  ;;  %3300 = vmatprep.subr.bf16.mxu1 %v8532_v1  ;;  %v8132_v63 = vld [vmem:[%s8376_s1 + $0xa84] ss:$16 sps:$4 sm:$0xff]   ;;  %v8137_v1 = vld [vmem:[%s8376_s1 + $0xa8c] ss:$16 sps:$4 sm:$0xff]  }
 0x25b   : > { %3219 = vmatpush1.bf16.msra.mxu0 %v8533_v3  ;;  %3301 = vmatpush1.bf16.msra.mxu1 %v8534_v4  ;;  %v8149_v3 = vld [vmem:[%s8376_s1 + $0xa88] ss:$16 sps:$4 sm:$0xff]   ;;  %v8156_v4 = vld [vmem:[%s8376_s1 + $0xaa4] ss:$16 sps:$4 sm:$0xff]  }
 0x25c   : > { %3220 = vmatprep.subr.bf16.mxu0 %v8535_v5  ;;  %3302 = vmatprep.subr.bf16.mxu1 %v8536_v6  ;;  %v8161_v5 = vld [vmem:[%s8376_s1 + $0xaac] ss:$16 sps:$4 sm:$0xff]   ;;  %v8168_v6 = vld [vmem:[%s8376_s1 + $0xaa0] ss:$16 sps:$4 sm:$0xff]  }
 0x25d   : > { %8542 = vst [vmem:[#allocation11_spill] sm:$0xff] %v8161_v5  ;;  %8543 = vst [vmem:[#allocation12_spill] sm:$0xff] %v8168_v6 }
 0x25f   : > { %3221 = vmatpush1.bf16.msra.mxu0 %v8537_v8  ;;  %3303 = vmatpush1.bf16.msra.mxu1 %v8538_v9  ;;  %v8173_v8 = vld [vmem:[%s8376_s1 + $0xaa8] ss:$16 sps:$4 sm:$0xff]   ;;  %v8180_v9 = vld [vmem:[%s8376_s1 + $0xac4] ss:$16 sps:$4 sm:$0xff]  }
 0x260   : > { %3231 = vmatprep.subr.bf16.mxu0 %v8539_v10  ;;  %3313 = vmatprep.subr.bf16.mxu1 %v8540_v11  ;;  %8544 = vst [vmem:[#allocation13_spill] sm:$0xff] %v8173_v8  ;;  %8545 = vst [vmem:[#allocation14_spill] sm:$0xff] %v8180_v9  ;;  %v8185_v10 = vld [vmem:[%s8376_s1 + $0xacc] ss:$16 sps:$4 sm:$0xff]   ;;  %v8192_v11 = vld [vmem:[%s8376_s1 + $0xac0] ss:$16 sps:$4 sm:$0xff]  }
 0x261   : > { %8546 = vst [vmem:[#allocation15_spill] sm:$0xff] %v8185_v10  ;;  %8547 = vst [vmem:[#allocation18_spill] sm:$0xff] %v8192_v11 }
 0x262   : > { %3223 = vmatmul.mubr.bf16.vlgmr.msra.gmra.mrb[4].mxu0 %v7818_v7  ;;  %3305 = vmatmul.mubr.bf16.vlgmr.msra.gmra.mrb[4].mxu1 %v7818_v7 }
 0x263   : > { %3232 = vmatpush1.bf16.msra.mxu0 %v7707_v19  ;;  %3314 = vmatpush1.bf16.msra.mxu1 %v8541_v13  ;;  %v5532_v19 = vld [vmem:[%s5888_s30 + $0x8] ss:$12 sps:$4 sm:$0x1e]  }
 0x264   : > { %3233 = vmatprep.subr.bf16.mxu0 %v7719_v60  ;;  %3315 = vmatprep.subr.bf16.mxu1 %v7724_v61  ;;  %v7847_v16 = vrot.slane %v5532_v19, 1  ;;  %v8108_v60 = vld [vmem:[%s8376_s1 + $0xa64] ss:$16 sps:$4 sm:$0xff]   ;;  %v8113_v61 = vld [vmem:[%s8376_s1 + $0xa6c] ss:$16 sps:$4 sm:$0xff]  }
 0x265   : > { %3263 = vmatprep.mubr.bf16.mxu0 %v8469_v21  ;;  %3345 = vmatprep.mubr.bf16.mxu1 %v8469_v21  ;;  %v8197_v13 = vld [vmem:[%s8376_s1 + $0xac8] ss:$16 sps:$4 sm:$0xff]   ;;  %v8204_v19 = vld [vmem:[%s8376_s1 + $0xae4] ss:$16 sps:$4 sm:$0xff]  }
 0x266   : > { %8548 = vst [vmem:[#allocation19_spill] sm:$0xff] %v8197_v13  ;;  %8549 = vst [vmem:[#allocation20_spill] sm:$0xff] %v8204_v19 }
 0x267   : > { %3234 = vmatpush1.bf16.msra.mxu0 %v7733_v47  ;;  %3316 = vmatpush1.bf16.msra.mxu1 %v7738_v0  ;;  %v7862_v47 = vld [vmem:[%s8376_s1 + $0x924] ss:$16 sps:$4 sm:$0xff]   ;;  %v7867_v0 = vld [vmem:[%s8376_s1 + $0x92c] ss:$16 sps:$4 sm:$0xff]  }
 0x268   : > { %3791 = vmatprep.subr.bf16.mxu0 %v7833_v14  ;;  %3873 = vmatprep.subr.bf16.mxu1 %v7838_v15 }
 0x26e   : > { %4774 = vmatmul.mubr.msk.bf16.vlgmr.msra.gmra.mrb[4].mxu0 %vm712_vm0, %v7847_v16  ;;  %4775 = vmatmul.mubr.msk.bf16.vlgmr.msra.gmra.mrb[4].mxu1 %vm712_vm0, %v7847_v16 }
 0x26f   : > { %3792 = vmatpush1.bf16.msra.mxu0 %v7852_v24  ;;  %3874 = vmatpush1.bf16.msra.mxu1 %v7857_v25 }
 0x270   : > { %3793 = vmatprep.subr.bf16.mxu0 %v7862_v47  ;;  %3875 = vmatprep.subr.bf16.mxu1 %v7867_v0 }
 0x271   : > { %3823 = vmatprep.mubr.bf16.mxu0 %v7749_v58  ;;  %3905 = vmatprep.mubr.bf16.mxu1 %v7749_v58  ;;  %v8101_v58 = vld [vmem:[%s8376_s1 + $0xa48] ss:$16 sps:$4 sm:$0xff]  }
 0x273   : > { %3794 = vmatpush1.bf16.msra.mxu0 %v7878_v46  ;;  %3876 = vmatpush1.bf16.msra.mxu1 %v7883_v20 }
 0x274   : > { %3795 = vmatprep.subr.bf16.mxu0 %v7890_v22  ;;  %3877 = vmatprep.subr.bf16.mxu1 %v7895_v12 }
 0x277   : > { %3796 = vmatpush1.bf16.msra.mxu0 %v7904_v23  ;;  %3878 = vmatpush1.bf16.msra.mxu1 %v7909_v17 }
 0x278   : > { %3797 = vmatprep.subr.bf16.mxu0 %v7916_v48  ;;  %3879 = vmatprep.subr.bf16.mxu1 %v7921_v26 }
 0x27b   : > { %3798 = vmatpush1.bf16.msra.mxu0 %v7928_v59  ;;  %3880 = vmatpush1.bf16.msra.mxu1 %v7933_v27 }
 0x27c   : > { %3799 = vmatprep.subr.bf16.mxu0 %v7940_v28  ;;  %3881 = vmatprep.subr.bf16.mxu1 %v7945_v29 }
 0x27f   : > { %3800 = vmatpush1.bf16.msra.mxu0 %v7952_v30  ;;  %3882 = vmatpush1.bf16.msra.mxu1 %v7957_v31 }
 0x280   : > { %3801 = vmatprep.subr.bf16.mxu0 %v7964_v32  ;;  %3883 = vmatprep.subr.bf16.mxu1 %v7969_v33 }
 0x283   : > { %3802 = vmatpush1.bf16.msra.mxu0 %v7976_v34  ;;  %3884 = vmatpush1.bf16.msra.mxu1 %v7981_v35 }
 0x284   : > { %3803 = vmatprep.subr.bf16.mxu0 %v7988_v36  ;;  %3885 = vmatprep.subr.bf16.mxu1 %v7993_v37 }
 0x287   : > { %3804 = vmatpush1.bf16.msra.mxu0 %v8000_v38  ;;  %3886 = vmatpush1.bf16.msra.mxu1 %v8005_v39 }
 0x288   : > { %3805 = vmatprep.subr.bf16.mxu0 %v8012_v40  ;;  %3887 = vmatprep.subr.bf16.mxu1 %v8017_v41 }
 0x28b   : > { %3806 = vmatpush1.bf16.msra.mxu0 %v8024_v42  ;;  %3888 = vmatpush1.bf16.msra.mxu1 %v8029_v43 }
 0x28c   : > { %3807 = vmatprep.subr.bf16.mxu0 %v8036_v52  ;;  %3889 = vmatprep.subr.bf16.mxu1 %v8041_v57 }
 0x28f   : > { %3808 = vmatpush1.bf16.msra.mxu0 %v8048_v18  ;;  %3890 = vmatpush1.bf16.msra.mxu1 %v8053_v44 }
 0x290   : > { %3809 = vmatprep.subr.bf16.mxu0 %v8060_v45  ;;  %3891 = vmatprep.subr.bf16.mxu1 %v8065_v49 }
 0x293   : > { %3810 = vmatpush1.bf16.msra.mxu0 %v8072_v50  ;;  %3892 = vmatpush1.bf16.msra.mxu1 %v8077_v51 }
 0x294   : > { %3811 = vmatprep.subr.bf16.mxu0 %v8084_v53  ;;  %3893 = vmatprep.subr.bf16.mxu1 %v8089_v55 }
 0x297   : > { %3812 = vmatpush1.bf16.msra.mxu0 %v8096_v56  ;;  %3894 = vmatpush1.bf16.msra.mxu1 %v8101_v58 }
 0x298   : > { %3813 = vmatprep.subr.bf16.mxu0 %v8108_v60  ;;  %3895 = vmatprep.subr.bf16.mxu1 %v8113_v61 }
 0x29b   : > { %3814 = vmatpush1.bf16.msra.mxu0 %v8120_v54  ;;  %3896 = vmatpush1.bf16.msra.mxu1 %v8125_v62 }
 0x29c   : > { %3815 = vmatprep.subr.bf16.mxu0 %v8132_v63  ;;  %3897 = vmatprep.subr.bf16.mxu1 %v8137_v1 }
 0x29f   : > { %3816 = vmatpush1.bf16.msra.mxu0 %v8144_v2  ;;  %3898 = vmatpush1.bf16.msra.mxu1 %v8149_v3 }
 0x2a0   : > { %3817 = vmatprep.subr.bf16.mxu0 %v8156_v4  ;;  %3899 = vmatprep.subr.bf16.mxu1 %v8161_v5 }
 0x2a3   : > { %3818 = vmatpush1.bf16.msra.mxu0 %v8168_v6  ;;  %3900 = vmatpush1.bf16.msra.mxu1 %v8173_v8  ;;  %v8209_v8 = vld [vmem:[%s8376_s1 + $0xaec] ss:$16 sps:$4 sm:$0xff]  }
 0x2a4   : > { %3819 = vmatprep.subr.bf16.mxu0 %v8180_v9  ;;  %3901 = vmatprep.subr.bf16.mxu1 %v8185_v10  ;;  %8550 = vst [vmem:[#allocation3_spill] sm:$0xff] %v8209_v8  ;;  %v8216_v9 = vld [vmem:[%s8376_s1 + $0xae0] ss:$16 sps:$4 sm:$0xff]   ;;  %v8221_v10 = vld [vmem:[%s8376_s1 + $0xae8] ss:$16 sps:$4 sm:$0xff]  }
 0x2a5   : > { %8551 = vst [vmem:[#allocation21_spill] sm:$0xff] %v8216_v9  ;;  %8552 = vst [vmem:[#allocation4_spill] sm:$0xff] %v8221_v10 }
 0x2a7   : > { %3820 = vmatpush1.bf16.msra.mxu0 %v8192_v11  ;;  %3902 = vmatpush1.bf16.msra.mxu1 %v8197_v13  ;;  %v8228_v11 = vld [vmem:[%s8376_s1 + $0xb04] ss:$16 sps:$4 sm:$0xff]   ;;  %v8233_v13 = vld [vmem:[%s8376_s1 + $0xb0c] ss:$16 sps:$4 sm:$0xff]  }
 0x2a8   : > { %3821 = vmatprep.subr.bf16.mxu0 %v8204_v19  ;;  %3903 = vmatprep.subr.bf16.mxu1 %v8209_v8  ;;  %8553 = vst [vmem:[#allocation5_spill] sm:$0xff] %v8228_v11  ;;  %8554 = vst [vmem:[#allocation6_spill] sm:$0xff] %v8233_v13  ;;  %v8240_v19 = vld [vmem:[%s8376_s1 + $0xb00] ss:$16 sps:$4 sm:$0xff]   ;;  %v8245_v8 = vld [vmem:[%s8376_s1 + $0xb08] ss:$16 sps:$4 sm:$0xff]  }
 0x2a9   : > { %8555 = vst [vmem:[#allocation7_spill] sm:$0xff] %v8240_v19  ;;  %8556 = vst [vmem:[#allocation8_spill] sm:$0xff] %v8245_v8 }
 0x2ab   : > { %3822 = vmatpush1.bf16.msra.mxu0 %v8216_v9  ;;  %3904 = vmatpush1.bf16.msra.mxu1 %v8221_v10  ;;  %v8252_v9 = vld [vmem:[%s8376_s1 + $0xb24] ss:$16 sps:$4 sm:$0xff]   ;;  %v8257_v10 = vld [vmem:[%s8376_s1 + $0xb2c] ss:$16 sps:$4 sm:$0xff]  }
 0x2ac   : > { %3832 = vmatprep.subr.bf16.mxu0 %v8228_v11  ;;  %3914 = vmatprep.subr.bf16.mxu1 %v8233_v13  ;;  %8557 = vst [vmem:[#allocation9_spill] sm:$0xff] %v8252_v9  ;;  %v8266_v13 = vld [vmem:[%s8376_s1 + $0xb20] ss:$16 sps:$4 sm:$0xff]   ;;  %v8271_v11 = vld [vmem:[%s8376_s1 + $0xb28] ss:$16 sps:$4 sm:$0xff]  }
 0x2ae   : > { %3824 = vmatmul.mubr.bf16.vlgmr.msra.gmra.mrb[0].mxu0 %v7818_v7  ;;  %3906 = vmatmul.mubr.bf16.vlgmr.msra.gmra.mrb[0].mxu1 %v7818_v7  ;;  %v8558_v7 = vld [vmem:[#allocation16_spill] sm:$0xff] }
 0x2af   : > { %3833 = vmatpush1.bf16.msra.mxu0 %v8240_v19  ;;  %3915 = vmatpush1.bf16.msra.mxu1 %v8245_v8  ;;  %v3968_v8 = vshrl.u32 %v8558_v7, 16  ;;  %v3971_v19 = vshll.u32 %v8558_v7, 16 }
 0x2b0   : > { %3834 = vmatprep.subr.bf16.mxu0 %v8252_v9  ;;  %3916 = vmatprep.subr.bf16.mxu1 %v8257_v10 }
 0x2b1   : > { %3864 = vmatprep.mubr.bf16.mxu0 %v8469_v21  ;;  %3946 = vmatprep.mubr.bf16.mxu1 %v8469_v21  ;;  %v3970_v6 = vrot.slane %v3968_v8, 1  ;;  %v3973_v9 = vrot.slane %v3971_v19, 2 }
 0x2b3   : > { %3835 = vmatpush1.bf16.msra.mxu0 %v8266_v13  ;;  %3917 = vmatpush1.bf16.msra.mxu1 %v8271_v11  ;;  %v3974_v5 = vor.u32 %v3973_v9, %v3970_v6 }
 0x2b4   : > { %3988 = vmatprep.subr.bf16.mxu0 %v7833_v14  ;;  %4070 = vmatprep.subr.bf16.mxu1 %v7838_v15  ;;  %v8559_v14 = vld [vmem:[#allocation11_spill] sm:$0xff]  ;;  %v8560_v15 = vld [vmem:[#allocation2_spill] sm:$0xff] }
 0x2ba   : > { %4920 = vmatmul.mubr.msk.bf16.vlgmr.msra.gmra.mrb[0].mxu0 %vm712_vm0, %v7847_v16  ;;  %4921 = vmatmul.mubr.msk.bf16.vlgmr.msra.gmra.mrb[0].mxu1 %vm712_vm0, %v7847_v16  ;;  %v3960_v16 = vshrl.u32 %v8560_v15, 16 }
 0x2bb   : > { %3989 = vmatpush1.bf16.msra.mxu0 %v7852_v24  ;;  %4071 = vmatpush1.bf16.msra.mxu1 %v7857_v25  ;;  %v3963_v24 = vshll.u32 %v8560_v15, 16  ;;  %v8561_v25 = vld [vmem:[#allocation12_spill] sm:$0xff] }
 0x2bc   : > { %3990 = vmatprep.subr.bf16.mxu0 %v7862_v47  ;;  %4072 = vmatprep.subr.bf16.mxu1 %v7867_v0  ;;  %v8562_v47 = vld [vmem:[#allocation13_spill] sm:$0xff]  ;;  %v8563_v0 = vld [vmem:[#allocation14_spill] sm:$0xff] }
 0x2bd   : > { %4020 = vmatprep.mubr.bf16.mxu0 %v3974_v5  ;;  %4102 = vmatprep.mubr.bf16.mxu1 %v3974_v5 }
 0x2bf   : > { %3991 = vmatpush1.bf16.msra.mxu0 %v7878_v46  ;;  %4073 = vmatpush1.bf16.msra.mxu1 %v7883_v20  ;;  %v8564_v46 = vld [vmem:[#allocation15_spill] sm:$0xff]  ;;  %v3962_v20 = vrot.slane %v3960_v16, 1 }
 0x2c0   : > { %3992 = vmatprep.subr.bf16.mxu0 %v7890_v22  ;;  %4074 = vmatprep.subr.bf16.mxu1 %v7895_v12  ;;  %v3965_v22 = vrot.slane %v3963_v24, 2  ;;  %v8565_v12 = vld [vmem:[#allocation18_spill] sm:$0xff] }
 0x2c3   : > { %3993 = vmatpush1.bf16.msra.mxu0 %v7904_v23  ;;  %4075 = vmatpush1.bf16.msra.mxu1 %v7909_v17  ;;  %v8566_v23 = vld [vmem:[#allocation19_spill] sm:$0xff]  ;;  %v8567_v17 = vld [vmem:[#allocation20_spill] sm:$0xff] }
 0x2c4   : > { %3994 = vmatprep.subr.bf16.mxu0 %v7916_v48  ;;  %4076 = vmatprep.subr.bf16.mxu1 %v7921_v26  ;;  %v8568_v48 = vld [vmem:[#allocation3_spill] sm:$0xff]  ;;  %v3966_v26 = vor.u32 %v3965_v22, %v3962_v20 }
 0x2c7   : > { %3995 = vmatpush1.bf16.msra.mxu0 %v7928_v59  ;;  %4077 = vmatpush1.bf16.msra.mxu1 %v7933_v27  ;;  %v8569_v59 = vld [vmem:[#allocation21_spill] sm:$0xff]  ;;  %v8570_v27 = vld [vmem:[#allocation4_spill] sm:$0xff] }
 0x2c8   : > { %3996 = vmatprep.subr.bf16.mxu0 %v7940_v28  ;;  %4078 = vmatprep.subr.bf16.mxu1 %v7945_v29  ;;  %v8571_v28 = vld [vmem:[#allocation5_spill] sm:$0xff]  ;;  %v8572_v29 = vld [vmem:[#allocation6_spill] sm:$0xff] }
 0x2cb   : > { %3997 = vmatpush1.bf16.msra.mxu0 %v7952_v30  ;;  %4079 = vmatpush1.bf16.msra.mxu1 %v7957_v31  ;;  %v8573_v30 = vld [vmem:[#allocation17_spill] sm:$0xff] }
 0x2cc   : > { %3998 = vmatprep.subr.bf16.mxu0 %v7964_v32  ;;  %4080 = vmatprep.subr.bf16.mxu1 %v7969_v33  ;;  %v3976_v31 = vshrl.u32 %v8573_v30, 16  ;;  %v3979_v32 = vshll.u32 %v8573_v30, 16  ;;  %v8574_v33 = vld [vmem:[#allocation7_spill] sm:$0xff] }
 0x2cf   : > { %3999 = vmatpush1.bf16.msra.mxu0 %v7976_v34  ;;  %4081 = vmatpush1.bf16.msra.mxu1 %v7981_v35  ;;  %v8575_v34 = vld [vmem:[#allocation8_spill] sm:$0xff]  ;;  %v8576_v35 = vld [vmem:[#allocation9_spill] sm:$0xff] }
 0x2d0   : > { %4000 = vmatprep.subr.bf16.mxu0 %v7988_v36  ;;  %4082 = vmatprep.subr.bf16.mxu1 %v7993_v37  ;;  %v3978_v36 = vrot.slane %v3976_v31, 1  ;;  %v3981_v37 = vrot.slane %v3979_v32, 2 }
 0x2d3   : > { %4001 = vmatpush1.bf16.msra.mxu0 %v8000_v38  ;;  %4083 = vmatpush1.bf16.msra.mxu1 %v8005_v39  ;;  %v3982_v38 = vor.u32 %v3981_v37, %v3978_v36 }
 0x2d4   : > { %4002 = vmatprep.subr.bf16.mxu0 %v8012_v40  ;;  %4084 = vmatprep.subr.bf16.mxu1 %v8017_v41 }
 0x2d7   : > { %4003 = vmatpush1.bf16.msra.mxu0 %v8024_v42  ;;  %4085 = vmatpush1.bf16.msra.mxu1 %v8029_v43 }
 0x2d8   : > { %4004 = vmatprep.subr.bf16.mxu0 %v8036_v52  ;;  %4086 = vmatprep.subr.bf16.mxu1 %v8041_v57 }
 0x2db   : > { %4005 = vmatpush1.bf16.msra.mxu0 %v8048_v18  ;;  %4087 = vmatpush1.bf16.msra.mxu1 %v8053_v44 }
 0x2dc   : > { %4006 = vmatprep.subr.bf16.mxu0 %v8060_v45  ;;  %4088 = vmatprep.subr.bf16.mxu1 %v8065_v49  ;;  %v4162_v49 = vld [vmem:[%s8377_s2] sm:$0x3] }
 0x2df   : > { %4007 = vmatpush1.bf16.msra.mxu0 %v8072_v50  ;;  %4089 = vmatpush1.bf16.msra.mxu1 %v8077_v51 }
 0x2e0   : > { %4008 = vmatprep.subr.bf16.mxu0 %v8084_v53  ;;  %4090 = vmatprep.subr.bf16.mxu1 %v8089_v55 }
 0x2e3   : > { %4009 = vmatpush1.bf16.msra.mxu0 %v8096_v56  ;;  %4091 = vmatpush1.bf16.msra.mxu1 %v8101_v58 }
 0x2e4   : > { %4010 = vmatprep.subr.bf16.mxu0 %v8108_v60  ;;  %4092 = vmatprep.subr.bf16.mxu1 %v8113_v61 }
 0x2e7   : > { %4011 = vmatpush1.bf16.msra.mxu0 %v8120_v54  ;;  %4093 = vmatpush1.bf16.msra.mxu1 %v8125_v62 }
 0x2e8   : > { %4012 = vmatprep.subr.bf16.mxu0 %v8132_v63  ;;  %4094 = vmatprep.subr.bf16.mxu1 %v8137_v1 }
 0x2eb   : > { %4013 = vmatpush1.bf16.msra.mxu0 %v8144_v2  ;;  %4095 = vmatpush1.bf16.msra.mxu1 %v8149_v3 }
 0x2ec   : > { %4014 = vmatprep.subr.bf16.mxu0 %v8156_v4  ;;  %4096 = vmatprep.subr.bf16.mxu1 %v8559_v14 }
 0x2ef   : > { %4015 = vmatpush1.bf16.msra.mxu0 %v8561_v25  ;;  %4097 = vmatpush1.bf16.msra.mxu1 %v8562_v47 }
 0x2f0   : > { %4016 = vmatprep.subr.bf16.mxu0 %v8563_v0  ;;  %4098 = vmatprep.subr.bf16.mxu1 %v8564_v46 }
 0x2f3   : > { %4017 = vmatpush1.bf16.msra.mxu0 %v8565_v12  ;;  %4099 = vmatpush1.bf16.msra.mxu1 %v8566_v23 }
 0x2f4   : > { %4018 = vmatprep.subr.bf16.mxu0 %v8567_v17  ;;  %4100 = vmatprep.subr.bf16.mxu1 %v8568_v48 }
 0x2f7   : > { %4019 = vmatpush1.bf16.msra.mxu0 %v8569_v59  ;;  %4101 = vmatpush1.bf16.msra.mxu1 %v8570_v27 }
 0x2f8   : > { %4029 = vmatprep.subr.bf16.mxu0 %v8571_v28  ;;  %4111 = vmatprep.subr.bf16.mxu1 %v8572_v29 }
 0x2fa   : > { %4021 = vmatmul.mubr.bf16.vlgmr.msra.gmra.mrb[4].mxu0 %v3966_v26  ;;  %4103 = vmatmul.mubr.bf16.vlgmr.msra.gmra.mrb[4].mxu1 %v3966_v26 }
 0x2fb   : > { %4030 = vmatpush1.bf16.msra.mxu0 %v8574_v33  ;;  %4112 = vmatpush1.bf16.msra.mxu1 %v8575_v34 }
 0x2fc   : > { %4031 = vmatprep.subr.bf16.mxu0 %v8576_v35  ;;  %4113 = vmatprep.subr.bf16.mxu1 %v8257_v10 }
 0x2fd   : > { %4061 = vmatprep.mubr.bf16.mxu0 %v8469_v21  ;;  %4143 = vmatprep.mubr.bf16.mxu1 %v8469_v21  ;;  %v4164_v21 = vlaneseq }
 0x2ff   : > { %4032 = vmatpush1.bf16.msra.mxu0 %v8266_v13  ;;  %4114 = vmatpush1.bf16.msra.mxu1 %v8271_v11  ;;  %v4165_v44 = vshrl.u32 %v4164_v21, 7 }
 0x301   : > { %v4166_v45 = vsub.s32 0, %v4165_v44  ;;  %v4170_v50 = vsub.s32 1, %v4165_v44 }
 0x303   : > { %v4167_v58 = vrot.slane %v4162_v49, %v4166_v45  ;;  %v4171_v63 = vrot.slane %v4162_v49, %v4170_v50 }
 0x306   : > { %4922 = vmatmul.mubr.msk.bf16.vlgmr.msra.gmra.mrb[4].mxu0 %vm712_vm0, %v3982_v38  ;;  %4923 = vmatmul.mubr.msk.bf16.vlgmr.msra.gmra.mrb[4].mxu1 %vm712_vm0, %v3982_v38 }
 0x38d   : > { %v3866_v39 = vpop.f32.mrb[0].mxu0  ;;  %v3948_v40 = vpop.f32.mrb[0].mxu1 }
 0x38e   : > { %v3868_v41 = vpop.f32.mrb[1].mxu0  ;;  %v3950_v42 = vpop.f32.mrb[1].mxu1 }
 0x38f   : > { %v3870_v43 = vpop.f32.mrb[2].mxu0  ;;  %v3952_v52 = vpop.f32.mrb[2].mxu1 }
 0x390   : > { %v3871_v57 = vpop.f32.mrb[3].mxu0  ;;  %v3953_v18 = vpop.f32.mrb[3].mxu1 }
 0x3d9   : > { %v4063_v51 = vpop.f32.mrb[4].mxu0  ;;  %v4145_v53 = vpop.f32.mrb[4].mxu1 }
 0x3da   : > { %v4156_v55 = vmax.f32 %v3866_v39, %v4063_v51  ;;  %v4158_v56 = vmax.f32 %v3948_v40, %v4145_v53  ;;  %v4065_v60 = vpop.f32.mrb[5].mxu0  ;;  %v4147_v61 = vpop.f32.mrb[5].mxu1 }
 0x3db   : > { %v4157_v54 = vmax.f32 %v3868_v41, %v4065_v60  ;;  %v4159_v62 = vmax.f32 %v3950_v42, %v4147_v61  ;;  %v4067_v1 = vpop.f32.mrb[6].mxu0  ;;  %v4149_v2 = vpop.f32.mrb[6].mxu1 }
 0x3dc   : > { %v4160_v3 = vmax.f32 %v4156_v55, %v4158_v56  ;;  %v4068_v4 = vpop.f32.mrb[7].mxu0  ;;  %v4150_v5 = vpop.f32.mrb[7].mxu1 }
 0x3dd   : > { %v4161_v6 = vmax.f32 %v4157_v54, %v4159_v62 }
 0x3de   : > { %v4174_v8 = vadd.f32 %v4167_v58, %v4160_v3 }
 0x3df   : > { %v4175_v9 = vadd.f32 %v4171_v63, %v4161_v6 }
 0x3e0   : > { %v4176_v10 = vmax.f32 %v4174_v8, 0.0 }
 0x3e1   : > { %v4177_v11 = vmax.f32 %v4175_v9, 0.0 }
 0x3e2   : > { %4178 = vst [vmem:[%s170_s17] sm:$0x7f] %v4176_v10 }
 0x3e3   : > { %4180 = vst.msk [vmem:[%s170_s17 + $0x8] sm:$0x7f] %vm4179_vm1, %v4177_v11 }
 0x3e4 PF: > { %s13_s12 = sadd.s32 1, %s5715_s12  }
 0x3e5   : > { %p10_p4 = scmp.ge.s32.totalorder %s13_s12, 4  }
 0x3e7   :  { %12 = sbr.rel (!%p10_p4) target bundleno = 1 (0x1), region = 66 }

// kernel: convnet_gate_forward.5
= control target key start
LH: loop header
LB: loop body
LE: loop exit
PB: predicated region body
PF: predicated region fallthrough
CT: control target
= control target key end

     0   :  { %v37_v20 = vlaneseq  ;;  %vm1570_vm0 = vmmov 0   ;;  %vm127_vm1 = vcmask 261120   ;;  %vm1216_vm2 = vcmask 80896   ;;  %s2025_s2 = inlined_call_operand.vmem [shape: bf16[1568,10], index: 2, kind: input, shape index: {}]   ;;  %s2026_s0 = inlined_call_operand.vmem [shape: f32[8,1568], index: 0, kind: input, shape index: {}]   ;;  %s2027_s1 = inlined_call_operand.vmem [shape: f32[1,1568], index: 1, kind: input, shape index: {}]   ;;  %s2028_s4 = inlined_call_operand.vmem [shape: f32[8,1568], index: 4, kind: output, shape index: {0}]   ;;  %s2029_s3 = inlined_call_operand.vmem [shape: f32[1,10], index: 3, kind: input, shape index: {}]   ;;  %s2030_s5 = inlined_call_operand.vmem [shape: f32[8,10], index: 5, kind: output, shape index: {1}]  }
   0x1   :  { %v1471_v0 = vld [vmem:[%s2025_s2 + $0x40] sm:$0xff]   ;;  %v1475_v4 = vld [vmem:[%s2025_s2 + $0x48] sm:$0xff]   ;;  %v1479_v8 = vld [vmem:[%s2025_s2 + $0x50] sm:$0xff]  }
   0x2   :  { %v1472_v1 = vld [vmem:[%s2025_s2] sm:$0xff]   ;;  %1326 = vmatprep.subr.bf16.mxu0 %v1471_v0  ;;  %v1476_v5 = vld [vmem:[%s2025_s2 + $0x8] sm:$0xff]   ;;  %v1480_v9 = vld [vmem:[%s2025_s2 + $0x10] sm:$0xff]   ;;  %v1673_v25 = vshrl.u32 %v37_v20, 7 }
   0x3   :  { %v1473_v2 = vld [vmem:[%s2025_s2 + $0xc0] sm:$0xff]   ;;  %1327 = vmatpush3.bf16.msra.mxu0 %v1472_v1  ;;  %v1477_v6 = vld [vmem:[%s2025_s2 + $0xc8] sm:$0xff]   ;;  %v1481_v10 = vld [vmem:[%s2025_s2 + $0xd0] sm:$0xff]  }
   0x4   :  { %v1474_v3 = vld [vmem:[%s2025_s2 + $0x80] sm:$0xff]   ;;  %1348 = vmatprep.subr.bf16.mxu1 %v1473_v2  ;;  %1328 = vmatprep.subr.bf16.mxu0 %v1475_v4  ;;  %v1478_v7 = vld [vmem:[%s2025_s2 + $0x88] sm:$0xff]   ;;  %v1482_v11 = vld [vmem:[%s2025_s2 + $0x90] sm:$0xff]   ;;  %v43_v30 = vsub.s32 1, %v1673_v25  ;;  %v39_v32 = vsub.s32 0, %v1673_v25  ;;  %v51_v34 = vsub.s32 3, %v1673_v25 }
   0x5   :  { %1349 = vmatpush3.bf16.msra.mxu1 %v1474_v3  ;;  %v1483_v12 = vld [vmem:[%s2025_s2 + $0x58] sm:$0xff]   ;;  %v1487_v16 = vld [vmem:[%s2025_s2 + $0x60] sm:$0xff]   ;;  %v1491_v21 = vld [vmem:[%s2025_s2 + $0x68] sm:$0xff]   ;;  %v47_v36 = vsub.s32 2, %v1673_v25  ;;  %v67_v20 = vsub.s32 7, %v1673_v25 }
   0x6   :  { %1350 = vmatprep.subr.bf16.mxu1 %v1477_v6  ;;  %v1484_v13 = vld [vmem:[%s2025_s2 + $0x18] sm:$0xff]   ;;  %v1488_v17 = vld [vmem:[%s2025_s2 + $0x20] sm:$0xff]   ;;  %v1492_v22 = vld [vmem:[%s2025_s2 + $0x28] sm:$0xff]  }
   0x7   :  { %1329 = vmatpush3.bf16.msra.mxu0 %v1476_v5  ;;  %v1485_v14 = vld [vmem:[%s2025_s2 + $0xd8] sm:$0xff]   ;;  %v1489_v18 = vld [vmem:[%s2025_s2 + $0xe0] sm:$0xff]   ;;  %v1493_v23 = vld [vmem:[%s2025_s2 + $0xe8] sm:$0xff]  }
   0x8   :  { %1330 = vmatprep.subr.bf16.mxu0 %v1479_v8  ;;  %v1486_v15 = vld [vmem:[%s2025_s2 + $0x98] sm:$0xff]   ;;  %v1490_v19 = vld [vmem:[%s2025_s2 + $0xa0] sm:$0xff]   ;;  %v1494_v24 = vld [vmem:[%s2025_s2 + $0xa8] sm:$0xff]  }
   0x9   :  { %1351 = vmatpush3.bf16.msra.mxu1 %v1478_v7  ;;  %v1495_v26 = vld [vmem:[%s2025_s2 + $0x70] sm:$0xff]   ;;  %v1499_v31 = vld [vmem:[%s2025_s2 + $0x78] sm:$0xff]   ;;  %v21_v38 = vld [vmem:[%s2026_s0 + $0x8] sm:$0xff] }
   0xa   :  { %1352 = vmatprep.subr.bf16.mxu1 %v1481_v10  ;;  %v1496_v27 = vld [vmem:[%s2025_s2 + $0x30] sm:$0xff]   ;;  %v1500_v33 = vld [vmem:[%s2025_s2 + $0x38] sm:$0xff]   ;;  %v1709_v39 = vld [vmem:[%s2027_s1] sm:$0xff]  ;;  %v130_v42 = vpack.c.bf16 %v21_v38, %v21_v38 }
   0xb   :  { %1331 = vmatpush3.bf16.msra.mxu0 %v1480_v9  ;;  %v1497_v28 = vld [vmem:[%s2025_s2 + $0xf0] sm:$0xff]   ;;  %v1501_v35 = vld [vmem:[%s2025_s2 + $0xf8] sm:$0xff]   ;;  %v20_v40 = vld [vmem:[%s2026_s0] sm:$0xff]  ;;  %v44_v41 = vrot.slane %v1709_v39, %v43_v30  ;;  %v40_v43 = vrot.slane %v1709_v39, %v39_v32  ;;  %v52_v47 = vrot.slane %v1709_v39, %v51_v34  ;;  %v48_v48 = vrot.slane %v1709_v39, %v47_v36 }
   0xc   :  { %1332 = vmatprep.subr.bf16.mxu0 %v1483_v12  ;;  %v1498_v29 = vld [vmem:[%s2025_s2 + $0xb0] sm:$0xff]   ;;  %v1502_v37 = vld [vmem:[%s2025_s2 + $0xb8] sm:$0xff]   ;;  %v129_v44 = vpack.c.bf16 %v20_v40, %v20_v40  ;;  %v1503_v45 = vld [vmem:[%s2025_s2 + $0x140] sm:$0xff]   ;;  %968 = vmatprep.mubr.bf16.mxu0 %v130_v42 }
   0xd   :  { %1353 = vmatpush3.bf16.msra.mxu1 %v1482_v11  ;;  %v23_v46 = vld [vmem:[%s2026_s0 + $0x18] sm:$0xff]  ;;  %v103_v49 = vmul.f32 %v44_v41, %v21_v38  ;;  %v102_v50 = vmul.f32 %v40_v43, %v20_v40  ;;  %v1504_v52 = vld [vmem:[%s2025_s2 + $0x100] sm:$0xff]   ;;  %v22_v55 = vld [vmem:[%s2026_s0 + $0x10] sm:$0xff] }
   0xe   :  { %1354 = vmatprep.subr.bf16.mxu1 %v1485_v14  ;;  %v132_v51 = vpack.c.bf16 %v23_v46, %v23_v46  ;;  %v105_v53 = vmul.f32 %v52_v47, %v23_v46  ;;  %v1505_v54 = vld [vmem:[%s2025_s2 + $0x1c0] sm:$0xff]   ;;  %v104_v56 = vmul.f32 %v48_v48, %v22_v55  ;;  %v131_v57 = vpack.c.bf16 %v22_v55, %v22_v55  ;;  %v1507_v59 = vld [vmem:[%s2025_s2 + $0x148] sm:$0xff]   ;;  %v1511_v63 = vld [vmem:[%s2025_s2 + $0x150] sm:$0xff]  }
   0xf   :  { %1333 = vmatpush3.bf16.msra.mxu0 %v1484_v13  ;;  %116 = vst [vmem:[%s2028_s4 + $0x8] sm:$0xff] %v103_v49  ;;  %115 = vst [vmem:[%s2028_s4] sm:$0xff] %v102_v50  ;;  %v1506_v58 = vld [vmem:[%s2025_s2 + $0x180] sm:$0xff]   ;;  %v1508_v60 = vld [vmem:[%s2025_s2 + $0x108] sm:$0xff]  }
  0x10   :  { %1334 = vmatprep.subr.bf16.mxu0 %v1487_v16  ;;  %1008 = vmatprep.mubr.bf16.mxu1 %v132_v51  ;;  %118 = vst [vmem:[%s2028_s4 + $0x18] sm:$0xff] %v105_v53  ;;  %117 = vst [vmem:[%s2028_s4 + $0x10] sm:$0xff] %v104_v56  ;;  %v1509_v61 = vld [vmem:[%s2025_s2 + $0x1c8] sm:$0xff]   ;;  %v1512_v0 = vld [vmem:[%s2025_s2 + $0x110] sm:$0xff]   ;;  %v59_v16 = vsub.s32 5, %v1673_v25 }
  0x11   :  { %1355 = vmatpush3.bf16.msra.mxu1 %v1486_v15  ;;  %v1510_v62 = vld [vmem:[%s2025_s2 + $0x188] sm:$0xff]   ;;  %v1513_v1 = vld [vmem:[%s2025_s2 + $0x1d0] sm:$0xff]   ;;  %v1515_v3 = vld [vmem:[%s2025_s2 + $0x158] sm:$0xff]  }
  0x12   :  { %1356 = vmatprep.subr.bf16.mxu1 %v1489_v18  ;;  %v1514_v2 = vld [vmem:[%s2025_s2 + $0x190] sm:$0xff]   ;;  %v1516_v4 = vld [vmem:[%s2025_s2 + $0x118] sm:$0xff]   ;;  %v1519_v7 = vld [vmem:[%s2025_s2 + $0x160] sm:$0xff]   ;;  %v55_v18 = vsub.s32 4, %v1673_v25 }
  0x13   :  { %1335 = vmatpush3.bf16.msra.mxu0 %v1488_v17  ;;  %v1517_v5 = vld [vmem:[%s2025_s2 + $0x1d8] sm:$0xff]   ;;  %v1520_v8 = vld [vmem:[%s2025_s2 + $0x120] sm:$0xff]   ;;  %v1523_v11 = vld [vmem:[%s2025_s2 + $0x168] sm:$0xff]  }
  0x14   :  { %1336 = vmatprep.subr.bf16.mxu0 %v1491_v21  ;;  %v1518_v6 = vld [vmem:[%s2025_s2 + $0x198] sm:$0xff]   ;;  %v1521_v9 = vld [vmem:[%s2025_s2 + $0x1e0] sm:$0xff]   ;;  %v1524_v12 = vld [vmem:[%s2025_s2 + $0x128] sm:$0xff]  }
  0x15   :  { %1357 = vmatpush3.bf16.msra.mxu1 %v1490_v19  ;;  %v1522_v10 = vld [vmem:[%s2025_s2 + $0x1a0] sm:$0xff]   ;;  %v1525_v13 = vld [vmem:[%s2025_s2 + $0x1e8] sm:$0xff]   ;;  %v1527_v15 = vld [vmem:[%s2025_s2 + $0x170] sm:$0xff]  }
  0x16   :  { %1358 = vmatprep.subr.bf16.mxu1 %v1493_v23  ;;  %v1526_v14 = vld [vmem:[%s2025_s2 + $0x1a8] sm:$0xff]   ;;  %v1528_v17 = vld [vmem:[%s2025_s2 + $0x130] sm:$0xff]   ;;  %v60_v23 = vrot.slane %v1709_v39, %v59_v16  ;;  %v24_v38 = vld [vmem:[%s2026_s0 + $0x20] sm:$0xff] }
  0x17   :  { %1337 = vmatpush3.bf16.msra.mxu0 %v1492_v22  ;;  %v1529_v19 = vld [vmem:[%s2025_s2 + $0x1f0] sm:$0xff]   ;;  %v1531_v22 = vld [vmem:[%s2025_s2 + $0x178] sm:$0xff]   ;;  %v133_v42 = vpack.c.bf16 %v24_v38, %v24_v38  ;;  %v1535_v43 = vld [vmem:[%s2025_s2 + $0x240] sm:$0xff]  }
  0x18   :  { %1338 = vmatprep.subr.bf16.mxu0 %v1495_v26  ;;  %v1530_v21 = vld [vmem:[%s2025_s2 + $0x1b0] sm:$0xff]   ;;  %v1532_v26 = vld [vmem:[%s2025_s2 + $0x138] sm:$0xff]   ;;  %v1537_v47 = vld [vmem:[%s2025_s2 + $0x2c0] sm:$0xff]  }
  0x19   :  { %1359 = vmatpush3.bf16.msra.mxu1 %v1494_v24  ;;  %v63_v24 = vsub.s32 6, %v1673_v25  ;;  %v26_v48 = vld [vmem:[%s2026_s0 + $0x30] sm:$0xff]  ;;  %v1538_v51 = vld [vmem:[%s2025_s2 + $0x280] sm:$0xff]   ;;  %v1540_v53 = vld [vmem:[%s2025_s2 + $0x208] sm:$0xff]  }
  0x1a   :  { %1360 = vmatprep.subr.bf16.mxu1 %v1497_v28  ;;  %v1533_v28 = vld [vmem:[%s2025_s2 + $0x1f8] sm:$0xff]   ;;  %v135_v50 = vpack.c.bf16 %v26_v48, %v26_v48  ;;  %v1542_v55 = vld [vmem:[%s2025_s2 + $0x288] sm:$0xff]   ;;  %v1543_v56 = vld [vmem:[%s2025_s2 + $0x250] sm:$0xff]  }
  0x1b   :  { %1339 = vmatpush3.bf16.msra.mxu0 %v1496_v27  ;;  %v56_v27 = vrot.slane %v1709_v39, %v55_v18  ;;  %v64_v40 = vrot.slane %v1709_v39, %v63_v24  ;;  %v29_v16 = vld [vmem:[%s2026_s0 + $0x48] sm:$0xff] }
  0x1c   :  { %1340 = vmatprep.subr.bf16.mxu0 %v1499_v31  ;;  %v1534_v31 = vld [vmem:[%s2025_s2 + $0x1b8] sm:$0xff]   ;;  %v1568_v25 = vld [vmem:[%s2025_s2 + $0x308] sm:$0xff]  }
  0x1d   :  { %1361 = vmatpush3.bf16.msra.mxu1 %v1498_v29  ;;  %v68_v29 = vrot.slane %v1709_v39, %v67_v20  ;;  %v106_v41 = vmul.f32 %v56_v27, %v24_v38  ;;  %v1536_v39 = vld [vmem:[%s2025_s2 + $0x200] sm:$0xff]   ;;  %v108_v49 = vmul.f32 %v64_v40, %v26_v48  ;;  %v1569_v20 = vmov 0.0   ;;  %v30_v27 = vld [vmem:[%s2026_s0 + $0x50] sm:$0xff] }
  0x1e   :  { %1362 = vmatprep.subr.bf16.mxu1 %v1501_v35 }
  0x1f   :  { %1341 = vmatpush3.bf16.msra.mxu0 %v1500_v33  ;;  %v25_v33 = vld [vmem:[%s2026_s0 + $0x28] sm:$0xff]  ;;  %119 = vst [vmem:[%s2028_s4 + $0x20] sm:$0xff] %v106_v41  ;;  %121 = vst [vmem:[%s2028_s4 + $0x30] sm:$0xff] %v108_v49 }
  0x20   :  { %1370 = vmatprep.subr.bf16.mxu0 %v1503_v45  ;;  %v107_v35 = vmul.f32 %v60_v23, %v25_v33 }
  0x21   :  { %1363 = vmatpush3.bf16.msra.mxu1 %v1502_v37  ;;  %v134_v37 = vpack.c.bf16 %v25_v33, %v25_v33 }
  0x22   :  { %969 = vmatmul.mubr.bf16.vlgmr.msra.gmra.mrb[0].mxu0 %v129_v44  ;;  %1392 = vmatprep.subr.bf16.mxu1 %v1505_v54  ;;  %v27_v44 = vld [vmem:[%s2026_s0 + $0x38] sm:$0xff]  ;;  %120 = vst [vmem:[%s2028_s4 + $0x28] sm:$0xff] %v107_v35  ;;  %v1541_v54 = vld [vmem:[%s2025_s2 + $0x2c8] sm:$0xff]  }
  0x23   :  { %1371 = vmatpush3.bf16.msra.mxu0 %v1504_v52  ;;  %1048 = vmatprep.mubr.bf16.mxu0 %v134_v37  ;;  %v109_v45 = vmul.f32 %v68_v29, %v27_v44  ;;  %v136_v46 = vpack.c.bf16 %v27_v44, %v27_v44  ;;  %v1539_v52 = vld [vmem:[%s2025_s2 + $0x248] sm:$0xff]  }
  0x24   :  { %1009 = vmatmul.mubr.bf16.vlgmr.msra.gmra.mrb[0].mxu1 %v131_v57  ;;  %1372 = vmatprep.subr.bf16.mxu0 %v1507_v59  ;;  %v1544_v57 = vld [vmem:[%s2025_s2 + $0x210] sm:$0xff]  }
  0x25   :  { %1393 = vmatpush3.bf16.msra.mxu1 %v1506_v58  ;;  %122 = vst [vmem:[%s2028_s4 + $0x38] sm:$0xff] %v109_v45  ;;  %1088 = vmatprep.mubr.bf16.mxu1 %v136_v46  ;;  %v1545_v58 = vld [vmem:[%s2025_s2 + $0x2d0] sm:$0xff]  }
  0x26   :  { %1394 = vmatprep.subr.bf16.mxu1 %v1509_v61  ;;  %v1546_v59 = vld [vmem:[%s2025_s2 + $0x290] sm:$0xff]   ;;  %v1548_v61 = vld [vmem:[%s2025_s2 + $0x218] sm:$0xff]  }
  0x27   :  { %1373 = vmatpush3.bf16.msra.mxu0 %v1508_v60  ;;  %v1547_v60 = vld [vmem:[%s2025_s2 + $0x258] sm:$0xff]  }
  0x28   :  { %1374 = vmatprep.subr.bf16.mxu0 %v1511_v63  ;;  %v1550_v63 = vld [vmem:[%s2025_s2 + $0x298] sm:$0xff]  }
  0x29   :  { %1395 = vmatpush3.bf16.msra.mxu1 %v1510_v62  ;;  %v1549_v62 = vld [vmem:[%s2025_s2 + $0x2d8] sm:$0xff]  }
  0x2a   :  { %1396 = vmatprep.subr.bf16.mxu1 %v1513_v1  ;;  %v1552_v1 = vld [vmem:[%s2025_s2 + $0x220] sm:$0xff]  }
  0x2b   :  { %1375 = vmatpush3.bf16.msra.mxu0 %v1512_v0  ;;  %v1551_v0 = vld [vmem:[%s2025_s2 + $0x260] sm:$0xff]  }
  0x2c   :  { %1376 = vmatprep.subr.bf16.mxu0 %v1515_v3  ;;  %v1554_v3 = vld [vmem:[%s2025_s2 + $0x2a0] sm:$0xff]  }
  0x2d   :  { %1397 = vmatpush3.bf16.msra.mxu1 %v1514_v2  ;;  %v1553_v2 = vld [vmem:[%s2025_s2 + $0x2e0] sm:$0xff]  }
  0x2e   :  { %1398 = vmatprep.subr.bf16.mxu1 %v1517_v5  ;;  %v1556_v5 = vld [vmem:[%s2025_s2 + $0x228] sm:$0xff]  }
  0x2f   :  { %1377 = vmatpush3.bf16.msra.mxu0 %v1516_v4  ;;  %v1555_v4 = vld [vmem:[%s2025_s2 + $0x268] sm:$0xff]  }
  0x30   :  { %1378 = vmatprep.subr.bf16.mxu0 %v1519_v7  ;;  %v1558_v7 = vld [vmem:[%s2025_s2 + $0x2a8] sm:$0xff]  }
  0x31   :  { %1399 = vmatpush3.bf16.msra.mxu1 %v1518_v6  ;;  %v1557_v6 = vld [vmem:[%s2025_s2 + $0x2e8] sm:$0xff]  }
  0x32   :  { %1400 = vmatprep.subr.bf16.mxu1 %v1521_v9  ;;  %v1560_v9 = vld [vmem:[%s2025_s2 + $0x230] sm:$0xff]  }
  0x33   :  { %1379 = vmatpush3.bf16.msra.mxu0 %v1520_v8  ;;  %v1559_v8 = vld [vmem:[%s2025_s2 + $0x270] sm:$0xff]  }
  0x34   :  { %1380 = vmatprep.subr.bf16.mxu0 %v1523_v11  ;;  %v1562_v11 = vld [vmem:[%s2025_s2 + $0x2b0] sm:$0xff]  }
  0x35   :  { %1401 = vmatpush3.bf16.msra.mxu1 %v1522_v10  ;;  %v1561_v10 = vld [vmem:[%s2025_s2 + $0x2f0] sm:$0xff]  }
  0x36   :  { %1402 = vmatprep.subr.bf16.mxu1 %v1525_v13  ;;  %v1564_v13 = vld [vmem:[%s2025_s2 + $0x238] sm:$0xff]  }
  0x37   :  { %1381 = vmatpush3.bf16.msra.mxu0 %v1524_v12  ;;  %v1563_v12 = vld [vmem:[%s2025_s2 + $0x278] sm:$0xff]  }
  0x38   :  { %1382 = vmatprep.subr.bf16.mxu0 %v1527_v15  ;;  %v1566_v15 = vld [vmem:[%s2025_s2 + $0x2b8] sm:$0xff]  }
  0x39   :  { %1403 = vmatpush3.bf16.msra.mxu1 %v1526_v14  ;;  %v1565_v14 = vld [vmem:[%s2025_s2 + $0x2f8] sm:$0xff]  }
  0x3a   :  { %1404 = vmatprep.subr.bf16.mxu1 %v1529_v19  ;;  %v28_v19 = vld [vmem:[%s2026_s0 + $0x40] sm:$0xff] }
  0x3b   :  { %1383 = vmatpush3.bf16.msra.mxu0 %v1528_v17  ;;  %v34_v17 = vld [vmem:[%s2027_s1 + $0x8] sm:$0x1f]  ;;  %v137_v24 = vpack.c.bf16 %v28_v19, %v28_v19 }
  0x3c   :  { %1384 = vmatprep.subr.bf16.mxu0 %v1531_v22  ;;  %v138_v22 = vpack.c.bf16 %v29_v16, %v29_v16  ;;  %v72_v23 = vrot.slane %v34_v17, %v39_v32  ;;  %v1567_v32 = vld [vmem:[%s2025_s2 + $0x300] sm:$0xff]   ;;  %v88_v37 = vrot.slane %v34_v17, %v55_v18 }
  0x3d   :  { %1405 = vmatpush3.bf16.msra.mxu1 %v1530_v21  ;;  %v76_v21 = vrot.slane %v34_v17, %v43_v30  ;;  %v80_v30 = vrot.slane %v34_v17, %v47_v36 }
  0x3e   :  { %1406 = vmatprep.subr.bf16.mxu1 %v1533_v28  ;;  %v84_v28 = vrot.slane %v34_v17, %v51_v34  ;;  %v110_v35 = vmul.f32 %v72_v23, %v28_v19  ;;  %v32_v34 = vld [vmem:[%s2026_s0 + $0x60] sm:$0xff] }
  0x3f   :  { %1385 = vmatpush3.bf16.msra.mxu0 %v1532_v26  ;;  %v31_v26 = vld [vmem:[%s2026_s0 + $0x58] sm:$0xff]  ;;  %v111_v33 = vmul.f32 %v76_v21, %v29_v16  ;;  %v112_v40 = vmul.f32 %v80_v30, %v30_v27  ;;  %v114_v36 = vmul.f32 %v88_v37, %v32_v34  ;;  %v141_v18 = vpack.c.bf16 %v32_v34, %v32_v34 }
  0x40   :  { %1414 = vmatprep.subr.bf16.mxu0 %v1535_v43  ;;  %v140_v29 = vpack.c.bf16 %v31_v26, %v31_v26  ;;  %v113_v38 = vmul.f32 %v84_v28, %v31_v26  ;;  %123 = vst [vmem:[%s2028_s4 + $0x40] sm:$0xff] %v110_v35 }
  0x41   :  { %1407 = vmatpush3.bf16.msra.mxu1 %v1534_v31  ;;  %v139_v31 = vpack.c.bf16 %v30_v27, %v30_v27  ;;  %124 = vst [vmem:[%s2028_s4 + $0x48] sm:$0xff] %v111_v33  ;;  %125 = vst [vmem:[%s2028_s4 + $0x50] sm:$0xff] %v112_v40 }
  0x42   :  { %1049 = vmatmul.mubr.bf16.vlgmr.msra.gmra.mrb[4].mxu0 %v133_v42  ;;  %1436 = vmatprep.subr.bf16.mxu1 %v1537_v47  ;;  %126 = vst [vmem:[%s2028_s4 + $0x58] sm:$0xff] %v113_v38  ;;  %128 = vst.msk [vmem:[%s2028_s4 + $0x60] sm:$0xff] %vm127_vm1, %v114_v36  ;;  %v1226_v42 = vld [vmem:[%s2029_s3] ss:$0 sm:$0xff] }
  0x43   :  { %1415 = vmatpush3.bf16.msra.mxu0 %v1536_v39  ;;  %1128 = vmatprep.mubr.bf16.mxu0 %v138_v22 }
  0x44   :  { %1089 = vmatmul.mubr.bf16.vlgmr.msra.gmra.mrb[4].mxu1 %v135_v50  ;;  %1416 = vmatprep.subr.bf16.mxu0 %v1539_v52 }
  0x45   :  { %1437 = vmatpush3.bf16.msra.mxu1 %v1538_v51  ;;  %1168 = vmatprep.mubr.bf16.mxu1 %v140_v29 }
  0x46   :  { %1438 = vmatprep.subr.bf16.mxu1 %v1541_v54 }
  0x47   :  { %1417 = vmatpush3.bf16.msra.mxu0 %v1540_v53 }
  0x48   :  { %1418 = vmatprep.subr.bf16.mxu0 %v1543_v56 }
  0x49   :  { %1439 = vmatpush3.bf16.msra.mxu1 %v1542_v55 }
  0x4a   :  { %1440 = vmatprep.subr.bf16.mxu1 %v1545_v58 }
  0x4b   :  { %1419 = vmatpush3.bf16.msra.mxu0 %v1544_v57 }
  0x4c   :  { %1420 = vmatprep.subr.bf16.mxu0 %v1547_v60 }
  0x4d   :  { %1441 = vmatpush3.bf16.msra.mxu1 %v1546_v59 }
  0x4e   :  { %1442 = vmatprep.subr.bf16.mxu1 %v1549_v62 }
  0x4f   :  { %1421 = vmatpush3.bf16.msra.mxu0 %v1548_v61 }
  0x50   :  { %1422 = vmatprep.subr.bf16.mxu0 %v1551_v0 }
  0x51   :  { %1443 = vmatpush3.bf16.msra.mxu1 %v1550_v63 }
  0x52   :  { %1444 = vmatprep.subr.bf16.mxu1 %v1553_v2 }
  0x53   :  { %1423 = vmatpush3.bf16.msra.mxu0 %v1552_v1 }
  0x54   :  { %1424 = vmatprep.subr.bf16.mxu0 %v1555_v4 }
  0x55   :  { %1445 = vmatpush3.bf16.msra.mxu1 %v1554_v3 }
  0x56   :  { %1446 = vmatprep.subr.bf16.mxu1 %v1557_v6 }
  0x57   :  { %1425 = vmatpush3.bf16.msra.mxu0 %v1556_v5 }
  0x58   :  { %1426 = vmatprep.subr.bf16.mxu0 %v1559_v8 }
  0x59   :  { %1447 = vmatpush3.bf16.msra.mxu1 %v1558_v7 }
  0x5a   :  { %1448 = vmatprep.subr.bf16.mxu1 %v1561_v10 }
  0x5b   :  { %1427 = vmatpush3.bf16.msra.mxu0 %v1560_v9 }
  0x5c   :  { %1428 = vmatprep.subr.bf16.mxu0 %v1563_v12 }
  0x5d   :  { %1449 = vmatpush3.bf16.msra.mxu1 %v1562_v11 }
  0x5e   :  { %1450 = vmatprep.subr.bf16.mxu1 %v1565_v14 }
  0x5f   :  { %1429 = vmatpush3.bf16.msra.mxu0 %v1564_v13 }
  0x60   :  { %1461 = vmatprep.subr.bf16.mxu0 %v1569_v20 }
  0x61   :  { %1451 = vmatpush3.bf16.msra.mxu1 %v1566_v15 }
  0x62   :  { %1129 = vmatmul.mubr.bf16.vlgmr.msra.gmra.mrb[8].mxu0 %v137_v24 }
  0x63   :  { %1462 = vmatpush3.bf16.msra.mxu0 %v1567_v32  ;;  %1465 = vmatprep.mubr.msk.bf16.mxu0 %vm1570_vm0, %v1569_v20 }
  0x64   :  { %1169 = vmatmul.mubr.bf16.vlgmr.msra.gmra.mrb[8].mxu1 %v139_v31  ;;  %1463 = vmatprep.subr.bf16.mxu0 %v1569_v20 }
  0x67   :  { %1464 = vmatpush3.bf16.msra.mxu0 %v1568_v25 }
  0x6a   :  { %1466 = vmatmul.mubr.msk.bf16.vlgmr.msra.gmra.mrb[12].mxu0 %vm127_vm1, %v141_v18 }
  0xf5   :  { %v1342_v41 = vpop.f32.mrb[0].mxu0 }
  0xf6   :  { %v1343_v43 = vpop.f32.mrb[1].mxu0 }
  0xf7   :  { %v1344_v44 = vadd.f32 %v1343_v43, %v1342_v41  ;;  %v1345_v45 = vpop.f32.mrb[2].mxu0  ;;  %v1364_v46 = vpop.f32.mrb[0].mxu1 }
  0xf8   :  { %v1346_v39 = vpop.f32.mrb[3].mxu0  ;;  %v1365_v48 = vpop.f32.mrb[1].mxu1 }
  0xf9   :  { %v971_v47 = vadd.f32 %v1344_v44, %v1226_v42  ;;  %v1366_v49 = vadd.f32 %v1365_v48, %v1364_v46  ;;  %v1367_v50 = vpop.f32.mrb[2].mxu1 }
  0xfa   :  { %v1368_v51 = vpop.f32.mrb[3].mxu1 }
  0xfb   :  { %v1011_v52 = vadd.f32 %v1366_v49, %v971_v47 }
 0x115   :  { %v1386_v53 = vpop.f32.mrb[4].mxu0 }
 0x116   :  { %v1387_v54 = vpop.f32.mrb[5].mxu0 }
 0x117   :  { %v1388_v55 = vadd.f32 %v1387_v54, %v1386_v53  ;;  %v1389_v56 = vpop.f32.mrb[6].mxu0  ;;  %v1408_v57 = vpop.f32.mrb[4].mxu1 }
 0x118   :  { %v1390_v58 = vpop.f32.mrb[7].mxu0  ;;  %v1409_v60 = vpop.f32.mrb[5].mxu1 }
 0x119   :  { %v1051_v59 = vadd.f32 %v1388_v55, %v1011_v52  ;;  %v1410_v61 = vadd.f32 %v1409_v60, %v1408_v57  ;;  %v1411_v62 = vpop.f32.mrb[6].mxu1 }
 0x11a   :  { %v1412_v63 = vpop.f32.mrb[7].mxu1 }
 0x11b   :  { %v1091_v0 = vadd.f32 %v1410_v61, %v1051_v59 }
 0x135   :  { %v1430_v1 = vpop.f32.mrb[8].mxu0 }
 0x136   :  { %v1431_v2 = vpop.f32.mrb[9].mxu0 }
 0x137   :  { %v1452_v3 = vpop.f32.mrb[8].mxu1  ;;  %v1432_v4 = vadd.f32 %v1431_v2, %v1430_v1  ;;  %v1433_v5 = vpop.f32.mrb[10].mxu0 }
 0x138   :  { %v1453_v6 = vpop.f32.mrb[9].mxu1  ;;  %v1434_v8 = vpop.f32.mrb[11].mxu0 }
 0x139   :  { %v1454_v7 = vadd.f32 %v1453_v6, %v1452_v3  ;;  %v1455_v9 = vpop.f32.mrb[10].mxu1  ;;  %v1131_v10 = vadd.f32 %v1432_v4, %v1091_v0 }
 0x13a   :  { %v1456_v11 = vpop.f32.mrb[11].mxu1 }
 0x13b   :  { %v1171_v12 = vadd.f32 %v1454_v7, %v1131_v10 }
 0x13d   :  { %v1210_v13 = vpop.f32.mrb[12].mxu0 }
 0x13e   :  { %v1211_v14 = vadd.f32 %v1210_v13, %v1171_v12  ;;  %v1467_v15 = vpop.f32.mrb[13].mxu0 }
 0x13f   :  { %v1213_v16 = vpop.f32.mrb[14].mxu0 }
 0x140   :  { %1217 = vst.msk [vmem:[%s2030_s5] sm:$0xff] %vm1216_vm2, %v1211_v14  ;;  %v1468_v17 = vpop.f32.mrb[15].mxu0 }

</bundles_post_ra>
